<compile_context>
chip_gen: v7x
topology: tpu7x:2x2x1
jax: 0.10.0
libtpu: 0.0.40
codegen_flags: <defaults>
</compile_context>

<pallas_src>
import functools

import jax
import jax.numpy as jnp
from jax.experimental import pallas as pl
from jax.experimental.pallas import tpu as pltpu


# ---------------------------------------------------------------------------
# Fused model kernel: gat1 -> ELU -> gat2 -> log_softmax
# ---------------------------------------------------------------------------
def _gat_model_kernel(x_ref, adjb_ref,
                      wl1t_ref, bl1_ref, wr1t_ref, br1_ref, att1_ref, bias1_ref,
                      wl2t_ref, bl2_ref, wr2t_ref, br2_ref, att2_ref, bias2_ref,
                      out_ref, *, heads1, negative_slope):
    neg = adjb_ref[...]                      # (N, N) bf16 additive mask: 0 / -1e30
    n = x_ref.shape[0]

    def gat_layer(feat_f32, wlT_b, blT, wrT_b, brT, att_col, bias, heads):
        """GATv2Conv layer. wlT_b/wrT_b: (HD, Din) bf16 (pre-transposed weights),
        blT/brT: (HD, 1) f32, att_col: (HD, 1) f32 (head-major flat), bias (1, HD)."""
        hd = wlT_b.shape[0]
        dh = hd // heads
        # One small transpose of the feature matrix; projections come out
        # pre-transposed so every O(N^2) tensor keeps source axis j on lanes.
        featT_b = feat_f32.T.astype(jnp.bfloat16)                              # (Din, N)
        xl_t = jnp.dot(wlT_b, featT_b, preferred_element_type=jnp.float32) + blT  # (HD, N) sources
        xr_t = jnp.dot(wrT_b, featT_b, preferred_element_type=jnp.float32) + brT  # (HD, N) targets
        # s[d, i, j] = xr[i, d] + xl[j, d]  (lane axis = source j)
        s = xr_t[:, :, None] + xl_t[:, None, :]                                # (HD, N, N)
        s = jnp.maximum(s, negative_slope * s)                                 # LeakyReLU(0.2)
        # Per-head D-reduction: e[h, i, j] = sum_d att[h, d] * s[h*dh+d, i, j]
        w = s * att_col[:, :, None]                                            # (HD, N, N)
        e = w.reshape(heads, dh, n, n).sum(axis=1)                             # (heads, N, N)
        # Masked softmax over sources j (lane axis); bf16 mask upcasts in the add.
        e = e + neg[None, :, :]
        m = jnp.max(e, axis=-1, keepdims=True)                                 # XLU lane reduce
        p = jnp.exp(e - m)                                                     # EUP; masked -> 0
        denom = jnp.sum(p, axis=-1, keepdims=True)                             # >= 1 via self-loops
        alpha = p * pl.reciprocal(denom, approx=True)
        # Heads-batched aggregation on the MXU (bf16 operands, f32 accumulation).
        xl_hd = xl_t.reshape(heads, dh, n)                                     # (heads, dh, N)
        out = jnp.einsum('hij,hdj->ihd',
                         alpha.astype(jnp.bfloat16), xl_hd.astype(jnp.bfloat16),
                         preferred_element_type=jnp.float32).reshape(n, hd)    # (N, HD)
        return out + bias

    x = x_ref[...]

    # Layer 1 (multi-head, concat) + fused ELU (exp only on the <=0 branch).
    h1 = gat_layer(x, wl1t_ref[...], bl1_ref[...], wr1t_ref[...], br1_ref[...],
                   att1_ref[...], bias1_ref[...], heads1)
    h1 = jnp.where(h1 > 0, h1, jnp.exp(jnp.minimum(h1, 0.0)) - 1.0)

    # Layer 2 (single head).
    h2 = gat_layer(h1, wl2t_ref[...], bl2_ref[...], wr2t_ref[...], br2_ref[...],
                   att2_ref[...], bias2_ref[...], 1)

    # Fused log_softmax over classes (dim=1).
    m2 = jnp.max(h2, axis=1, keepdims=True)
    sh = h2 - m2
    lse = jnp.log(jnp.sum(jnp.exp(sh), axis=1, keepdims=True))
    logp = sh - lse

    # Single lane-packed output slab [h | log_softmax(h)] -> one store.
    out_ref[...] = jnp.concatenate([h2, logp], axis=1).astype(out_ref.dtype)


# ---------------------------------------------------------------------------
# Wrappers / parameter helpers
# ---------------------------------------------------------------------------
def init_gatv2_params(key, dim_in, dim_out, heads):
    k1, k2, k3 = jax.random.split(key, 3)
    hd = heads * dim_out
    glorot = lambda k, shape: (jax.random.uniform(k, shape, jnp.float32, -1.0, 1.0)
                               * jnp.sqrt(6.0 / (shape[0] + shape[-1])))
    return {
        "wl": glorot(k1, (dim_in, hd)),
        "bl": jnp.zeros((1, hd), jnp.float32),
        "wr": glorot(k2, (dim_in, hd)),
        "br": jnp.zeros((1, hd), jnp.float32),
        "att": glorot(k3, (heads, dim_out)),
        "bias": jnp.zeros((1, hd), jnp.float32),
    }


def build_adj_bias(edge_index, n):
    """Additive mask (bf16): 0.0 where edge source->target or self-loop, else -1e30.
    The diagonal is always set, so every softmax row has at least one live entry."""
    src, dst = edge_index[0], edge_index[1]
    adj = jnp.full((n, n), -1e30, jnp.float32)
    adj = adj.at[dst, src].set(0.0)
    idx = jnp.arange(n)
    adj = adj.at[idx, idx].set(0.0)
    return adj.astype(jnp.bfloat16)


def _layer_args(p):
    """Pack one GATv2 layer's params in kernel-friendly layouts (bf16 / transposed)."""
    bf = jnp.bfloat16
    return (p["wl"].T.astype(bf), p["bl"].reshape(-1, 1),
            p["wr"].T.astype(bf), p["br"].reshape(-1, 1),
            p["att"].reshape(-1, 1), p["bias"])


def graph_attention_model(x, adj_bias, p1, p2, *, heads, dim_out):
    """Single fused pallas_call for the full forward pass.

    Returns (h, log_softmax(h)), both (N, dim_out) float32.
    """
    n = x.shape[0]
    kernel = functools.partial(_gat_model_kernel, heads1=heads, negative_slope=0.2)
    packed = pl.pallas_call(
        kernel,
        out_shape=jax.ShapeDtypeStruct((n, 2 * dim_out), jnp.float32),
        compiler_params=pltpu.CompilerParams(vmem_limit_bytes=48 * 1024 * 1024),
    )(x, adj_bias, *_layer_args(p1), *_layer_args(p2))
    return packed[:, :dim_out], packed[:, dim_out:]


# ---------------------------------------------------------------------------
# Example run
# ---------------------------------------------------------------------------
if __name__ == "__main__":
    key = jax.random.PRNGKey(0)
    k_x, k_src, k_dst, k_ea, k_p1, k_p2 = jax.random.split(key, 6)

    N, dim_in, dim_h, dim_out, heads, E = 16, 8, 8, 4, 8, 40

    x = jax.random.normal(k_x, (N, dim_in), jnp.float32)
    src = jax.random.randint(k_src, (E,), 0, N)
    dst = jax.random.randint(k_dst, (E,), 0, N)
    edge_index = jnp.stack([src, dst])                        # (2, E) PyG convention
    edge_attr = jax.random.normal(k_ea, (E, 4), jnp.float32)  # ignored (edge_dim=None)

    adj_bias = build_adj_bias(edge_index, N)

    p1 = init_gatv2_params(k_p1, dim_in, dim_h, heads)        # gat1: dim_in -> dim_h, 8 heads
    p2 = init_gatv2_params(k_p2, dim_h * heads, dim_out, 1)   # gat2: dim_h*heads -> dim_out

    h, logp = graph_attention_model(x, adj_bias, p1, p2, heads=heads, dim_out=dim_out)
    jax.block_until_ready((h, logp))

    assert h.shape == (N, dim_out) and logp.shape == (N, dim_out)
    assert bool(jnp.all(jnp.isfinite(h))) and bool(jnp.all(jnp.isfinite(logp)))
    # log_softmax rows must exponentiate to a probability distribution.
    assert bool(jnp.allclose(jnp.sum(jnp.exp(logp), axis=1), 1.0, atol=1e-3))
    print("KERNEL_OK")
</pallas_src>

<mosaic_0001>
module attributes {stable_mosaic.version = 11 : i64} {
  func.func @_gat_model_kernel(%arg0: memref<16x8xf32, #tpu.memory_space<vmem>>, %arg1: memref<16x16xbf16, #tpu.memory_space<vmem>>, %arg2: memref<64x8xbf16, #tpu.memory_space<vmem>>, %arg3: memref<64x1xf32, #tpu.memory_space<vmem>>, %arg4: memref<64x8xbf16, #tpu.memory_space<vmem>>, %arg5: memref<64x1xf32, #tpu.memory_space<vmem>>, %arg6: memref<64x1xf32, #tpu.memory_space<vmem>>, %arg7: memref<1x64xf32, #tpu.memory_space<vmem>>, %arg8: memref<4x64xbf16, #tpu.memory_space<vmem>>, %arg9: memref<4x1xf32, #tpu.memory_space<vmem>>, %arg10: memref<4x64xbf16, #tpu.memory_space<vmem>>, %arg11: memref<4x1xf32, #tpu.memory_space<vmem>>, %arg12: memref<4x1xf32, #tpu.memory_space<vmem>>, %arg13: memref<1x4xf32, #tpu.memory_space<vmem>>, %arg14: memref<16x8xf32, #tpu.memory_space<vmem>>) attributes {dimension_semantics = [], scalar_prefetch = 0 : i64, scratch_operands = 0 : i64, tpu.core_type = #tpu.core_type<tc>} {
    %c0 = arith.constant 0 : index
    %c0_0 = arith.constant 0 : index
    %0 = vector.load %arg1[%c0, %c0_0] : memref<16x16xbf16, #tpu.memory_space<vmem>>, vector<16x16xbf16>
    %c0_1 = arith.constant 0 : index
    %c0_2 = arith.constant 0 : index
    %1 = vector.load %arg0[%c0_1, %c0_2] : memref<16x8xf32, #tpu.memory_space<vmem>>, vector<16x8xf32>
    %c0_3 = arith.constant 0 : index
    %c0_4 = arith.constant 0 : index
    %2 = vector.load %arg2[%c0_3, %c0_4] : memref<64x8xbf16, #tpu.memory_space<vmem>>, vector<64x8xbf16>
    %c0_5 = arith.constant 0 : index
    %c0_6 = arith.constant 0 : index
    %3 = vector.load %arg3[%c0_5, %c0_6] : memref<64x1xf32, #tpu.memory_space<vmem>>, vector<64x1xf32>
    %c0_7 = arith.constant 0 : index
    %c0_8 = arith.constant 0 : index
    %4 = vector.load %arg4[%c0_7, %c0_8] : memref<64x8xbf16, #tpu.memory_space<vmem>>, vector<64x8xbf16>
    %c0_9 = arith.constant 0 : index
    %c0_10 = arith.constant 0 : index
    %5 = vector.load %arg5[%c0_9, %c0_10] : memref<64x1xf32, #tpu.memory_space<vmem>>, vector<64x1xf32>
    %c0_11 = arith.constant 0 : index
    %c0_12 = arith.constant 0 : index
    %6 = vector.load %arg6[%c0_11, %c0_12] : memref<64x1xf32, #tpu.memory_space<vmem>>, vector<64x1xf32>
    %c0_13 = arith.constant 0 : index
    %c0_14 = arith.constant 0 : index
    %7 = vector.load %arg7[%c0_13, %c0_14] : memref<1x64xf32, #tpu.memory_space<vmem>>, vector<1x64xf32>
    %8 = tpu.transpose %1, [1, 0] : vector<16x8xf32> -> vector<8x16xf32>
    %9 = arith.truncf %8 : vector<8x16xf32> to vector<8x16xbf16>
    %cst = arith.constant dense<0.000000e+00> : vector<64x16xf32>
    %10 = tpu.matmul %2, %9, %cst {dimension_numbers = #tpu.dot_dimension_numbers<[1], [0], [0], [1], [0, 0, 1, 1], [], []>} : vector<64x8xbf16>, vector<8x16xbf16>, vector<64x16xf32> -> vector<64x16xf32>
    %11 = vector.broadcast %3 : vector<64x1xf32> to vector<64x16xf32>
    %12 = arith.addf %10, %11 : vector<64x16xf32>
    %cst_15 = arith.constant dense<0.000000e+00> : vector<64x16xf32>
    %13 = tpu.matmul %4, %9, %cst_15 {dimension_numbers = #tpu.dot_dimension_numbers<[1], [0], [0], [1], [0, 0, 1, 1], [], []>} : vector<64x8xbf16>, vector<8x16xbf16>, vector<64x16xf32> -> vector<64x16xf32>
    %14 = vector.broadcast %5 : vector<64x1xf32> to vector<64x16xf32>
    %15 = arith.addf %13, %14 : vector<64x16xf32>
    %16 = vector.shape_cast %15 : vector<64x16xf32> to vector<64x16x1xf32>
    %17 = vector.shape_cast %12 : vector<64x16xf32> to vector<64x1x16xf32>
    %18 = vector.broadcast %16 : vector<64x16x1xf32> to vector<64x16x16xf32>
    %19 = vector.broadcast %17 : vector<64x1x16xf32> to vector<64x16x16xf32>
    %20 = arith.addf %18, %19 : vector<64x16x16xf32>
    %cst_16 = arith.constant 2.000000e-01 : f32
    %21 = vector.broadcast %cst_16 : f32 to vector<64x16x16xf32>
    %22 = arith.mulf %21, %20 : vector<64x16x16xf32>
    %23 = arith.maximumf %20, %22 : vector<64x16x16xf32>
    %24 = vector.shape_cast %6 : vector<64x1xf32> to vector<64x1x1xf32>
    %25 = vector.broadcast %24 : vector<64x1x1xf32> to vector<64x16x16xf32>
    %26 = arith.mulf %23, %25 : vector<64x16x16xf32>
    %27 = vector.shape_cast %26 : vector<64x16x16xf32> to vector<8x8x16x16xf32>
    %cst_17 = arith.constant dense<0.000000e+00> : vector<8x16x16xf32>
    %28 = vector.multi_reduction <add>, %27, %cst_17 [1] : vector<8x8x16x16xf32> to vector<8x16x16xf32>
    %29 = vector.shape_cast %0 : vector<16x16xbf16> to vector<1x16x16xbf16>
    %30 = arith.extf %29 : vector<1x16x16xbf16> to vector<1x16x16xf32>
    %31 = vector.broadcast %30 : vector<1x16x16xf32> to vector<8x16x16xf32>
    %32 = arith.addf %28, %31 : vector<8x16x16xf32>
    %cst_18 = arith.constant dense<0xFF800000> : vector<8x16xf32>
    %33 = vector.multi_reduction <maximumf>, %32, %cst_18 [2] : vector<8x16x16xf32> to vector<8x16xf32>
    %34 = vector.shape_cast %33 : vector<8x16xf32> to vector<8x16x1xf32>
    %35 = vector.broadcast %34 : vector<8x16x1xf32> to vector<8x16x16xf32>
    %36 = arith.subf %32, %35 : vector<8x16x16xf32>
    %37 = math.exp %36 : vector<8x16x16xf32>
    %cst_19 = arith.constant dense<0.000000e+00> : vector<8x16xf32>
    %38 = vector.multi_reduction <add>, %37, %cst_19 [2] : vector<8x16x16xf32> to vector<8x16xf32>
    %39 = vector.shape_cast %38 : vector<8x16xf32> to vector<8x16x1xf32>
    %40 = tpu.reciprocal %39 {approx = true} : vector<8x16x1xf32> -> vector<8x16x1xf32>
    %41 = vector.broadcast %40 : vector<8x16x1xf32> to vector<8x16x16xf32>
    %42 = arith.mulf %37, %41 : vector<8x16x16xf32>
    %43 = vector.shape_cast %12 : vector<64x16xf32> to vector<8x8x16xf32>
    %44 = arith.truncf %42 : vector<8x16x16xf32> to vector<8x16x16xbf16>
    %45 = arith.truncf %43 : vector<8x8x16xf32> to vector<8x8x16xbf16>
    "tpu.trace_start"() <{level = 10 : i32, message = "hij,hdj->ihd"}> : () -> ()
    %cst_20 = arith.constant dense<0.000000e+00> : vector<8x8x16xf32>
    %46 = tpu.matmul %45, %44, %cst_20 {dimension_numbers = #tpu.dot_dimension_numbers<[2], [2], [1], [1], [0, 0, 0, 1, 1, 1], [0], [0]>} : vector<8x8x16xbf16>, vector<8x16x16xbf16>, vector<8x8x16xf32> -> vector<8x8x16xf32>
    %47 = tpu.transpose %46, [2, 0, 1] : vector<8x8x16xf32> -> vector<16x8x8xf32>
    "tpu.trace_stop"() : () -> ()
    %48 = vector.shape_cast %47 : vector<16x8x8xf32> to vector<16x64xf32>
    %49 = vector.broadcast %7 : vector<1x64xf32> to vector<16x64xf32>
    %50 = arith.addf %48, %49 : vector<16x64xf32>
    %cst_21 = arith.constant 0.000000e+00 : f32
    %51 = vector.broadcast %cst_21 : f32 to vector<16x64xf32>
    %52 = arith.cmpf ogt, %50, %51 : vector<16x64xf32>
    %cst_22 = arith.constant 0.000000e+00 : f32
    %53 = vector.broadcast %cst_22 : f32 to vector<16x64xf32>
    %54 = arith.minimumf %50, %53 : vector<16x64xf32>
    %55 = math.exp %54 : vector<16x64xf32>
    %cst_23 = arith.constant 1.000000e+00 : f32
    %56 = vector.broadcast %cst_23 : f32 to vector<16x64xf32>
    %57 = arith.subf %55, %56 : vector<16x64xf32>
    %58 = arith.select %52, %50, %57 : vector<16x64xi1>, vector<16x64xf32>
    %c0_24 = arith.constant 0 : index
    %c0_25 = arith.constant 0 : index
    %59 = vector.load %arg8[%c0_24, %c0_25] : memref<4x64xbf16, #tpu.memory_space<vmem>>, vector<4x64xbf16>
    %c0_26 = arith.constant 0 : index
    %c0_27 = arith.constant 0 : index
    %60 = vector.load %arg9[%c0_26, %c0_27] : memref<4x1xf32, #tpu.memory_space<vmem>>, vector<4x1xf32>
    %c0_28 = arith.constant 0 : index
    %c0_29 = arith.constant 0 : index
    %61 = vector.load %arg10[%c0_28, %c0_29] : memref<4x64xbf16, #tpu.memory_space<vmem>>, vector<4x64xbf16>
    %c0_30 = arith.constant 0 : index
    %c0_31 = arith.constant 0 : index
    %62 = vector.load %arg11[%c0_30, %c0_31] : memref<4x1xf32, #tpu.memory_space<vmem>>, vector<4x1xf32>
    %c0_32 = arith.constant 0 : index
    %c0_33 = arith.constant 0 : index
    %63 = vector.load %arg12[%c0_32, %c0_33] : memref<4x1xf32, #tpu.memory_space<vmem>>, vector<4x1xf32>
    %c0_34 = arith.constant 0 : index
    %c0_35 = arith.constant 0 : index
    %64 = vector.load %arg13[%c0_34, %c0_35] : memref<1x4xf32, #tpu.memory_space<vmem>>, vector<1x4xf32>
    %65 = tpu.transpose %58, [1, 0] : vector<16x64xf32> -> vector<64x16xf32>
    %66 = arith.truncf %65 : vector<64x16xf32> to vector<64x16xbf16>
    %cst_36 = arith.constant dense<0.000000e+00> : vector<4x16xf32>
    %67 = tpu.matmul %59, %66, %cst_36 {dimension_numbers = #tpu.dot_dimension_numbers<[1], [0], [0], [1], [0, 0, 1, 1], [], []>} : vector<4x64xbf16>, vector<64x16xbf16>, vector<4x16xf32> -> vector<4x16xf32>
    %68 = vector.broadcast %60 : vector<4x1xf32> to vector<4x16xf32>
    %69 = arith.addf %67, %68 : vector<4x16xf32>
    %cst_37 = arith.constant dense<0.000000e+00> : vector<4x16xf32>
    %70 = tpu.matmul %61, %66, %cst_37 {dimension_numbers = #tpu.dot_dimension_numbers<[1], [0], [0], [1], [0, 0, 1, 1], [], []>} : vector<4x64xbf16>, vector<64x16xbf16>, vector<4x16xf32> -> vector<4x16xf32>
    %71 = vector.broadcast %62 : vector<4x1xf32> to vector<4x16xf32>
    %72 = arith.addf %70, %71 : vector<4x16xf32>
    %73 = vector.shape_cast %72 : vector<4x16xf32> to vector<4x16x1xf32>
    %74 = vector.shape_cast %69 : vector<4x16xf32> to vector<4x1x16xf32>
    %75 = vector.broadcast %73 : vector<4x16x1xf32> to vector<4x16x16xf32>
    %76 = vector.broadcast %74 : vector<4x1x16xf32> to vector<4x16x16xf32>
    %77 = arith.addf %75, %76 : vector<4x16x16xf32>
    %cst_38 = arith.constant 2.000000e-01 : f32
    %78 = vector.broadcast %cst_38 : f32 to vector<4x16x16xf32>
    %79 = arith.mulf %78, %77 : vector<4x16x16xf32>
    %80 = arith.maximumf %77, %79 : vector<4x16x16xf32>
    %81 = vector.shape_cast %63 : vector<4x1xf32> to vector<4x1x1xf32>
    %82 = vector.broadcast %81 : vector<4x1x1xf32> to vector<4x16x16xf32>
    %83 = arith.mulf %80, %82 : vector<4x16x16xf32>
    %84 = vector.shape_cast %83 : vector<4x16x16xf32> to vector<1x4x16x16xf32>
    %cst_39 = arith.constant dense<0.000000e+00> : vector<1x16x16xf32>
    %85 = vector.multi_reduction <add>, %84, %cst_39 [1] : vector<1x4x16x16xf32> to vector<1x16x16xf32>
    %86 = vector.shape_cast %0 : vector<16x16xbf16> to vector<1x16x16xbf16>
    %87 = arith.extf %86 : vector<1x16x16xbf16> to vector<1x16x16xf32>
    %88 = arith.addf %85, %87 : vector<1x16x16xf32>
    %cst_40 = arith.constant dense<0xFF800000> : vector<1x16xf32>
    %89 = vector.multi_reduction <maximumf>, %88, %cst_40 [2] : vector<1x16x16xf32> to vector<1x16xf32>
    %90 = vector.shape_cast %89 : vector<1x16xf32> to vector<1x16x1xf32>
    %91 = vector.broadcast %90 : vector<1x16x1xf32> to vector<1x16x16xf32>
    %92 = arith.subf %88, %91 : vector<1x16x16xf32>
    %93 = math.exp %92 : vector<1x16x16xf32>
    %cst_41 = arith.constant dense<0.000000e+00> : vector<1x16xf32>
    %94 = vector.multi_reduction <add>, %93, %cst_41 [2] : vector<1x16x16xf32> to vector<1x16xf32>
    %95 = vector.shape_cast %94 : vector<1x16xf32> to vector<1x16x1xf32>
    %96 = tpu.reciprocal %95 {approx = true} : vector<1x16x1xf32> -> vector<1x16x1xf32>
    %97 = vector.broadcast %96 : vector<1x16x1xf32> to vector<1x16x16xf32>
    %98 = arith.mulf %93, %97 : vector<1x16x16xf32>
    %99 = vector.shape_cast %69 : vector<4x16xf32> to vector<1x4x16xf32>
    %100 = arith.truncf %98 : vector<1x16x16xf32> to vector<1x16x16xbf16>
    %101 = arith.truncf %99 : vector<1x4x16xf32> to vector<1x4x16xbf16>
    "tpu.trace_start"() <{level = 10 : i32, message = "hij,hdj->ihd"}> : () -> ()
    %cst_42 = arith.constant dense<0.000000e+00> : vector<1x4x16xf32>
    %102 = tpu.matmul %101, %100, %cst_42 {dimension_numbers = #tpu.dot_dimension_numbers<[2], [2], [1], [1], [0, 0, 0, 1, 1, 1], [0], [0]>} : vector<1x4x16xbf16>, vector<1x16x16xbf16>, vector<1x4x16xf32> -> vector<1x4x16xf32>
    %103 = tpu.transpose %102, [2, 0, 1] : vector<1x4x16xf32> -> vector<16x1x4xf32>
    "tpu.trace_stop"() : () -> ()
    %104 = vector.shape_cast %103 : vector<16x1x4xf32> to vector<16x4xf32>
    %105 = vector.broadcast %64 : vector<1x4xf32> to vector<16x4xf32>
    %106 = arith.addf %104, %105 : vector<16x4xf32>
    %cst_43 = arith.constant dense<0xFF800000> : vector<16xf32>
    %107 = vector.multi_reduction <maximumf>, %106, %cst_43 [1] : vector<16x4xf32> to vector<16xf32>
    %108 = vector.shape_cast %107 : vector<16xf32> to vector<16x1xf32>
    %109 = vector.broadcast %108 : vector<16x1xf32> to vector<16x4xf32>
    %110 = arith.subf %106, %109 : vector<16x4xf32>
    %111 = math.exp %110 : vector<16x4xf32>
    %cst_44 = arith.constant dense<0.000000e+00> : vector<16xf32>
    %112 = vector.multi_reduction <add>, %111, %cst_44 [1] : vector<16x4xf32> to vector<16xf32>
    %113 = vector.shape_cast %112 : vector<16xf32> to vector<16x1xf32>
    %114 = math.log %113 : vector<16x1xf32>
    %115 = vector.broadcast %114 : vector<16x1xf32> to vector<16x4xf32>
    %116 = arith.subf %110, %115 : vector<16x4xf32>
    %117 = tpu.concatenate %106, %116 in 1 : vector<16x4xf32>, vector<16x4xf32> -> vector<16x8xf32>
    %c0_45 = arith.constant 0 : index
    %c0_46 = arith.constant 0 : index
    %118 = vector.load %arg14[%c0_45, %c0_46] : memref<16x8xf32, #tpu.memory_space<vmem>>, vector<16x8xf32>
    tpu.vector_store %arg14[%c0_45, %c0_46], %117 {strides = array<i32>} : memref<16x8xf32, #tpu.memory_space<vmem>>, vector<16x8xf32>,
    return
  }
}

</mosaic_0001>

<bundles_post_ra>
// kernel: tpu_custom_call.1
= control target key start
LH: loop header
LB: loop body
LE: loop exit
PB: predicated region body
PF: predicated region fallthrough
CT: control target
= control target key end

     0   :  { %v6158_v1 = vmov 0   ;;  %vm186_vm0 = vcmask 64512   ;;  %v405_v12 = vlaneseq  ;;  %v6159_v13 = vmov 1966171168   ;;  %s6166_s26 = smov 24   ;;  %s6168_s27 = smov 40   ;;  %s8816_s0 = inlined_call_operand.vmem [shape: f32[16,8], index: 0, kind: input, shape index: {}]   ;;  %s8817_s5 = inlined_call_operand.vmem [shape: f32[64,1], index: 5, kind: input, shape index: {}]   ;;  %s8818_s2 = inlined_call_operand.vmem [shape: bf16[64,8], index: 2, kind: input, shape index: {}]   ;;  %s8819_s4 = inlined_call_operand.vmem [shape: bf16[64,8], index: 4, kind: input, shape index: {}]   ;;  %s8820_s3 = inlined_call_operand.vmem [shape: f32[64,1], index: 3, kind: input, shape index: {}]   ;;  %s8821_s6 = inlined_call_operand.vmem [shape: f32[64,1], index: 6, kind: input, shape index: {}]   ;;  %s8822_s1 = inlined_call_operand.vmem [shape: bf16[16,16], index: 1, kind: input, shape index: {}]   ;;  %s8823_s11 = inlined_call_operand.vmem [shape: f32[4,1], index: 11, kind: input, shape index: {}]   ;;  %s8824_s12 = inlined_call_operand.vmem [shape: f32[4,1], index: 12, kind: input, shape index: {}]   ;;  %s8825_s9 = inlined_call_operand.vmem [shape: f32[4,1], index: 9, kind: input, shape index: {}]   ;;  %s8826_s7 = inlined_call_operand.vmem [shape: f32[1,64], index: 7, kind: input, shape index: {}]   ;;  %s8827_s8 = inlined_call_operand.vmem [shape: bf16[4,64], index: 8, kind: input, shape index: {}]   ;;  %s8828_s10 = inlined_call_operand.vmem [shape: bf16[4,64], index: 10, kind: input, shape index: {}]   ;;  %s8829_s13 = inlined_call_operand.vmem [shape: f32[1,4], index: 13, kind: input, shape index: {}]   ;;  %s8830_s14 = inlined_call_operand.vmem [shape: f32[16,8], index: 14, kind: output, shape index: {}]  }
   0x1   :  { %v50_v0 = vld [vmem:[%s8816_s0] sm:$0xff]  ;;  %6028 = vset.pattern.permute.xlu1 %v6158_v1  ;;  %v51_v3 = vld [vmem:[%s8816_s0 + $0x8] sm:$0xff]  ;;  %v79_v5 = vld [vmem:[%s8817_s5 + $0x18] sm:$0xff]  ;;  %v1119_v14 = vunpack.c.l.s4 %v6159_v13  ;;  %vm199_vm1 = vcmask 1043456   ;;  %vm3253_vm2 = vcmask 130048   ;;  %vm6161_vm3 = vmmov 0  }
   0x2   :  { %v76_v2 = vld [vmem:[%s8817_s5] sm:$0xff]  ;;  %93 = vxpose.xlu0.b32.start [1/2] (short) (narrow) %v50_v0, 8  ;;  %v77_v4 = vld [vmem:[%s8817_s5 + $0x8] sm:$0xff]  ;;  %v82_v10 = vld [vmem:[%s8817_s5 + $0x30] sm:$0xff]  ;;  %v6285_v16 = vshrl.u32 %v405_v12, 7  ;;  %s6167_s0 = smov 32  }
   0x3   :  { %270 = vperm.xlu1 %6028, %v76_v2   ;;  %v6030_v6 = vld [vmem:[%s8818_s2] sm:$0xff]   ;;  %v81_v9 = vld [vmem:[%s8817_s5 + $0x28] sm:$0xff]  ;;  %v83_v11 = vld [vmem:[%s8817_s5 + $0x38] sm:$0xff]  ;;  %v1120_v17 = vunpack.c.0.s8 %v1119_v14  ;;  %s6169_s28 = smov 48   ;;  %s6170_s29 = smov 56   ;;  %vm4932_vm4 = vcmask 195584  }
   0x4   :  { %v6031_v7 = vld [vmem:[%s8819_s4] sm:$0xff]   ;;  %5916 = vmatprep.mubr.msk.bf16.mxu0 %vm186_vm0, %v6030_v6  ;;  %8960 = vst [vmem:[#allocation2_spill] sm:$0xff] %v6285_v16  ;;  %v61_v18 = vld [vmem:[%s8820_s3 + $0x8] sm:$0xff]  ;;  %v62_v20 = vld [vmem:[%s8820_s3 + $0x10] sm:$0xff]  ;;  %v6315_v30 = vsub.s32 0, %v6285_v16  ;;  %vm4935_vm5 = vcmask 261120  }
   0x5   :  { %5926 = vmatprep.mubr.msk.bf16.mxu1 %vm186_vm0, %v6031_v7  ;;  %v80_v8 = vld [vmem:[%s8817_s5 + $0x20] sm:$0xff]  ;;  %v6291_v19 = vsub.s32 %v1120_v17, %v6285_v16  ;;  %v63_v23 = vld [vmem:[%s8820_s3 + $0x18] sm:$0xff]  ;;  %v85_v24 = vld [vmem:[%s8821_s6 + $0x8] sm:$0xff]  ;;  %vm4938_vm6 = vcmask 326656   ;;  %vm4941_vm7 = vcmask 392192   ;;  %vm4944_vm8 = vcmask 457728  }
   0x6   :  { %94 = vxpose.xlu0.b32.end [2/2] (short) (narrow) %v51_v3, 8  ;;  %v60_v15 = vld [vmem:[%s8820_s3] sm:$0xff]  ;;  %v78_v29 = vld [vmem:[%s8817_s5 + $0x10] sm:$0xff]  ;;  %8962 = vst [vmem:[#allocation4_spill] sm:$0xff] %v6315_v30  ;;  %v65_v33 = vld [vmem:[%s8820_s3 + $0x28] sm:$0xff]  ;;  %v2270_v43 = vcombine.high %v85_v24, %v85_v24  ;;  %vm5014_vm11 = vcmask 523264  }
   0x7   :  { %275 = vperm.xlu1 %6028, %v77_v4   ;;  %8961 = vst [vmem:[#allocation3_spill] sm:$0xff] %v6291_v19  ;;  %v84_v21 = vld [vmem:[%s8821_s6] sm:$0xff]  ;;  %v2277_v26 = vrot.slane %v85_v24, %v6291_v19  ;;  %v86_v54 = vld [vmem:[%s8821_s6 + $0x10] sm:$0xff]  ;;  %v87_v60 = vld [vmem:[%s8821_s6 + $0x18] sm:$0xff]  ;;  %vm5539_vm12 = vcmask 1041409   ;;  %vm5542_vm13 = vcmask 1042434  }
   0x8   :  { %v2228_v22 = vrot.slane %v84_v21, %v6291_v19  ;;  %v64_v27 = vld [vmem:[%s8820_s3 + $0x20] sm:$0xff]  ;;  %v2221_v40 = vcombine.high %v84_v21, %v84_v21  ;;  %v2284_v49 = vrot.slane %v2270_v43, %v6291_v19  ;;  %v2326_v59 = vrot.slane %v86_v54, %v6291_v19  ;;  %v66_v62 = vld [vmem:[%s8820_s3 + $0x30] sm:$0xff]  ;;  %v67_v2 = vld [vmem:[%s8820_s3 + $0x38] sm:$0xff]  ;;  %s6165_s3 = smov 16  }
   0x9   :  { %v2285_v32 = vcombine.high %v2277_v26, %v2277_v26  ;;  %v2293_v37 = vrot.slane %v2277_v26, %v6291_v19  ;;  %v2319_v24 = vcombine.high %v86_v54, %v86_v54  ;;  %v89_v43 = vld [vmem:[%s8821_s6 + $0x28] sm:$0xff]  ;;  %vm5545_vm14 = vcmask 1043459  }
   0xa   :  { %v2236_v25 = vcombine.high %v2228_v22, %v2228_v22  ;;  %v2244_v28 = vrot.slane %v2228_v22, %v6291_v19  ;;  %v2235_v46 = vrot.slane %v2221_v40, %v6291_v19  ;;  %v2300_v53 = vrot.slane %v2284_v49, %v6291_v19 }
   0xb   :  { %285 = vperm.xlu1 %6028, %v79_v5   ;;  %v2307_v36 = vrot.slane %v2285_v32, %v6291_v19  ;;  %v2648_v38 = vrot.slane %v2293_v37, %v6315_v30  ;;  %v2315_v42 = vcombine.high %v2293_v37, %v2293_v37  ;;  %v2286_v58 = vcombine.high %v2284_v49, %v2284_v49 }
   0xc   :  { %v2258_v31 = vrot.slane %v2236_v25, %v6291_v19  ;;  %v2616_v34 = vrot.slane %v2244_v28, %v6315_v30  ;;  %v2266_v39 = vcombine.high %v2244_v28, %v2244_v28  ;;  %v2251_v51 = vrot.slane %v2235_v46, %v6291_v19 }
   0xd   :  { %v2652_v41 = vrot.slane %v2307_v36, %v6315_v30  ;;  %v2656_v47 = vrot.slane %v2315_v42, %v6315_v30  ;;  %v2317_v48 = vcombine.high %v2307_v36, %v2307_v36  ;;  %v2237_v56 = vcombine.high %v2235_v46, %v2235_v46 }
   0xe   :  { %v2620_v35 = vrot.slane %v2258_v31, %v6315_v30  ;;  %v2624_v44 = vrot.slane %v2266_v39, %v6315_v30  ;;  %v2268_v45 = vcombine.high %v2258_v31, %v2258_v31  ;;  %v2632_v55 = vrot.slane %v2251_v51, %v6315_v30 }
   0xf   :  { %290 = vperm.xlu1 %6028, %v80_v8   ;;  %v2660_v52 = vrot.slane %v2317_v48, %v6315_v30  ;;  %v2664_v57 = vrot.slane %v2300_v53, %v6315_v30  ;;  %v2265_v61 = vrot.slane %v2237_v56, %v6291_v19  ;;  %v2314_v63 = vrot.slane %v2286_v58, %v6291_v19 }
  0x10   :  { %v2628_v50 = vrot.slane %v2268_v45, %v6315_v30  ;;  %v2334_v0 = vcombine.high %v2326_v59, %v2326_v59  ;;  %v2342_v4 = vrot.slane %v2326_v59, %v6291_v19  ;;  %v2267_v13 = vcombine.high %v2251_v51, %v2251_v51 }
  0x11   :  { %v2636_v3 = vrot.slane %v2265_v61, %v6315_v30  ;;  %v2668_v5 = vrot.slane %v2314_v63, %v6315_v30  ;;  %v2318_v26 = vcombine.high %v2314_v63, %v2314_v63  ;;  %v2333_v31 = vrot.slane %v2319_v24, %v6291_v19 }
  0x12   :  { %v2356_v6 = vrot.slane %v2334_v0, %v6291_v19  ;;  %v2680_v8 = vrot.slane %v2342_v4, %v6315_v30  ;;  %v2640_v17 = vrot.slane %v2267_v13, %v6315_v30  ;;  %v2473_v49 = vrot.slane %v89_v43, %v6291_v19 }
  0x13   :  { %295 = vperm.xlu1 %6028, %v81_v9   ;;  %v2676_v32 = vrot.slane %v2318_v26, %v6315_v30  ;;  %v2349_v37 = vrot.slane %v2333_v31, %v6291_v19  ;;  %vm5548_vm15 = vcmask 1044484  }
  0x14   :  { %v2684_v9 = vrot.slane %v2356_v6, %v6315_v30  ;;  %v2481_v54 = vcombine.high %v2473_v49, %v2473_v49  ;;  %v2489_v58 = vrot.slane %v2473_v49, %v6291_v19 }
  0x16   :  { %v2776_v59 = vrot.slane %v2489_v58, %v6315_v30 }
  0x17   :  { %300 = vperm.xlu1 %6028, %v82_v10  }
  0x1b   :  { %305 = vperm.xlu1 %6028, %v83_v11  }
  0x1f   :  { %128 = vperm.xlu1 %6028, %v60_v15   ;;  %v2316_v15 = vcombine.high %v2300_v53, %v2300_v53 }
  0x23   :  { %133 = vperm.xlu1 %6028, %v61_v18   ;;  %v2364_v18 = vcombine.high %v2342_v4, %v2342_v4 }
  0x25   :  { %v2688_v22 = vrot.slane %v2364_v18, %v6315_v30 }
  0x27   :  { %138 = vperm.xlu1 %6028, %v62_v20   ;;  %v2672_v20 = vrot.slane %v2316_v15, %v6315_v30 }
  0x2b   :  { %143 = vperm.xlu1 %6028, %v63_v23   ;;  %v2269_v23 = vcombine.high %v2265_v61, %v2265_v61 }
  0x2d   :  { %v2644_v28 = vrot.slane %v2269_v23, %v6315_v30 }
  0x2f   :  { %148 = vperm.xlu1 %6028, %v64_v27   ;;  %6029 = vset.pattern.permute.xlu0 %v6158_v1  ;;  %v2375_v1 = vrot.slane %v87_v60, %v6291_v19  ;;  %v2368_v27 = vcombine.high %v87_v60, %v87_v60  ;;  %v2365_v60 = vcombine.high %v2349_v37, %v2349_v37 }
  0x30   :  { %280 = vperm.xlu0 %6029, %v78_v29   ;;  %v2366_v29 = vcombine.high %v2356_v6, %v2356_v6 }
  0x31   :  { %v2383_v7 = vcombine.high %v2375_v1, %v2375_v1  ;;  %v2391_v11 = vrot.slane %v2375_v1, %v6291_v19  ;;  %v2704_v63 = vrot.slane %v2365_v60, %v6315_v30 }
  0x32   :  { %v2692_v36 = vrot.slane %v2366_v29, %v6315_v30  ;;  %v6034_v29 = vld [vmem:[%s8819_s4 + $0x8] sm:$0xff]  }
  0x33   :  { %153 = vperm.xlu1 %6028, %v65_v33   ;;  %v2405_v10 = vrot.slane %v2383_v7, %v6291_v19  ;;  %v2712_v12 = vrot.slane %v2391_v11, %v6315_v30  ;;  %v2413_v21 = vcombine.high %v2391_v11, %v2391_v11 }
  0x34   :  { %2870 = vperm.xlu0 %6029, %v2616_v34   ;;  %v2382_v34 = vrot.slane %v2368_v27, %v6291_v19 }
  0x35   :  { %v2716_v14 = vrot.slane %v2405_v10, %v6315_v30  ;;  %v2720_v25 = vrot.slane %v2413_v21, %v6315_v30  ;;  %v2415_v33 = vcombine.high %v2405_v10, %v2405_v10 }
  0x36   :  { %v2398_v40 = vrot.slane %v2382_v34, %v6291_v19 }
  0x37   :  { %2874 = vperm.xlu1 %6028, %v2620_v35   ;;  %v88_v35 = vld [vmem:[%s8821_s6 + $0x20] sm:$0xff]  ;;  %v2724_v39 = vrot.slane %v2415_v33, %v6315_v30 }
  0x38   :  { %2902 = vperm.xlu0 %6029, %v2648_v38   ;;  %v2335_v38 = vcombine.high %v2333_v31, %v2333_v31  ;;  %v2424_v42 = vrot.slane %v88_v35, %v6291_v19  ;;  %v2728_v46 = vrot.slane %v2398_v40, %v6315_v30  ;;  %v6035_v31 = vld [vmem:[%s8818_s2 + $0x10] sm:$0xff]  }
  0x3a   :  { %v2363_v45 = vrot.slane %v2335_v38, %v6291_v19  ;;  %v2432_v48 = vcombine.high %v2424_v42, %v2424_v42  ;;  %v2440_v51 = vrot.slane %v2424_v42, %v6291_v19  ;;  %v6038_v38 = vld [vmem:[%s8819_s4 + $0x18] sm:$0xff]  }
  0x3b   :  { %2906 = vperm.xlu1 %6028, %v2652_v41   ;;  %v2384_v41 = vcombine.high %v2382_v34, %v2382_v34 }
  0x3c   :  { %2878 = vperm.xlu0 %6029, %v2624_v44   ;;  %v2696_v44 = vrot.slane %v2349_v37, %v6315_v30  ;;  %v2454_v53 = vrot.slane %v2432_v48, %v6291_v19  ;;  %v2462_v0 = vcombine.high %v2440_v51, %v2440_v51  ;;  %v2367_v4 = vcombine.high %v2363_v45, %v2363_v45  ;;  %v6037_v37 = vld [vmem:[%s8818_s2 + $0x18] sm:$0xff]  }
  0x3e   :  { %v2748_v56 = vrot.slane %v2454_v53, %v6315_v30  ;;  %v2464_v10 = vcombine.high %v2454_v53, %v2454_v53 }
  0x3f   :  { %2910 = vperm.xlu1 %6028, %v2656_v47   ;;  %v2412_v47 = vrot.slane %v2384_v41, %v6291_v19 }
  0x40   :  { %2882 = vperm.xlu0 %6029, %v2628_v50   ;;  %v2700_v50 = vrot.slane %v2363_v45, %v6315_v30  ;;  %v2756_v15 = vrot.slane %v2464_v10, %v6315_v30 }
  0x41   :  { %v2416_v7 = vcombine.high %v2412_v47, %v2412_v47 }
  0x43   :  { %2914 = vperm.xlu1 %6028, %v2660_v52   ;;  %v2732_v52 = vrot.slane %v2412_v47, %v6315_v30 }
  0x44   :  { %2886 = vperm.xlu0 %6029, %v2632_v55   ;;  %v2744_v55 = vrot.slane %v2440_v51, %v6315_v30 }
  0x47   :  { %2918 = vperm.xlu1 %6028, %v2664_v57   ;;  %v2503_v57 = vrot.slane %v2481_v54, %v6291_v19 }
  0x48   :  { %158 = vperm.xlu0 %6029, %v66_v62   ;;  %v2414_v62 = vcombine.high %v2398_v40, %v2398_v40 }
  0x49   :  { %v2780_v61 = vrot.slane %v2503_v57, %v6315_v30  ;;  %v2513_v13 = vcombine.high %v2503_v57, %v2503_v57 }
  0x4a   :  { %v2736_v1 = vrot.slane %v2414_v62, %v6315_v30 }
  0x4b   :  { %163 = vperm.xlu1 %6028, %v67_v2   ;;  %v2511_v2 = vcombine.high %v2489_v58, %v2489_v58 }
  0x4c   :  { %2890 = vperm.xlu0 %6029, %v2636_v3   ;;  %v2752_v3 = vrot.slane %v2462_v0, %v6315_v30 }
  0x4d   :  { %v2784_v6 = vrot.slane %v2511_v2, %v6315_v30 }
  0x4f   :  { %2922 = vperm.xlu1 %6028, %v2668_v5   ;;  %v2417_v5 = vcombine.high %v88_v35, %v88_v35 }
  0x50   :  { %2934 = vperm.xlu0 %6029, %v2680_v8   ;;  %v2466_v8 = vcombine.high %v89_v43, %v89_v43 }
  0x51   :  { %v2431_v11 = vrot.slane %v2417_v5, %v6291_v19 }
  0x53   :  { %2938 = vperm.xlu1 %6028, %v2684_v9   ;;  %v2708_v9 = vrot.slane %v2367_v4, %v6315_v30  ;;  %v2433_v18 = vcombine.high %v2431_v11, %v2431_v11 }
  0x54   :  { %2966 = vperm.xlu0 %6029, %v2712_v12   ;;  %v2740_v12 = vrot.slane %v2416_v7, %v6315_v30 }
  0x55   :  { %v6416_v26 = vrot.slane %v2433_v18, %v6291_v19 }
  0x57   :  { %2970 = vperm.xlu1 %6028, %v2716_v14   ;;  %v2480_v14 = vrot.slane %v2466_v8, %v6291_v19  ;;  %v2764_v35 = vrot.slane %v6416_v26, %v6315_v30 }
  0x58   :  { %2894 = vperm.xlu0 %6029, %v2640_v17   ;;  %v6407_v17 = vrot.slane %v2431_v11, %v6291_v19 }
  0x59   :  { %v6411_v23 = vrot.slane %v2480_v14, %v6291_v19  ;;  %v2482_v24 = vcombine.high %v2480_v14, %v2480_v14 }
  0x5b   :  { %2926 = vperm.xlu1 %6028, %v2672_v20   ;;  %v2792_v33 = vrot.slane %v6411_v23, %v6315_v30  ;;  %v6433_v34 = vrot.slane %v2482_v24, %v6291_v19 }
  0x5c   :  { %2942 = vperm.xlu0 %6029, %v2688_v22   ;;  %v2788_v22 = vrot.slane %v2513_v13, %v6315_v30 }
  0x5f   :  { %2974 = vperm.xlu1 %6028, %v2720_v25   ;;  %v2760_v25 = vrot.slane %v6407_v17, %v6315_v30 }
  0x60   :  { %2898 = vperm.xlu0 %6029, %v2644_v28   ;;  %v6033_v28 = vld [vmem:[%s8818_s2 + $0x8] sm:$0xff]  }
  0x63   :  { %2930 = vperm.xlu1 %6028, %v2676_v32   ;;  %v6036_v32 = vld [vmem:[%s8819_s4 + $0x10] sm:$0xff]  }
  0x64   :  { %2946 = vperm.xlu0 %6029, %v2692_v36   ;;  %v2796_v36 = vrot.slane %v6433_v34, %v6315_v30 }
  0x67   :  { %2978 = vperm.xlu1 %6028, %v2724_v39  }
  0x68   :  { %2950 = vperm.xlu0 %6029, %v2696_v44  }
  0x6b   :  { %2982 = vperm.xlu1 %6028, %v2728_v46  }
  0x6c   :  { %2954 = vperm.xlu0 %6029, %v2700_v50  }
  0x6f   :  { %2986 = vperm.xlu1 %6028, %v2732_v52  }
  0x70   :  { %2998 = vperm.xlu0 %6029, %v2744_v55  }
  0x73   :  { %3002 = vperm.xlu1 %6028, %v2748_v56  }
  0x74   :  { %3030 = vperm.xlu0 %6029, %v2776_v59  }
  0x77   :  { %3034 = vperm.xlu1 %6028, %v2780_v61  }
  0x78   :  { %2958 = vperm.xlu0 %6029, %v2704_v63  }
  0x7b   :  { %2990 = vperm.xlu1 %6028, %v2736_v1  }
  0x7c   :  { %3006 = vperm.xlu0 %6029, %v2752_v3  }
  0x7f   :  { %3038 = vperm.xlu1 %6028, %v2784_v6  }
  0x80   :  { %2962 = vperm.xlu0 %6029, %v2708_v9   ;;  %v6508_v9 = vsub.s32 1, %v6285_v16 }
  0x82   :  { %v109_v20 = vpop.trf.xlu0  ;;  %v6451_v39 = vpop.permute.xlu1 %270  ;;  %8973 = vst [vmem:[#allocation15_spill] sm:$0xff] %v6508_v9 }
  0x83   :  { %2994 = vperm.xlu1 %6028, %v2740_v12   ;;  %v125_v21 = vpack.c.bf16 %v109_v20, %v109_v20 }
  0x84   :  { %3010 = vperm.xlu0 %6029, %v2756_v15  }
  0x85   :  { %6012 = vmatprep.subr.msk.bf16.mxu0 %vm199_vm1, %v125_v21  ;;  %6013 = vmatprep.subr.msk.bf16.mxu1 %vm199_vm1, %v125_v21  ;;  %v201_v27 = vsel %vm199_vm1, %v125_v21, 0  ;;  %vm5551_vm1 = vcmask 1045509  }
  0x86   :  { %5915 = vmatpush3.bf16.msra.mxu0 %v201_v27  ;;  %5925 = vmatpush3.bf16.msra.mxu1 %v201_v27  ;;  %v276_v40 = vpop.permute.xlu1 %275 }
  0x87   :  { %3042 = vperm.xlu1 %6028, %v2788_v22   ;;  %v6525_v22 = vsub.s32 2, %v6285_v16 }
  0x88   :  { %3014 = vperm.xlu0 %6029, %v2760_v25   ;;  %v6530_v25 = vsub.s32 3, %v6285_v16 }
  0x89   :  { %5917 = vmatmul.mubr.msk.bf16.vlgmr.msra.gmra.mrb[0].mxu0 %vm186_vm0, %v6033_v28  ;;  %5927 = vmatmul.mubr.msk.bf16.vlgmr.msra.gmra.mrb[0].mxu1 %vm186_vm0, %v6034_v29  ;;  %8974 = vst [vmem:[#allocation16_spill] sm:$0xff] %v6525_v22 }
  0x8a   :  { %5920 = vmatprep.mubr.msk.bf16.mxu0 %vm186_vm0, %v6035_v31  ;;  %5930 = vmatprep.mubr.msk.bf16.mxu1 %vm186_vm0, %v6036_v32  ;;  %v286_v41 = vpop.permute.xlu1 %285  ;;  %8975 = vst [vmem:[#allocation17_spill] sm:$0xff] %v6530_v25  ;;  %v6541_v32 = vsub.s32 4, %v6285_v16 }
  0x8b   :  { %3046 = vperm.xlu1 %6028, %v2792_v33  }
  0x8c   :  { %3018 = vperm.xlu0 %6029, %v2764_v35   ;;  %v6546_v35 = vsub.s32 5, %v6285_v16 }
  0x8e   :  { %v6453_v42 = vpop.permute.xlu1 %290 }
  0x8f   :  { %3050 = vperm.xlu1 %6028, %v2796_v36   ;;  %v6549_v36 = vsub.s32 6, %v6285_v16 }
  0x91   :  { %5921 = vmatmul.mubr.msk.bf16.gmra.mrb[4].mxu0 %vm186_vm0, %v6037_v37  ;;  %5931 = vmatmul.mubr.msk.bf16.gmra.mrb[4].mxu1 %vm186_vm0, %v6038_v38  ;;  %v6552_v37 = vsub.s32 7, %v6285_v16 }
  0x92   :  { %v6455_v43 = vpop.permute.xlu1 %295 }
  0x96   :  { %v6457_v44 = vpop.permute.xlu1 %300 }
  0x9a   :  { %v6459_v45 = vpop.permute.xlu1 %305 }
  0x9e   :  { %v6461_v46 = vpop.permute.xlu1 %128 }
  0xa2   :  { %v6463_v47 = vpop.permute.xlu1 %133 }
  0xa6   :  { %v6465_v48 = vpop.permute.xlu1 %138 }
  0xaa   :  { %v6467_v49 = vpop.permute.xlu1 %143 }
  0xae   :  { %v6469_v50 = vpop.permute.xlu1 %148 }
  0xaf   :  { %v281_v52 = vpop.permute.xlu0 %280 }
  0xb2   :  { %v6471_v51 = vpop.permute.xlu1 %153 }
  0xb3   :  { %v6475_v54 = vpop.permute.xlu0 %2870 }
  0xb4   :  { %8964 = vst [vmem:[#allocation6_spill] sm:$0xff] %v6475_v54 }
  0xb6   :  { %v6473_v53 = vpop.permute.xlu1 %2874 }
  0xb7   :  { %8963 = vst [vmem:[#allocation5_spill] sm:$0xff] %v6473_v53  ;;  %v6479_v56 = vpop.permute.xlu0 %2902 }
  0xb8   :  { %8966 = vst [vmem:[#allocation8_spill] sm:$0xff] %v6479_v56 }
  0xba   :  { %v6477_v55 = vpop.permute.xlu1 %2906 }
  0xbb   :  { %8965 = vst [vmem:[#allocation7_spill] sm:$0xff] %v6477_v55  ;;  %v6483_v58 = vpop.permute.xlu0 %2878 }
  0xbc   :  { %8968 = vst [vmem:[#allocation10_spill] sm:$0xff] %v6483_v58 }
  0xbe   :  { %v6481_v57 = vpop.permute.xlu1 %2910 }
  0xbf   :  { %8967 = vst [vmem:[#allocation9_spill] sm:$0xff] %v6481_v57  ;;  %v6487_v60 = vpop.permute.xlu0 %2882 }
  0xc0   :  { %8970 = vst [vmem:[#allocation12_spill] sm:$0xff] %v6487_v60 }
  0xc2   :  { %v6485_v59 = vpop.permute.xlu1 %2914 }
  0xc3   :  { %8969 = vst [vmem:[#allocation11_spill] sm:$0xff] %v6485_v59  ;;  %v6503_v7 = vpop.permute.xlu0 %2886 }
  0xc4   :  { %8972 = vst [vmem:[#allocation14_spill] sm:$0xff] %v6503_v7 }
  0xc6   :  { %v6501_v6 = vpop.permute.xlu1 %2918 }
  0xc7   :  { %8971 = vst [vmem:[#allocation13_spill] sm:$0xff] %v6501_v6  ;;  %v6534_v28 = vpop.permute.xlu0 %158 }
  0xca   :  { %v6532_v27 = vpop.permute.xlu1 %163 }
 0x15c   :  { %v6489_v61 = vpop.f32.mrb[0].mxu0  ;;  %v5928_v62 = vpop.f32.mrb[0].mxu1 }
 0x15d   :  { %v6491_v63 = vpop.f32.mrb[1].mxu0  ;;  %v6493_v0 = vpop.f32.mrb[1].mxu1  ;;  %v6497_v3 = vadd.f32 %v5928_v62, %v281_v52 }
 0x15e   :  { %v6495_v1 = vpop.f32.mrb[2].mxu0  ;;  %v5929_v2 = vpop.f32.mrb[2].mxu1 }
 0x15f   :  { %v6499_v4 = vpop.f32.mrb[3].mxu0  ;;  %v377_v5 = vpop.f32.mrb[3].mxu1  ;;  %v584_v8 = vrot.slane %v6497_v3, %v6315_v30  ;;  %v595_v18 = vrot.slane %v6497_v3, %v6508_v9  ;;  %v606_v24 = vrot.slane %v6497_v3, %v6525_v22  ;;  %v6536_v29 = vadd.f32 %v5929_v2, %v286_v41 }
 0x160   :  { %v617_v31 = vrot.slane %v6497_v3, %v6530_v25  ;;  %v6543_v33 = vadd.f32 %v377_v5, %v276_v40  ;;  %v6570_v62 = vpop.permute.xlu1 %2922  ;;  %v6572_v2 = vpop.permute.xlu0 %2890  ;;  %v628_v5 = vrot.slane %v6497_v3, %v6541_v32  ;;  %v650_v59 = vrot.slane %v6497_v3, %v6549_v36 }
 0x161   :  { %590 = vbcast.lane.b32.xlu1 %v584_v8, 264  ;;  %586 = vbcast.lane.b32.xlu0 %v584_v8, 256  ;;  %v6556_v38 = vrot.slane %v6536_v29, %v6541_v32  ;;  %v6560_v41 = vrot.slane %v6536_v29, %v6546_v35  ;;  %v6564_v40 = vrot.slane %v6536_v29, %v6549_v36 }
 0x162   :  { %v6568_v52 = vrot.slane %v6536_v29, %v6552_v37  ;;  %8976 = vst [vmem:[#allocation18_spill] sm:$0xff] %v6570_v62  ;;  %8977 = vst [vmem:[#allocation19_spill] sm:$0xff] %v6572_v2  ;;  %v6593_v16 = vrot.slane %v6543_v33, %v6552_v37  ;;  %v375_v2 = vadd.f32 %v6493_v0, %v6451_v39 }
 0x164   :  { %v6510_v10 = vpop.f32.mrb[4].mxu0  ;;  %v6512_v11 = vpop.f32.mrb[4].mxu1  ;;  %v430_v60 = vrot.slane %v375_v2, %v6525_v22 }
 0x165   :  { %v6514_v12 = vpop.f32.mrb[5].mxu0  ;;  %v390_v13 = vpop.f32.mrb[5].mxu1  ;;  %601 = vbcast.lane.b32.xlu1 %v595_v18, 264  ;;  %597 = vbcast.lane.b32.xlu0 %v595_v18, 256  ;;  %v6581_v18 = vrot.slane %v6543_v33, %v6541_v32 }
 0x166   :  { %v6516_v14 = vpop.f32.mrb[6].mxu0  ;;  %v6518_v15 = vpop.f32.mrb[6].mxu1  ;;  %v6577_v8 = vadd.f32 %v390_v13, %v6453_v42  ;;  %v639_v42 = vrot.slane %v6497_v3, %v6546_v35 }
 0x167   :  { %v6522_v20 = vpop.f32.mrb[7].mxu0  ;;  %v393_v21 = vpop.f32.mrb[7].mxu1  ;;  %v6650_v7 = vadd.f32 %v6518_v15, %v6459_v45 }
 0x168   :  { %v6599_v13 = vrot.slane %v6577_v8, %v6541_v32  ;;  %v6601_v62 = vpop.permute.xlu1 %2938  ;;  %v6603_v6 = vpop.permute.xlu0 %2934 }
 0x169   :  { %612 = vbcast.lane.b32.xlu1 %v606_v24, 264  ;;  %608 = vbcast.lane.b32.xlu0 %v606_v24, 256  ;;  %v6585_v24 = vrot.slane %v6543_v33, %v6546_v35  ;;  %8978 = vst [vmem:[#allocation20_spill] sm:$0xff] %v6603_v6  ;;  %v6693_v53 = vrot.slane %v6650_v7, %v6549_v36 }
 0x16b   :  { %8994 = vst [vmem:[#allocation36_spill] sm:$0xff] %v6693_v53  ;;  %v474_v53 = vrot.slane %v375_v2, %v6549_v36 }
 0x16c   :  { %v6614_v55 = vpop.permute.xlu1 %2970  ;;  %v6616_v56 = vpop.permute.xlu0 %2966 }
 0x16d   :  { %623 = vbcast.lane.b32.xlu1 %v617_v31, 264  ;;  %619 = vbcast.lane.b32.xlu0 %v617_v31, 256  ;;  %v6589_v31 = vrot.slane %v6543_v33, %v6549_v36  ;;  %8979 = vst [vmem:[#allocation21_spill] sm:$0xff] %v6614_v55  ;;  %8980 = vst [vmem:[#allocation22_spill] sm:$0xff] %v6616_v56  ;;  %v6633_v55 = vrot.slane %v6577_v8, %v6549_v36 }
 0x16e   :  { %v419_v56 = vrot.slane %v375_v2, %v6508_v9 }
 0x170   :  { %v6635_v39 = vpop.permute.xlu1 %2926  ;;  %v6637_v0 = vpop.permute.xlu0 %2894 }
 0x171   :  { %634 = vbcast.lane.b32.xlu1 %v628_v5, 264  ;;  %630 = vbcast.lane.b32.xlu0 %v628_v5, 256  ;;  %v6606_v5 = vadd.f32 %v393_v21, %v6455_v43  ;;  %v661_v43 = vrot.slane %v6497_v3, %v6552_v37  ;;  %v6624_v21 = vrot.slane %v6577_v8, %v6546_v35 }
 0x172   :  { %8981 = vst [vmem:[#allocation23_spill] sm:$0xff] %v6635_v39  ;;  %8982 = vst [vmem:[#allocation24_spill] sm:$0xff] %v6637_v0  ;;  %v6654_v39 = vrot.slane %v6577_v8, %v6552_v37 }
 0x173   :  { %v6612_v57 = vrot.slane %v6606_v5, %v6541_v32  ;;  %v6641_v3 = vrot.slane %v6606_v5, %v6549_v36 }
 0x174   :  { %8983 = vst [vmem:[#allocation25_spill] sm:$0xff] %v6654_v39  ;;  %v6658_v0 = vpop.permute.xlu0 %2942 }
 0x175   :  { %645 = vbcast.lane.b32.xlu1 %v639_v42, 264  ;;  %641 = vbcast.lane.b32.xlu0 %v639_v42, 256  ;;  %v408_v42 = vrot.slane %v375_v2, %v6315_v30  ;;  %8985 = vst [vmem:[#allocation27_spill] sm:$0xff] %v6658_v0 }
 0x178   :  { %v6680_v58 = vpop.permute.xlu0 %2898 }
 0x179   :  { %656 = vbcast.lane.b32.xlu1 %v650_v59, 264  ;;  %652 = vbcast.lane.b32.xlu0 %v650_v59, 256  ;;  %v6628_v59 = vrot.slane %v6606_v5, %v6546_v35  ;;  %8991 = vst [vmem:[#allocation33_spill] sm:$0xff] %v6680_v58 }
 0x17d   :  { %667 = vbcast.lane.b32.xlu1 %v661_v43, 264  ;;  %663 = vbcast.lane.b32.xlu0 %v661_v43, 256  ;;  %v6646_v43 = vadd.f32 %v6512_v11, %v6457_v44  ;;  %v6663_v44 = vrot.slane %v6606_v5, %v6552_v37  ;;  %v441_v11 = vrot.slane %v375_v2, %v6530_v25 }
 0x17f   :  { %8986 = vst [vmem:[#allocation28_spill] sm:$0xff] %v6663_v44  ;;  %v6667_v45 = vrot.slane %v6646_v43, %v6541_v32  ;;  %v6676_v15 = vrot.slane %v6646_v43, %v6546_v35  ;;  %v848_v44 = vrot.slane %v6606_v5, %v6315_v30 }
 0x181   :  { %414 = vbcast.lane.b32.xlu1 %v408_v42, 264  ;;  %410 = vbcast.lane.b32.xlu0 %v408_v42, 256  ;;  %v6656_v42 = vpop.permute.xlu1 %2974  ;;  %8987 = vst [vmem:[#allocation29_spill] sm:$0xff] %v6667_v45  ;;  %8989 = vst [vmem:[#allocation31_spill] sm:$0xff] %v6676_v15  ;;  %v452_v45 = vrot.slane %v375_v2, %v6541_v32 }
 0x182   :  { %8984 = vst [vmem:[#allocation26_spill] sm:$0xff] %v6656_v42 }
 0x185   :  { %425 = vbcast.lane.b32.xlu1 %v419_v56, 264  ;;  %421 = vbcast.lane.b32.xlu0 %v419_v56, 256  ;;  %v6671_v56 = vrot.slane %v6650_v7, %v6541_v32  ;;  %v6678_v42 = vpop.permute.xlu1 %2930  ;;  %v6705_v32 = vpop.permute.xlu0 %2946 }
 0x186   :  { %8990 = vst [vmem:[#allocation32_spill] sm:$0xff] %v6678_v42  ;;  %v6697_v42 = vrot.slane %v6646_v43, %v6552_v37  ;;  %8998 = vst [vmem:[#allocation40_spill] sm:$0xff] %v6705_v32 }
 0x187   :  { %8988 = vst [vmem:[#allocation30_spill] sm:$0xff] %v6671_v56  ;;  %v6689_v56 = vrot.slane %v6646_v43, %v6549_v36  ;;  %v683_v36 = vrot.slane %v6536_v29, %v6508_v9 }
 0x188   :  { %8995 = vst [vmem:[#allocation37_spill] sm:$0xff] %v6697_v42 }
 0x189   :  { %436 = vbcast.lane.b32.xlu1 %v430_v60, 264  ;;  %432 = vbcast.lane.b32.xlu0 %v430_v60, 256  ;;  %v6684_v60 = vrot.slane %v6650_v7, %v6546_v35  ;;  %8993 = vst [vmem:[#allocation35_spill] sm:$0xff] %v6689_v56  ;;  %v463_v56 = vrot.slane %v375_v2, %v6546_v35  ;;  %v6711_v58 = vpop.permute.xlu0 %2950 }
 0x18a   :  { %9000 = vst [vmem:[#allocation42_spill] sm:$0xff] %v6711_v58  ;;  %v672_v35 = vrot.slane %v6536_v29, %v6315_v30 }
 0x18b   :  { %8992 = vst [vmem:[#allocation34_spill] sm:$0xff] %v6684_v60  ;;  %v6703_v60 = vpop.permute.xlu1 %2978 }
 0x18c   :  { %8997 = vst [vmem:[#allocation39_spill] sm:$0xff] %v6703_v60 }
 0x18d   :  { %447 = vbcast.lane.b32.xlu1 %v441_v11, 264  ;;  %443 = vbcast.lane.b32.xlu0 %v441_v11, 256  ;;  %v6701_v11 = vrot.slane %v6650_v7, %v6552_v37  ;;  %v6716_v42 = vpop.permute.xlu0 %2954 }
 0x18e   :  { %9002 = vst [vmem:[#allocation44_spill] sm:$0xff] %v6716_v42 }
 0x18f   :  { %8996 = vst [vmem:[#allocation38_spill] sm:$0xff] %v6701_v11  ;;  %v6709_v15 = vpop.permute.xlu1 %2982  ;;  %v485_v11 = vrot.slane %v375_v2, %v6552_v37 }
 0x190   :  { %8999 = vst [vmem:[#allocation41_spill] sm:$0xff] %v6709_v15 }
 0x191   :  { %458 = vbcast.lane.b32.xlu1 %v452_v45, 264  ;;  %454 = vbcast.lane.b32.xlu0 %v452_v45, 256  ;;  %v6724_v15 = vpop.permute.xlu0 %2998 }
 0x192   :  { %9004 = vst [vmem:[#allocation46_spill] sm:$0xff] %v6724_v15  ;;  %v518_v15 = vrot.slane %v6543_v33, %v6525_v22 }
 0x193   :  { %v6714_v45 = vpop.permute.xlu1 %2986 }
 0x194   :  { %9001 = vst [vmem:[#allocation43_spill] sm:$0xff] %v6714_v45  ;;  %v771_v45 = vrot.slane %v6577_v8, %v6508_v9 }
 0x195   :  { %469 = vbcast.lane.b32.xlu1 %v463_v56, 264  ;;  %465 = vbcast.lane.b32.xlu0 %v463_v56, 256  ;;  %v6730_v2 = vpop.permute.xlu0 %3030 }
 0x196   :  { %9006 = vst [vmem:[#allocation48_spill] sm:$0xff] %v6730_v2 }
 0x197   :  { %v6722_v56 = vpop.permute.xlu1 %3002 }
 0x198   :  { %9003 = vst [vmem:[#allocation45_spill] sm:$0xff] %v6722_v56 }
 0x199   :  { %480 = vbcast.lane.b32.xlu1 %v474_v53, 264  ;;  %476 = vbcast.lane.b32.xlu0 %v474_v53, 256  ;;  %v694_v53 = vrot.slane %v6536_v29, %v6525_v22  ;;  %v6736_v56 = vpop.permute.xlu0 %2958 }
 0x19a   :  { %9008 = vst [vmem:[#allocation50_spill] sm:$0xff] %v6736_v56 }
 0x19b   :  { %v6728_v37 = vpop.permute.xlu1 %3034 }
 0x19c   :  { %9005 = vst [vmem:[#allocation47_spill] sm:$0xff] %v6728_v37  ;;  %v793_v37 = vrot.slane %v6577_v8, %v6530_v25 }
 0x19d   :  { %491 = vbcast.lane.b32.xlu1 %v485_v11, 264  ;;  %487 = vbcast.lane.b32.xlu0 %v485_v11, 256  ;;  %v705_v11 = vrot.slane %v6536_v29, %v6530_v25 }
 0x1a1   :  { %678 = vbcast.lane.b32.xlu1 %v672_v35, 264  ;;  %674 = vbcast.lane.b32.xlu0 %v672_v35, 256  ;;  %v6734_v35 = vpop.permute.xlu1 %2990 }
 0x1a2   :  { %9007 = vst [vmem:[#allocation49_spill] sm:$0xff] %v6734_v35 }
 0x1a5   :  { %689 = vbcast.lane.b32.xlu1 %v683_v36, 264  ;;  %685 = vbcast.lane.b32.xlu0 %v683_v36, 256  ;;  %v6742_v36 = vpop.permute.xlu1 %3038 }
 0x1a6   :  { %9009 = vst [vmem:[#allocation51_spill] sm:$0xff] %v6742_v36  ;;  %v782_v36 = vrot.slane %v6577_v8, %v6525_v22 }
 0x1a9   :  { %700 = vbcast.lane.b32.xlu1 %v694_v53, 264  ;;  %696 = vbcast.lane.b32.xlu0 %v694_v53, 256  ;;  %v6744_v53 = vpop.permute.xlu0 %3006  ;;  %v6748_v29 = vpop.permute.xlu1 %2994 }
 0x1aa   :  { %9010 = vst [vmem:[#allocation52_spill] sm:$0xff] %v6744_v53  ;;  %9011 = vst [vmem:[#allocation53_spill] sm:$0xff] %v6748_v29 }
 0x1ad   :  { %711 = vbcast.lane.b32.xlu1 %v705_v11, 264  ;;  %707 = vbcast.lane.b32.xlu0 %v705_v11, 256  ;;  %v6750_v11 = vpop.permute.xlu0 %2962 }
 0x1ae   :  { %9012 = vst [vmem:[#allocation54_spill] sm:$0xff] %v6750_v11 }
 0x1b1   :  { %722 = vbcast.lane.b32.xlu1 %v6556_v38, 264  ;;  %718 = vbcast.lane.b32.xlu0 %v6556_v38, 256  ;;  %v496_v38 = vrot.slane %v6543_v33, %v6315_v30  ;;  %v6758_v53 = vpop.permute.xlu0 %3010 }
 0x1b2   :  { %9014 = vst [vmem:[#allocation56_spill] sm:$0xff] %v6758_v53 }
 0x1b5   :  { %733 = vbcast.lane.b32.xlu1 %v6560_v41, 264  ;;  %729 = vbcast.lane.b32.xlu0 %v6560_v41, 256  ;;  %v6756_v41 = vpop.permute.xlu1 %3042 }
 0x1b6   :  { %9013 = vst [vmem:[#allocation55_spill] sm:$0xff] %v6756_v41 }
 0x1b9   :  { %744 = vbcast.lane.b32.xlu1 %v6564_v40, 264  ;;  %740 = vbcast.lane.b32.xlu0 %v6564_v40, 256  ;;  %v507_v40 = vrot.slane %v6543_v33, %v6508_v9  ;;  %v6764_v29 = vpop.permute.xlu1 %3046 }
 0x1ba   :  { %9015 = vst [vmem:[#allocation57_spill] sm:$0xff] %v6764_v29 }
 0x1bd   :  { %755 = vbcast.lane.b32.xlu1 %v6568_v52, 264  ;;  %751 = vbcast.lane.b32.xlu0 %v6568_v52, 256  ;;  %v6766_v52 = vpop.permute.xlu0 %3014  ;;  %v6770_v53 = vpop.permute.xlu1 %3050 }
 0x1be   :  { %9016 = vst [vmem:[#allocation58_spill] sm:$0xff] %v6766_v52  ;;  %9017 = vst [vmem:[#allocation59_spill] sm:$0xff] %v6770_v53 }
 0x1c1   :  { %502 = vbcast.lane.b32.xlu1 %v496_v38, 264  ;;  %498 = vbcast.lane.b32.xlu0 %v496_v38, 256  ;;  %v529_v38 = vrot.slane %v6543_v33, %v6530_v25  ;;  %v6772_v35 = vpop.permute.xlu0 %3018 }
 0x1c2   :  { %9018 = vst [vmem:[#allocation60_spill] sm:$0xff] %v6772_v35 }
 0x1c5   :  { %513 = vbcast.lane.b32.xlu1 %v507_v40, 264  ;;  %509 = vbcast.lane.b32.xlu0 %v507_v40, 256 }
 0x1c9   :  { %524 = vbcast.lane.b32.xlu1 %v518_v15, 264  ;;  %520 = vbcast.lane.b32.xlu0 %v518_v15, 256 }
 0x1cd   :  { %535 = vbcast.lane.b32.xlu1 %v529_v38, 264  ;;  %531 = vbcast.lane.b32.xlu0 %v529_v38, 256 }
 0x1d1   :  { %546 = vbcast.lane.b32.xlu1 %v6581_v18, 264  ;;  %542 = vbcast.lane.b32.xlu0 %v6581_v18, 256 }
 0x1d3   :  { %v6776_v40 = vpop.permute.xlu1 %590  ;;  %v6778_v29 = vpop.permute.xlu0 %586 }
 0x1d5   :  { %557 = vbcast.lane.b32.xlu1 %v6585_v24, 264  ;;  %553 = vbcast.lane.b32.xlu0 %v6585_v24, 256  ;;  %v760_v24 = vrot.slane %v6577_v8, %v6315_v30  ;;  %v6833_v8 = vld [vmem:[%s8821_s6 + $0x30] sm:$0xff] }
 0x1d6   :  { %9026 = vst [vmem:[#allocation68_spill] sm:$0xff] %v6833_v8  ;;  %v2522_v39 = vrot.slane %v6833_v8, %v6291_v19 }
 0x1d7   :  { %v6782_v15 = vpop.permute.xlu1 %601  ;;  %v6784_v33 = vpop.permute.xlu0 %597 }
 0x1d9   :  { %568 = vbcast.lane.b32.xlu1 %v6589_v31, 264  ;;  %564 = vbcast.lane.b32.xlu0 %v6589_v31, 256 }
 0x1db   :  { %v6788_v38 = vpop.permute.xlu1 %612  ;;  %v6790_v35 = vpop.permute.xlu0 %608 }
 0x1dd   :  { %579 = vbcast.lane.b32.xlu1 %v6593_v16, 264  ;;  %575 = vbcast.lane.b32.xlu0 %v6593_v16, 256 }
 0x1df   :  { %v6794_v18 = vpop.permute.xlu1 %623  ;;  %v6796_v52 = vpop.permute.xlu0 %619 }
 0x1e1   :  { %766 = vbcast.lane.b32.xlu1 %v760_v24, 264  ;;  %762 = vbcast.lane.b32.xlu0 %v760_v24, 256 }
 0x1e3   :  { %v6800_v53 = vpop.permute.xlu1 %634  ;;  %v6802_v31 = vpop.permute.xlu0 %630 }
 0x1e5   :  { %777 = vbcast.lane.b32.xlu1 %v771_v45, 264  ;;  %773 = vbcast.lane.b32.xlu0 %v771_v45, 256 }
 0x1e7   :  { %v6806_v41 = vpop.permute.xlu1 %645  ;;  %v6808_v16 = vpop.permute.xlu0 %641 }
 0x1e8   :  { %9019 = vst [vmem:[#allocation61_spill] sm:$0xff] %v6808_v16 }
 0x1e9   :  { %788 = vbcast.lane.b32.xlu1 %v782_v36, 264  ;;  %784 = vbcast.lane.b32.xlu0 %v782_v36, 256 }
 0x1eb   :  { %v6812_v2 = vpop.permute.xlu1 %656  ;;  %v6814_v24 = vpop.permute.xlu0 %652 }
 0x1ec   :  { %9020 = vst [vmem:[#allocation62_spill] sm:$0xff] %v6812_v2  ;;  %9021 = vst [vmem:[#allocation63_spill] sm:$0xff] %v6814_v24 }
 0x1ed   :  { %799 = vbcast.lane.b32.xlu1 %v793_v37, 264  ;;  %795 = vbcast.lane.b32.xlu0 %v793_v37, 256 }
 0x1ef   :  { %v6818_v60 = vpop.permute.xlu1 %667  ;;  %v6820_v45 = vpop.permute.xlu0 %663 }
 0x1f0   :  { %9022 = vst [vmem:[#allocation64_spill] sm:$0xff] %v6818_v60  ;;  %9023 = vst [vmem:[#allocation65_spill] sm:$0xff] %v6820_v45 }
 0x1f1   :  { %810 = vbcast.lane.b32.xlu1 %v6599_v13, 264  ;;  %806 = vbcast.lane.b32.xlu0 %v6599_v13, 256  ;;  %v859_v13 = vrot.slane %v6606_v5, %v6508_v9 }
 0x1f3   :  { %v6824_v54 = vpop.permute.xlu1 %414  ;;  %v6826_v36 = vpop.permute.xlu0 %410 }
 0x1f4   :  { %9024 = vst [vmem:[#allocation66_spill] sm:$0xff] %v6824_v54  ;;  %9025 = vst [vmem:[#allocation67_spill] sm:$0xff] %v6826_v36 }
 0x1f5   :  { %854 = vbcast.lane.b32.xlu1 %v848_v44, 264  ;;  %850 = vbcast.lane.b32.xlu0 %v848_v44, 256  ;;  %v6846_v44 = vld [vmem:[%s8821_s6 + $0x38] sm:$0xff] }
 0x1f6   :  { %9029 = vst [vmem:[#allocation71_spill] sm:$0xff] %v6846_v44  ;;  %v2571_v54 = vrot.slane %v6846_v44, %v6291_v19 }
 0x1f7   :  { %v6835_v37 = vpop.permute.xlu1 %425  ;;  %v6837_v11 = vpop.permute.xlu0 %421 }
 0x1f8   :  { %9027 = vst [vmem:[#allocation69_spill] sm:$0xff] %v6835_v37  ;;  %9028 = vst [vmem:[#allocation70_spill] sm:$0xff] %v6837_v11  ;;  %v870_v11 = vrot.slane %v6606_v5, %v6525_v22  ;;  %v2530_v37 = vcombine.high %v2522_v39, %v2522_v39  ;;  %v2579_v58 = vcombine.high %v2571_v54, %v2571_v54 }
 0x1f9   :  { %865 = vbcast.lane.b32.xlu1 %v859_v13, 264  ;;  %861 = vbcast.lane.b32.xlu0 %v859_v13, 256  ;;  %v6858_v13 = vadd.f32 %v6489_v61, %v6465_v48  ;;  %v6877_v61 = vadd.f32 %v6495_v1, %v6467_v49 }
 0x1fa   :  { %v6871_v60 = vrot.slane %v2530_v37, %v6291_v19  ;;  %v6910_v49 = vrot.slane %v2579_v58, %v6291_v19 }
 0x1fb   :  { %v6848_v36 = vpop.permute.xlu1 %436  ;;  %v6850_v56 = vpop.permute.xlu0 %432  ;;  %9032 = vst [vmem:[#allocation74_spill] sm:$0xff] %v6858_v13  ;;  %v1215_v48 = vcombine.high %v6858_v13, %v6858_v13  ;;  %9036 = vst [vmem:[#allocation78_spill] sm:$0xff] %v6877_v61  ;;  %v6925_v58 = vrot.slane %v6877_v61, %v6291_v19 }
 0x1fc   :  { %9030 = vst [vmem:[#allocation72_spill] sm:$0xff] %v6848_v36  ;;  %9031 = vst [vmem:[#allocation73_spill] sm:$0xff] %v6850_v56  ;;  %v881_v56 = vrot.slane %v6606_v5, %v6530_v25  ;;  %v6868_v36 = vadd.f32 %v6491_v63, %v6461_v46  ;;  %v1222_v46 = vrot.slane %v6858_v13, %v6291_v19 }
 0x1fd   :  { %876 = vbcast.lane.b32.xlu1 %v870_v11, 264  ;;  %872 = vbcast.lane.b32.xlu0 %v870_v11, 256  ;;  %v6880_v11 = vrot.slane %v2522_v39, %v6291_v19  ;;  %v6886_v63 = vadd.f32 %v6499_v4, %v6463_v47  ;;  %v6904_v4 = vadd.f32 %v6510_v10, %v6534_v28 }
 0x1fe   :  { %9035 = vst [vmem:[#allocation77_spill] sm:$0xff] %v6868_v36  ;;  %v1117_v39 = vcombine.high %v6868_v36, %v6868_v36  ;;  %v1124_v47 = vrot.slane %v6868_v36, %v6291_v19  ;;  %v1229_v1 = vrot.slane %v1215_v48, %v6291_v19  ;;  %v6919_v10 = vrot.slane %v2571_v54, %v6291_v19 }
 0x1ff   :  { %v6860_v42 = vpop.permute.xlu1 %447  ;;  %v6862_v45 = vpop.permute.xlu0 %443  ;;  %9037 = vst [vmem:[#allocation79_spill] sm:$0xff] %v6886_v63  ;;  %9040 = vst [vmem:[#allocation82_spill] sm:$0xff] %v6904_v4  ;;  %v2808_v13 = vrot.slane %v6880_v11, %v6315_v30  ;;  %v1230_v36 = vcombine.high %v1222_v46, %v1222_v46  ;;  %v1166_v48 = vcombine.high %v6886_v63, %v6886_v63 }
 0x200   :  { %9033 = vst [vmem:[#allocation75_spill] sm:$0xff] %v6860_v42  ;;  %9034 = vst [vmem:[#allocation76_spill] sm:$0xff] %v6862_v45  ;;  %v1264_v42 = vcombine.high %v6877_v61, %v6877_v61  ;;  %v6936_v54 = vrot.slane %v6886_v63, %v6291_v19  ;;  %v6940_v28 = vadd.f32 %v6514_v12, %v6469_v50 }
 0x201   :  { %887 = vbcast.lane.b32.xlu1 %v881_v56, 264  ;;  %883 = vbcast.lane.b32.xlu0 %v881_v56, 256  ;;  %v2812_v56 = vrot.slane %v6871_v60, %v6315_v30  ;;  %v6944_v61 = vadd.f32 %v6516_v14, %v6532_v27  ;;  %v1132_v45 = vcombine.high %v1124_v47, %v1124_v47 }
 0x202   :  { %9043 = vst [vmem:[#allocation85_spill] sm:$0xff] %v6940_v28  ;;  %v6955_v63 = vrot.slane %v1264_v42, %v6291_v19  ;;  %v6959_v50 = vrot.slane %v6904_v4, %v6291_v19  ;;  %v1231_v12 = vcombine.high %v1229_v1, %v1229_v1  ;;  %v2840_v14 = vrot.slane %v6919_v10, %v6315_v30 }
 0x203   :  { %v6888_v5 = vpop.permute.xlu1 %458  ;;  %v6890_v37 = vpop.permute.xlu0 %454  ;;  %9044 = vst [vmem:[#allocation86_spill] sm:$0xff] %v6944_v61  ;;  %v1238_v27 = vrot.slane %v1222_v46, %v6291_v19  ;;  %v1252_v42 = vrot.slane %v1230_v36, %v6291_v19  ;;  %v6980_v2 = vrot.slane %v6940_v28, %v6291_v19  ;;  %v1140_v32 = vrot.slane %v1124_v47, %v6291_v19 }
 0x204   :  { %9038 = vst [vmem:[#allocation80_spill] sm:$0xff] %v6888_v5  ;;  %9039 = vst [vmem:[#allocation81_spill] sm:$0xff] %v6890_v37  ;;  %v1131_v37 = vrot.slane %v1117_v39, %v6291_v19  ;;  %v2844_v39 = vrot.slane %v6910_v49, %v6315_v30 }
 0x205   :  { %898 = vbcast.lane.b32.xlu1 %v6612_v57, 264  ;;  %894 = vbcast.lane.b32.xlu0 %v6612_v57, 256  ;;  %v1260_v16 = vcombine.high %v1238_v27, %v1238_v27  ;;  %v1262_v8 = vcombine.high %v1252_v42, %v1252_v42 }
 0x206   :  { %v1147_v47 = vrot.slane %v1131_v37, %v6291_v19 }
 0x207   :  { %v6929_v5 = vpop.permute.xlu1 %469  ;;  %v6931_v57 = vpop.permute.xlu0 %465 }
 0x208   :  { %9041 = vst [vmem:[#allocation83_spill] sm:$0xff] %v6929_v5  ;;  %9042 = vst [vmem:[#allocation84_spill] sm:$0xff] %v6931_v57  ;;  %v1411_v5 = vcombine.high %v6904_v4, %v6904_v4  ;;  %v6950_v57 = vadd.f32 %v6522_v20, %v6471_v51  ;;  %v1279_v51 = vcombine.high %v6925_v58, %v6925_v58 }
 0x209   :  { %3066 = vperm.xlu1 %6028, %v2812_v56   ;;  %3062 = vperm.xlu0 %6029, %v2808_v13   ;;  %v6966_v20 = vrot.slane %v1166_v48, %v6291_v19  ;;  %v1313_v4 = vcombine.high %v6940_v28, %v6940_v28  ;;  %v6984_v48 = vrot.slane %v6944_v61, %v6291_v19 }
 0x20a   :  { %9045 = vst [vmem:[#allocation87_spill] sm:$0xff] %v6950_v57  ;;  %v6987_v36 = vrot.slane %v1411_v5, %v6291_v19  ;;  %v1362_v46 = vcombine.high %v6950_v57, %v6950_v57  ;;  %v6993_v13 = vrot.slane %v6950_v57, %v6291_v19  ;;  %v1154_v5 = vrot.slane %v1132_v45, %v6291_v19 }
 0x20b   :  { %v6970_v56 = vpop.permute.xlu1 %480  ;;  %v6972_v24 = vpop.permute.xlu0 %476  ;;  %v1133_v57 = vcombine.high %v1131_v37, %v1131_v37  ;;  %v7021_v28 = vrot.slane %v1238_v27, %v6315_v30  ;;  %v7029_v37 = vrot.slane %v1260_v16, %v6315_v30  ;;  %v1163_v6 = vcombine.high %v1147_v47, %v1147_v47 }
 0x20c   :  { %9046 = vst [vmem:[#allocation88_spill] sm:$0xff] %v6970_v56  ;;  %9047 = vst [vmem:[#allocation89_spill] sm:$0xff] %v6972_v24  ;;  %v1245_v56 = vrot.slane %v1229_v1, %v6291_v19  ;;  %v1259_v24 = vrot.slane %v1231_v12, %v6291_v19  ;;  %v1164_v45 = vcombine.high %v1154_v5, %v1154_v5 }
 0x20d   :  { %9048 = vst [vmem:[#allocation90_spill] sm:$0xff] %v6987_v36  ;;  %3098 = vperm.xlu1 %6028, %v2844_v39   ;;  %3094 = vperm.xlu0 %6029, %v2840_v14   ;;  %v7008_v39 = vrot.slane %v1313_v4, %v6291_v19  ;;  %v7016_v14 = vrot.slane %v1362_v46, %v6291_v19 }
 0x20e   :  { %v1261_v61 = vcombine.high %v1245_v56, %v1245_v56  ;;  %v7025_v4 = vrot.slane %v1252_v42, %v6315_v30  ;;  %v1263_v12 = vcombine.high %v1259_v24, %v1259_v24  ;;  %v7032_v46 = vrot.slane %v1262_v8, %v6315_v30 }
 0x20f   :  { %v7003_v44 = vpop.permute.xlu1 %491  ;;  %v7005_v1 = vpop.permute.xlu0 %487  ;;  %v1161_v27 = vrot.slane %v1133_v57, %v6291_v19  ;;  %v1287_v36 = vrot.slane %v6925_v58, %v6291_v19  ;;  %v7042_v0 = vrot.slane %v1245_v56, %v6315_v30  ;;  %v1280_v16 = vcombine.high %v6955_v63, %v6955_v63 }
 0x210   :  { %9049 = vst [vmem:[#allocation91_spill] sm:$0xff] %v7003_v44  ;;  %9050 = vst [vmem:[#allocation92_spill] sm:$0xff] %v7005_v1  ;;  %v1162_v44 = vcombine.high %v1140_v32, %v1140_v32  ;;  %v7048_v8 = vrot.slane %v1259_v24, %v6315_v30  ;;  %v7051_v57 = vrot.slane %v1261_v61, %v6315_v30 }
 0x211   :  { %821 = vbcast.lane.b32.xlu1 %v6624_v21, 264  ;;  %817 = vbcast.lane.b32.xlu0 %v6624_v21, 256  ;;  %v1301_v21 = vrot.slane %v1279_v51, %v6291_v19  ;;  %v7054_v58 = vrot.slane %v1140_v32, %v6315_v30  ;;  %v1294_v56 = vrot.slane %v6955_v63, %v6291_v19 }
 0x212   :  { %v7063_v51 = vrot.slane %v1154_v5, %v6315_v30  ;;  %v7066_v24 = vrot.slane %v1162_v44, %v6315_v30  ;;  %v7069_v61 = vrot.slane %v1164_v45, %v6315_v30  ;;  %v7073_v32 = vrot.slane %v1147_v47, %v6315_v30 }
 0x213   :  { %v7037_v1 = vpop.permute.xlu1 %678  ;;  %v7039_v42 = vpop.permute.xlu0 %674  ;;  %9053 = vst [vmem:[#allocation95_spill] sm:$0xff] %v7054_v58  ;;  %v936_v5 = vrot.slane %v6646_v43, %v6315_v30  ;;  %v7082_v44 = vrot.slane %v1163_v6, %v6315_v30  ;;  %v1308_v45 = vrot.slane %v1280_v16, %v6291_v19  ;;  %v7088_v47 = vrot.slane %v1287_v36, %v6315_v30 }
 0x214   :  { %9051 = vst [vmem:[#allocation93_spill] sm:$0xff] %v7037_v1  ;;  %9052 = vst [vmem:[#allocation94_spill] sm:$0xff] %v7039_v42  ;;  %v7060_v42 = vrot.slane %v1263_v12, %v6315_v30  ;;  %v1165_v1 = vcombine.high %v1161_v27, %v1161_v27  ;;  %v1309_v12 = vcombine.high %v1287_v36, %v1287_v36 }
 0x215   :  { %909 = vbcast.lane.b32.xlu1 %v6628_v59, 264  ;;  %9054 = vst [vmem:[#allocation96_spill] sm:$0xff] %v7063_v51  ;;  %9055 = vst [vmem:[#allocation97_spill] sm:$0xff] %v7066_v24  ;;  %905 = vbcast.lane.b32.xlu0 %v6628_v59, 256  ;;  %v1311_v24 = vcombine.high %v1301_v21, %v1301_v21  ;;  %v1182_v59 = vcombine.high %v6966_v20, %v6966_v20 }
 0x216   :  { %9056 = vst [vmem:[#allocation98_spill] sm:$0xff] %v7069_v61  ;;  %9057 = vst [vmem:[#allocation99_spill] sm:$0xff] %v7073_v32  ;;  %v9062_v32 = vcombine.high %v6936_v54, %v6936_v54  ;;  %v7100_v16 = vrot.slane %v1301_v21, %v6315_v30  ;;  %v947_v36 = vrot.slane %v6646_v43, %v6508_v9 }
 0x217   :  { %v7075_v58 = vpop.permute.xlu1 %689  ;;  %v7077_v63 = vpop.permute.xlu0 %685  ;;  %9060 = vst [vmem:[#allocation102_spill] sm:$0xff] %v7082_v44  ;;  %9061 = vst [vmem:[#allocation103_spill] sm:$0xff] %v7088_v47  ;;  %v7097_v44 = vrot.slane %v1161_v27, %v6315_v30  ;;  %v1196_v47 = vrot.slane %v6966_v20, %v6291_v19  ;;  %v7107_v61 = vrot.slane %v1165_v1, %v6315_v30 }
 0x218   :  { %9058 = vst [vmem:[#allocation100_spill] sm:$0xff] %v7075_v58  ;;  %9059 = vst [vmem:[#allocation101_spill] sm:$0xff] %v7077_v63  ;;  %v1310_v58 = vcombine.high %v1294_v56, %v1294_v56  ;;  %v1189_v63 = vrot.slane %v6936_v54, %v6291_v19  ;;  %v1203_v6 = vrot.slane %v9062_v32, %v6291_v19 }
 0x219   :  { %942 = vbcast.lane.b32.xlu1 %v936_v5, 264  ;;  %9063 = vst [vmem:[#allocation104_spill] sm:$0xff] %v7097_v44  ;;  %9064 = vst [vmem:[#allocation105_spill] sm:$0xff] %v7100_v16  ;;  %938 = vbcast.lane.b32.xlu0 %v936_v5, 256  ;;  %v7110_v51 = vrot.slane %v1309_v12, %v6315_v30  ;;  %v1024_v21 = vrot.slane %v6650_v7, %v6315_v30 }
 0x21a   :  { %9065 = vst [vmem:[#allocation106_spill] sm:$0xff] %v7107_v61  ;;  %v1035_v32 = vrot.slane %v6650_v7, %v6508_v9  ;;  %v7121_v5 = vrot.slane %v1311_v24, %v6315_v30  ;;  %v7124_v20 = vrot.slane %v1294_v56, %v6315_v30  ;;  %v1312_v1 = vcombine.high %v1308_v45, %v1308_v45 }
 0x21b   :  { %9066 = vst [vmem:[#allocation107_spill] sm:$0xff] %v7110_v51  ;;  %v7112_v54 = vpop.permute.xlu1 %700  ;;  %v7114_v27 = vpop.permute.xlu0 %696  ;;  %v1210_v12 = vrot.slane %v1182_v59, %v6291_v19  ;;  %v7128_v51 = vrot.slane %v1310_v58, %v6315_v30  ;;  %v1336_v16 = vrot.slane %v6980_v2, %v6291_v19  ;;  %v7134_v24 = vrot.slane %v6646_v43, %v6525_v22 }
 0x21c   :  { %9067 = vst [vmem:[#allocation108_spill] sm:$0xff] %v7112_v54  ;;  %9068 = vst [vmem:[#allocation109_spill] sm:$0xff] %v7114_v27  ;;  %v1211_v27 = vcombine.high %v1189_v63, %v1189_v63  ;;  %v1213_v54 = vcombine.high %v1203_v6, %v1203_v6  ;;  %v7138_v56 = vrot.slane %v6650_v7, %v6525_v22 }
 0x21d   :  { %9069 = vst [vmem:[#allocation110_spill] sm:$0xff] %v7121_v5  ;;  %9070 = vst [vmem:[#allocation111_spill] sm:$0xff] %v7124_v20  ;;  %953 = vbcast.lane.b32.xlu1 %v947_v36, 264  ;;  %949 = vbcast.lane.b32.xlu0 %v947_v36, 256  ;;  %v1212_v9 = vcombine.high %v1196_v47, %v1196_v47  ;;  %v9072_v58 = vcombine.high %v6980_v2, %v6980_v2 }
 0x21e   :  { %9071 = vst [vmem:[#allocation112_spill] sm:$0xff] %v7128_v51  ;;  %v7149_v36 = vrot.slane %v1308_v45, %v6315_v30  ;;  %v7152_v5 = vrot.slane %v1189_v63, %v6315_v30  ;;  %v7155_v61 = vrot.slane %v1203_v6, %v6315_v30  ;;  %v7158_v22 = vrot.slane %v1196_v47, %v6315_v30 }
 0x21f   :  { %v1350_v59 = vrot.slane %v9072_v58, %v6291_v19  ;;  %v7144_v51 = vpop.permute.xlu1 %711  ;;  %v7146_v20 = vpop.permute.xlu0 %707  ;;  %v7161_v44 = vrot.slane %v1312_v1, %v6315_v30  ;;  %v1214_v2 = vcombine.high %v1210_v12, %v1210_v12  ;;  %v1385_v58 = vrot.slane %v6993_v13, %v6291_v19 }
 0x220   :  { %9073 = vst [vmem:[#allocation113_spill] sm:$0xff] %v7149_v36  ;;  %9074 = vst [vmem:[#allocation114_spill] sm:$0xff] %v7155_v61  ;;  %v9076_v45 = vcombine.high %v6993_v13, %v6993_v13  ;;  %v7170_v63 = vrot.slane %v1211_v27, %v6315_v30  ;;  %v7173_v6 = vrot.slane %v1213_v54, %v6315_v30 }
 0x221   :  { %9075 = vst [vmem:[#allocation115_spill] sm:$0xff] %v7158_v22  ;;  %1030 = vbcast.lane.b32.xlu1 %v1024_v21, 264  ;;  %v7177_v47 = vrot.slane %v6646_v43, %v6530_v25  ;;  %v1358_v1 = vcombine.high %v1336_v16, %v1336_v16  ;;  %1026 = vbcast.lane.b32.xlu0 %v1024_v21, 256 }
 0x222   :  { %v1399_v36 = vrot.slane %v9076_v45, %v6291_v19  ;;  %9077 = vst [vmem:[#allocation116_spill] sm:$0xff] %v7170_v63  ;;  %9078 = vst [vmem:[#allocation117_spill] sm:$0xff] %v7173_v6  ;;  %v7180_v22 = vrot.slane %v1210_v12, %v6315_v30  ;;  %v7183_v61 = vrot.slane %v1212_v9, %v6315_v30 }
 0x223   :  { %v7187_v13 = vrot.slane %v6650_v7, %v6530_v25  ;;  %v1360_v27 = vcombine.high %v1350_v59, %v1350_v59  ;;  %v7189_v45 = vpop.permute.xlu1 %722  ;;  %v7191_v54 = vpop.permute.xlu0 %718  ;;  %v7194_v43 = vrot.slane %v1336_v16, %v6315_v30  ;;  %v7197_v21 = vrot.slane %v1350_v59, %v6315_v30 }
 0x224   :  { %9079 = vst [vmem:[#allocation118_spill] sm:$0xff] %v7180_v22  ;;  %9080 = vst [vmem:[#allocation119_spill] sm:$0xff] %v7183_v61  ;;  %v7201_v12 = vrot.slane %v7008_v39, %v6291_v19  ;;  %v1329_v9 = vcombine.high %v7008_v39, %v7008_v39  ;;  %v7206_v7 = vrot.slane %v1214_v2, %v6315_v30 }
 0x225   :  { %9081 = vst [vmem:[#allocation120_spill] sm:$0xff] %v7194_v43  ;;  %9082 = vst [vmem:[#allocation121_spill] sm:$0xff] %v7197_v21  ;;  %v1407_v25 = vcombine.high %v1385_v58, %v1385_v58  ;;  %v1409_v61 = vcombine.high %v1399_v36, %v1399_v36  ;;  %v1378_v22 = vcombine.high %v7016_v14, %v7016_v14  ;;  %1041 = vbcast.lane.b32.xlu1 %v1035_v32, 264 }
 0x226   :  { %9083 = vst [vmem:[#allocation122_spill] sm:$0xff] %v7206_v7  ;;  %v9084_v16 = vcombine.high %v6411_v23, %v6411_v23  ;;  %v2609_v21 = vcombine.high %v6919_v10, %v6919_v10  ;;  %v7217_v43 = vrot.slane %v1358_v1, %v6315_v30  ;;  %v1392_v39 = vrot.slane %v7016_v14, %v6291_v19 }
 0x227   :  { %1037 = vbcast.lane.b32.xlu0 %v1035_v32, 256  ;;  %v9086_v2 = vcombine.high %v6407_v17, %v6407_v17  ;;  %v2560_v6 = vcombine.high %v6880_v11, %v6880_v11  ;;  %v7228_v23 = vrot.slane %v1360_v27, %v6315_v30  ;;  %v1434_v10 = vrot.slane %v6959_v50, %v6291_v19  ;;  %v7232_v1 = vpop.permute.xlu1 %733 }
 0x228   :  { %v2800_v59 = vrot.slane %v9084_v16, %v6315_v30  ;;  %9085 = vst [vmem:[#allocation123_spill] sm:$0xff] %v7217_v43  ;;  %v7234_v16 = vpop.permute.xlu0 %729  ;;  %v7238_v14 = vrot.slane %v7201_v12, %v6315_v30  ;;  %v7241_v17 = vrot.slane %v1385_v58, %v6315_v30  ;;  %v7244_v32 = vrot.slane %v1399_v36, %v6315_v30 }
 0x229   :  { %v2768_v7 = vrot.slane %v9086_v2, %v6315_v30  ;;  %9087 = vst [vmem:[#allocation124_spill] sm:$0xff] %v7228_v23  ;;  %v7247_v11 = vrot.slane %v1329_v9, %v6291_v19  ;;  %v7250_v27 = vrot.slane %v1407_v25, %v6315_v30  ;;  %v7253_v2 = vrot.slane %v1409_v61, %v6315_v30 }
 0x22a   :  { %9088 = vst [vmem:[#allocation125_spill] sm:$0xff] %v7238_v14  ;;  %v7256_v23 = vrot.slane %v1378_v22, %v6291_v19  ;;  %v9093_v58 = vcombine.high %v6959_v50, %v6959_v50  ;;  %v7266_v36 = vadd.f32 %v7025_v4, %v6782_v15  ;;  %v7270_v25 = vadd.f32 %v7025_v4, %v6784_v33 }
 0x22b   :  { %9089 = vst [vmem:[#allocation126_spill] sm:$0xff] %v7247_v11  ;;  %9090 = vst [vmem:[#allocation127_spill] sm:$0xff] %v7250_v27  ;;  %3054 = vperm.xlu1 %6028, %v2800_v59   ;;  %v2848_v61 = vrot.slane %v2609_v21, %v6315_v30  ;;  %v7274_v22 = vrot.slane %v1392_v39, %v6315_v30  ;;  %3022 = vperm.xlu0 %6029, %v2768_v7  }
 0x22c   :  { %9091 = vst [vmem:[#allocation128_spill] sm:$0xff] %v7253_v2  ;;  %9092 = vst [vmem:[#allocation129_spill] sm:$0xff] %v7256_v23  ;;  %v7262_v14 = vrot.slane %v9093_v58, %v6291_v19  ;;  %v2816_v9 = vrot.slane %v2560_v6, %v6315_v30  ;;  %v7278_v50 = vrot.slane %v1434_v10, %v6315_v30  ;;  %v7296_v6 = vpop.permute.xlu1 %744  ;;  %v7298_v59 = vpop.permute.xlu0 %740  ;;  %v1992_v43 = vmul.f32 0.2, %v7266_v36 }
 0x22d   :  { %9095 = vst [vmem:[#allocation131_spill] sm:$0xff] %v7274_v22  ;;  %v1483_v15 = vrot.slane %v6984_v48, %v6291_v19  ;;  %v9097_v33 = vcombine.high %v6984_v48, %v6984_v48  ;;  %v7290_v21 = vadd.f32 %v7021_v28, %v6776_v40  ;;  %v7294_v7 = vadd.f32 %v7021_v28, %v6778_v29 }
 0x22e   :  { %9094 = vst [vmem:[#allocation130_spill] sm:$0xff] %v7262_v14  ;;  %9096 = vst [vmem:[#allocation132_spill] sm:$0xff] %v7278_v50  ;;  %v7302_v58 = vrot.slane %v7247_v11, %v6315_v30  ;;  %v1359_v48 = vcombine.high %v7201_v12, %v7201_v12  ;;  %v7312_v40 = vrot.slane %v7256_v23, %v6315_v30  ;;  %v9119_v11 = vld [vmem:[#allocation62_spill] sm:$0xff] }
 0x22f   :  { %v7286_v4 = vrot.slane %v9097_v33, %v6291_v19  ;;  %v7308_v33 = vadd.f32 %v7029_v37, %v6788_v38  ;;  %v7316_v29 = vrot.slane %v7262_v14, %v6315_v30  ;;  %v1408_v28 = vcombine.high %v1392_v39, %v1392_v39  ;;  %3102 = vperm.xlu1 %6028, %v2848_v61   ;;  %v5873_v61 = vld [vmem:[%s8822_s1] sm:$0xff]   ;;  %s6164_s1 = smov 8  }
 0x230   :  { %9099 = vst [vmem:[#allocation134_spill] sm:$0xff] %v7302_v58  ;;  %9100 = vst [vmem:[#allocation135_spill] sm:$0xff] %v7312_v40  ;;  %v1991_v58 = vmul.f32 0.2, %v7270_v25  ;;  %v7322_v12 = vadd.f32 %v7029_v37, %v6790_v35  ;;  %v1456_v38 = vcombine.high %v1434_v10, %v1434_v10  ;;  %v7326_v50 = vadd.f32 %v7032_v46, %v6794_v18  ;;  %v7341_v10 = vpop.permute.xlu1 %755  ;;  %v7343_v18 = vpop.permute.xlu0 %751 }
 0x231   :  { %9098 = vst [vmem:[#allocation133_spill] sm:$0xff] %v7286_v4  ;;  %9101 = vst [vmem:[#allocation136_spill] sm:$0xff] %v7316_v29  ;;  %3070 = vperm.xlu0 %6029, %v2816_v9   ;;  %v7329_v40 = vrot.slane %v1483_v15, %v6315_v30  ;;  %v7333_v39 = vrot.slane %v7286_v4, %v6315_v30  ;;  %v1505_v14 = vcombine.high %v1483_v15, %v1483_v15 }
 0x232   :  { %v1990_v29 = vmul.f32 0.2, %v7290_v21  ;;  %v1989_v35 = vmul.f32 0.2, %v7294_v7  ;;  %v7339_v37 = vadd.f32 %v7032_v46, %v6796_v52  ;;  %9104 = vst [vmem:[#allocation139_spill] sm:$0xff] %v7343_v18  ;;  %v7349_v9 = vrot.slane %v1359_v48, %v6315_v30  ;;  %v9169_v18 = vld [vmem:[#allocation106_spill] sm:$0xff] }
 0x233   :  { %9102 = vst [vmem:[#allocation137_spill] sm:$0xff] %v7329_v40  ;;  %9103 = vst [vmem:[#allocation138_spill] sm:$0xff] %v7333_v39  ;;  %v1994_v15 = vmul.f32 0.2, %v7308_v33  ;;  %v7353_v4 = vrot.slane %v1408_v28, %v6315_v30  ;;  %v2120_v39 = vmax.f32 %v7266_v36, %v1992_v43  ;;  %v2119_v40 = vmax.f32 %v7270_v25, %v1991_v58 }
 0x234   :  { %9105 = vst [vmem:[#allocation140_spill] sm:$0xff] %v7349_v9  ;;  %v1993_v63 = vmul.f32 0.2, %v7322_v12  ;;  %832 = vbcast.lane.b32.xlu1 %v6633_v55, 264  ;;  %v7364_v48 = vrot.slane %v1456_v38, %v6315_v30  ;;  %v1996_v28 = vmul.f32 0.2, %v7326_v50  ;;  %v1870_v9 = vadd.f32 %v7042_v0, %v6800_v53  ;;  %v7378_v38 = vpop.permute.xlu1 %502  ;;  %v7380_v46 = vpop.permute.xlu0 %498 }
 0x235   :  { %9106 = vst [vmem:[#allocation141_spill] sm:$0xff] %v7353_v4  ;;  %828 = vbcast.lane.b32.xlu0 %v6633_v55, 256  ;;  %v7370_v52 = vunpack.c.l.bf16 %v5873_v61  ;;  %v7373_v43 = vrot.slane %v1505_v14, %v6315_v30  ;;  %v2118_v36 = vmax.f32 %v7290_v21, %v1990_v29  ;;  %v2117_v25 = vmax.f32 %v7294_v7, %v1989_v35 }
 0x236   :  { %9107 = vst [vmem:[#allocation142_spill] sm:$0xff] %v7364_v48  ;;  %v1995_v58 = vmul.f32 0.2, %v7339_v37  ;;  %9109 = vst [vmem:[#allocation144_spill] sm:$0xff] %v7380_v46  ;;  %v2611_v53 = vcombine.high %v6910_v49, %v6910_v49  ;;  %v2122_v55 = vmax.f32 %v7308_v33, %v1994_v15  ;;  %v1869_v48 = vadd.f32 %v7042_v0, %v6802_v31  ;;  %v9114_v15 = vld [vmem:[#allocation27_spill] sm:$0xff]  ;;  %v9150_v46 = vld [vmem:[#allocation28_spill] sm:$0xff] }
 0x237   :  { %9108 = vst [vmem:[#allocation143_spill] sm:$0xff] %v7373_v43  ;;  %v9110_v14 = vcombine.high %v6433_v34, %v6433_v34  ;;  %v7393_v7 = vunpack.c.h.bf16 %v5873_v61  ;;  %v3160_v29 = vmul.f32 %v6601_v62, %v2120_v39  ;;  %v3159_v35 = vmul.f32 %v6601_v62, %v2119_v40 }
 0x238   :  { %v2121_v43 = vmax.f32 %v7322_v12, %v1993_v63  ;;  %920 = vbcast.lane.b32.xlu1 %v6641_v3, 264  ;;  %v9111_v0 = vcombine.high %v6416_v26, %v6416_v26  ;;  %v2124_v34 = vmax.f32 %v7326_v50, %v1996_v28  ;;  %v1998_v49 = vmul.f32 0.2, %v1870_v9  ;;  %v9112_v63 = vld [vmem:[#allocation20_spill] sm:$0xff]  ;;  %v7414_v26 = vpop.permute.xlu1 %513  ;;  %v7416_v61 = vpop.permute.xlu0 %509 }
 0x239   :  { %v7391_v21 = vrot.slane %v9110_v14, %v6315_v30  ;;  %v1872_v33 = vadd.f32 %v7048_v8, %v6806_v41  ;;  %916 = vbcast.lane.b32.xlu0 %v6641_v3, 256  ;;  %v2562_v62 = vcombine.high %v6871_v60, %v6871_v60  ;;  %v3158_v40 = vmul.f32 %v9112_v63, %v2118_v36  ;;  %v9115_v3 = vld [vmem:[#allocation71_spill] sm:$0xff]  ;;  %v9116_v60 = vld [vmem:[#allocation68_spill] sm:$0xff] }
 0x23a   :  { %v7403_v31 = vrot.slane %v9111_v0, %v6315_v30  ;;  %v3157_v12 = vmul.f32 %v9112_v63, %v2117_v25  ;;  %v2123_v39 = vmax.f32 %v7339_v37, %v1995_v58  ;;  %9113 = vst [vmem:[#allocation20_spill] sm:$0xff] %v7416_v61  ;;  %v7419_v50 = vrot.slane %v2611_v53, %v6315_v30  ;;  %v9117_v0 = vld [vmem:[#allocation61_spill] sm:$0xff]  ;;  %v9118_v53 = vld [vmem:[#allocation40_spill] sm:$0xff] }
 0x23b   :  { %v3162_v41 = vmul.f32 %v9114_v15, %v2122_v55  ;;  %v1997_v28 = vmul.f32 0.2, %v1869_v48  ;;  %v2564_v14 = vcombine.high %v9115_v3, %v9115_v3  ;;  %v2515_v36 = vcombine.high %v9116_v60, %v9116_v60 }
 0x23c   :  { %v3330_v25 = vsel %vm3253_vm2, %v3160_v29, 0.0  ;;  %v3315_v37 = vsel %vm3253_vm2, %v3159_v35, 0.0  ;;  %v3161_v58 = vmul.f32 %v9114_v15, %v2121_v43  ;;  %v1871_v63 = vadd.f32 %v7048_v8, %v9117_v0  ;;  %964 = vbcast.lane.b32.xlu1 %v7134_v24, 264  ;;  %v9120_v15 = vld [vmem:[#allocation63_spill] sm:$0xff]  ;;  %v7441_v60 = vpop.permute.xlu1 %524  ;;  %v7443_v0 = vpop.permute.xlu0 %520 }
 0x23d   :  { %v3164_v55 = vmul.f32 %v9118_v53, %v2124_v34  ;;  %v2126_v23 = vmax.f32 %v1870_v9, %v1998_v49  ;;  %v2000_v4 = vmul.f32 0.2, %v1872_v33  ;;  %v1874_v3 = vadd.f32 %v7051_v57, %v9119_v11  ;;  %960 = vbcast.lane.b32.xlu0 %v7134_v24, 256  ;;  %9121 = vst [vmem:[#allocation27_spill] sm:$0xff] %v7441_v60 }
 0x23e   :  { %v3329_v29 = vsel %vm3253_vm2, %v3158_v40, 0.0  ;;  %v3314_v35 = vsel %vm3253_vm2, %v3157_v12, 0.0  ;;  %v3163_v43 = vmul.f32 %v9118_v53, %v2123_v39  ;;  %v1873_v8 = vadd.f32 %v7051_v57, %v9120_v15  ;;  %9122 = vst [vmem:[#allocation71_spill] sm:$0xff] %v7443_v0  ;;  %v9123_v53 = vld [vmem:[#allocation42_spill] sm:$0xff] }
 0x23f   :  { %v3332_v9 = vsel %vm3253_vm2, %v3162_v41, 0.0  ;;  %v2125_v34 = vmax.f32 %v1869_v48, %v1997_v28  ;;  %v7447_v11 = vrot.slane %v2564_v14, %v6291_v19  ;;  %v7450_v24 = vrot.slane %v2515_v36, %v6291_v19  ;;  %v9124_v36 = vld [vmem:[#allocation64_spill] sm:$0xff] }
 0x240   :  { %v3331_v49 = vadd.f32 %v3330_v25, %v3329_v29  ;;  %v3316_v40 = vadd.f32 %v3315_v37, %v3314_v35  ;;  %v3317_v12 = vsel %vm3253_vm2, %v3161_v58, 0.0  ;;  %v1999_v39 = vmul.f32 0.2, %v1871_v63  ;;  %1052 = vbcast.lane.b32.xlu1 %v7138_v56, 264  ;;  %v7460_v37 = vpop.permute.xlu1 %535  ;;  %v7462_v58 = vpop.permute.xlu0 %531  ;;  %v9127_v35 = vld [vmem:[#allocation65_spill] sm:$0xff] }
 0x241   :  { %v3334_v57 = vsel %vm3253_vm2, %v3164_v55, 0.0  ;;  %v3166_v15 = vmul.f32 %v9123_v53, %v2126_v23  ;;  %v2128_v0 = vmax.f32 %v1872_v33, %v2000_v4  ;;  %v2002_v41 = vmul.f32 0.2, %v1874_v3  ;;  %1048 = vbcast.lane.b32.xlu0 %v7138_v56, 256  ;;  %9125 = vst [vmem:[#allocation68_spill] sm:$0xff] %v7460_v37  ;;  %9126 = vst [vmem:[#allocation61_spill] sm:$0xff] %v7462_v58 }
 0x242   :  { %v3333_v48 = vadd.f32 %v3332_v9, %v3331_v49  ;;  %v3319_v28 = vsel %vm3253_vm2, %v3163_v43, 0.0  ;;  %v2001_v14 = vmul.f32 0.2, %v1873_v8  ;;  %v1876_v25 = vadd.f32 %v7060_v42, %v9124_v36  ;;  %v9129_v37 = vld [vmem:[#allocation66_spill] sm:$0xff] }
 0x243   :  { %v3318_v29 = vadd.f32 %v3317_v12, %v3316_v40  ;;  %v3165_v55 = vmul.f32 %v9123_v53, %v2125_v34  ;;  %v7467_v23 = vrot.slane %v7447_v11, %v6291_v19  ;;  %v7471_v56 = vrot.slane %v7450_v24, %v6291_v19  ;;  %v9128_v40 = vld [vmem:[#allocation44_spill] sm:$0xff] }
 0x244   :  { %v3335_v4 = vadd.f32 %v3334_v57, %v3333_v48  ;;  %v2127_v33 = vmax.f32 %v1871_v63, %v1999_v39  ;;  %v1875_v43 = vadd.f32 %v7060_v42, %v9127_v35  ;;  %3058 = vperm.xlu1 %6028, %v7391_v21   ;;  %v2820_v9 = vrot.slane %v2562_v62, %v6315_v30  ;;  %v9130_v57 = vld [vmem:[#allocation95_spill] sm:$0xff]  ;;  %v9131_v39 = vld [vmem:[#allocation69_spill] sm:$0xff]  ;;  %v9132_v48 = vld [vmem:[#allocation96_spill] sm:$0xff]  ;;  %v7484_v35 = vpop.permute.xlu1 %546  ;;  %v7486_v21 = vpop.permute.xlu0 %542 }
 0x245   :  { %v3320_v49 = vadd.f32 %v3319_v28, %v3318_v29  ;;  %v3336_v34 = vsel %vm3253_vm2, %v3166_v15, 0.0  ;;  %v3168_v12 = vmul.f32 %v9128_v40, %v2128_v0  ;;  %v2130_v53 = vmax.f32 %v1874_v3, %v2002_v41  ;;  %3026 = vperm.xlu0 %6029, %v7403_v31   ;;  %9133 = vst [vmem:[#allocation40_spill] sm:$0xff] %v7484_v35  ;;  %v9135_v15 = vld [vmem:[#allocation70_spill] sm:$0xff]  ;;  %v9140_v31 = vld [vmem:[#allocation72_spill] sm:$0xff]  ;;  %v9142_v35 = vld [vmem:[#allocation73_spill] sm:$0xff] }
 0x246   :  { %v2129_v36 = vmax.f32 %v1873_v8, %v2001_v14  ;;  %v2004_v58 = vmul.f32 0.2, %v1876_v25  ;;  %v1830_v63 = vadd.f32 %v9130_v57, %v9129_v37  ;;  %v1832_v42 = vadd.f32 %v9132_v48, %v9131_v39  ;;  %9134 = vst [vmem:[#allocation62_spill] sm:$0xff] %v7486_v21  ;;  %v9136_v29 = vld [vmem:[#allocation50_spill] sm:$0xff]  ;;  %v9137_v39 = vld [vmem:[#allocation67_spill] sm:$0xff] }
 0x247   :  { %v3321_v62 = vsel %vm3253_vm2, %v3165_v55, 0.0  ;;  %v1831_v0 = vadd.f32 %v9132_v48, %v9135_v15  ;;  %v3337_v8 = vadd.f32 %v3336_v34, %v3335_v4  ;;  %v3167_v41 = vmul.f32 %v9128_v40, %v2127_v33 }
 0x248   :  { %v2003_v28 = vmul.f32 0.2, %v1875_v43  ;;  %3106 = vperm.xlu1 %6028, %v7419_v50   ;;  %v2580_v14 = vcombine.high %v7447_v11, %v7447_v11  ;;  %v3338_v37 = vsel %vm3253_vm2, %v3168_v12, 0.0  ;;  %v3170_v55 = vmul.f32 %v9136_v29, %v2130_v53  ;;  %v7506_v50 = vpop.permute.xlu1 %557  ;;  %v7508_v3 = vpop.permute.xlu0 %553  ;;  %v9141_v53 = vld [vmem:[#allocation97_spill] sm:$0xff] }
 0x249   :  { %v1829_v48 = vadd.f32 %v9130_v57, %v9137_v39  ;;  %3074 = vperm.xlu0 %6029, %v2820_v9   ;;  %v2531_v15 = vcombine.high %v7450_v24, %v7450_v24  ;;  %v3169_v4 = vmul.f32 %v9136_v29, %v2129_v36  ;;  %v2132_v33 = vmax.f32 %v1876_v25, %v2004_v58  ;;  %v9143_v39 = vld [vmem:[#allocation76_spill] sm:$0xff]  ;;  %v9144_v36 = vld [vmem:[#allocation98_spill] sm:$0xff]  ;;  %v9145_v58 = vld [vmem:[#allocation25_spill] sm:$0xff] }
 0x24a   :  { %v1958_v34 = vmul.f32 0.2, %v1830_v63  ;;  %v1960_v40 = vmul.f32 0.2, %v1832_v42  ;;  %9138 = vst [vmem:[#allocation63_spill] sm:$0xff] %v7506_v50  ;;  %9139 = vst [vmem:[#allocation42_spill] sm:$0xff] %v7508_v3  ;;  %v3322_v11 = vadd.f32 %v3321_v62, %v3320_v49  ;;  %v1834_v21 = vadd.f32 %v9141_v53, %v9140_v31 }
 0x24b   :  { %v1959_v12 = vmul.f32 0.2, %v1831_v0  ;;  %v1833_v9 = vadd.f32 %v9141_v53, %v9142_v35  ;;  %v3323_v57 = vsel %vm3253_vm2, %v3167_v41, 0.0  ;;  %v2131_v24 = vmax.f32 %v1875_v43, %v2003_v28  ;;  %v9146_v43 = vld [vmem:[#allocation54_spill] sm:$0xff] }
 0x24c   :  { %v1835_v25 = vadd.f32 %v9144_v36, %v9143_v39  ;;  %843 = vbcast.lane.b32.xlu1 %v9145_v58, 264  ;;  %v7519_v29 = vrot.slane %v2580_v14, %v6291_v19  ;;  %v3339_v3 = vadd.f32 %v3338_v37, %v3337_v8  ;;  %v3340_v49 = vsel %vm3253_vm2, %v3170_v55, 0.0  ;;  %v7528_v39 = vpop.permute.xlu1 %568  ;;  %v7530_v50 = vpop.permute.xlu0 %564  ;;  %v9149_v55 = vld [vmem:[#allocation75_spill] sm:$0xff] }
 0x24d   :  { %v1957_v62 = vmul.f32 0.2, %v1829_v48  ;;  %839 = vbcast.lane.b32.xlu0 %v9145_v58, 256  ;;  %v7524_v31 = vrot.slane %v2531_v15, %v6291_v19  ;;  %v3325_v35 = vsel %vm3253_vm2, %v3169_v4, 0.0  ;;  %v3172_v41 = vmul.f32 %v9146_v43, %v2132_v33  ;;  %9147 = vst [vmem:[#allocation64_spill] sm:$0xff] %v7528_v39  ;;  %9148 = vst [vmem:[#allocation65_spill] sm:$0xff] %v7530_v50 }
 0x24e   :  { %v2086_v28 = vmax.f32 %v1830_v63, %v1958_v34  ;;  %v2088_v53 = vmax.f32 %v1832_v42, %v1960_v40  ;;  %v2087_v14 = vmax.f32 %v1831_v0, %v1959_v12  ;;  %v1962_v8 = vmul.f32 0.2, %v1834_v21  ;;  %v9151_v4 = vld [vmem:[#allocation81_spill] sm:$0xff]  ;;  %v9152_v33 = vld [vmem:[#allocation99_spill] sm:$0xff]  ;;  %v9153_v12 = vld [vmem:[#allocation6_spill] sm:$0xff] }
 0x24f   :  { %v1961_v37 = vmul.f32 0.2, %v1833_v9  ;;  %v1836_v60 = vadd.f32 %v9144_v36, %v9149_v55  ;;  %v3324_v58 = vadd.f32 %v3323_v57, %v3322_v11  ;;  %v3171_v15 = vmul.f32 %v9146_v43, %v2131_v24  ;;  %v9154_v57 = vld [vmem:[#allocation5_spill] sm:$0xff]  ;;  %v9157_v50 = vld [vmem:[#allocation80_spill] sm:$0xff] }
 0x250   :  { %v1963_v19 = vmul.f32 0.2, %v1835_v25  ;;  %931 = vbcast.lane.b32.xlu1 %v9150_v46, 264  ;;  %v2085_v42 = vmax.f32 %v1829_v48, %v1957_v62  ;;  %v1837_v34 = vadd.f32 %v9152_v33, %v9151_v4  ;;  %v3341_v40 = vadd.f32 %v3340_v49, %v3339_v3  ;;  %v7545_v36 = vpop.permute.xlu1 %579  ;;  %v7547_v43 = vpop.permute.xlu0 %575  ;;  %v9158_v49 = vld [vmem:[#allocation84_spill] sm:$0xff] }
 0x251   :  { %927 = vbcast.lane.b32.xlu0 %v9150_v46, 256  ;;  %v3126_v11 = vmul.f32 %v9153_v12, %v2086_v28  ;;  %v3128_v24 = vmul.f32 %v9154_v57, %v2088_v53  ;;  %9155 = vst [vmem:[#allocation44_spill] sm:$0xff] %v7545_v36  ;;  %9156 = vst [vmem:[#allocation66_spill] sm:$0xff] %v7547_v43  ;;  %v3342_v55 = vsel %vm3253_vm2, %v3172_v41, 0.0  ;;  %v1964_v46 = vmul.f32 0.2, %v1836_v60 }
 0x252   :  { %v3326_v48 = vadd.f32 %v3325_v35, %v3324_v58  ;;  %v3127_v62 = vmul.f32 %v9154_v57, %v2087_v14  ;;  %v2090_v4 = vmax.f32 %v1834_v21, %v1962_v8  ;;  %v2089_v63 = vmax.f32 %v1833_v9, %v1961_v37  ;;  %v9159_v28 = vld [vmem:[#allocation104_spill] sm:$0xff]  ;;  %v9160_v35 = vld [vmem:[#allocation83_spill] sm:$0xff]  ;;  %v9161_v21 = vld [vmem:[#allocation89_spill] sm:$0xff] }
 0x253   :  { %v2091_v39 = vmax.f32 %v1835_v25, %v1963_v19  ;;  %v1838_v3 = vadd.f32 %v9152_v33, %v9157_v50  ;;  %v1839_v0 = vadd.f32 %v9159_v28, %v9158_v49  ;;  %v3327_v53 = vsel %vm3253_vm2, %v3171_v15, 0.0  ;;  %v9162_v9 = vld [vmem:[#allocation102_spill] sm:$0xff] }
 0x254   :  { %975 = vbcast.lane.b32.xlu1 %v7177_v47, 264  ;;  %v3125_v36 = vmul.f32 %v9153_v12, %v2085_v42  ;;  %v1965_v41 = vmul.f32 0.2, %v1837_v34  ;;  %v1840_v14 = vadd.f32 %v9159_v28, %v9160_v35  ;;  %v1841_v8 = vadd.f32 %v9162_v9, %v9161_v21  ;;  %v7565_v25 = vpop.permute.xlu1 %766  ;;  %v9164_v42 = vld [vmem:[#allocation10_spill] sm:$0xff]  ;;  %v9167_v35 = vld [vmem:[#allocation88_spill] sm:$0xff] }
 0x255   :  { %971 = vbcast.lane.b32.xlu0 %v7177_v47, 256  ;;  %v3269_v19 = vsel %vm3253_vm2, %v3126_v11, 0.0  ;;  %v3270_v50 = vsel %vm3253_vm2, %v3128_v24, 0.0  ;;  %9163 = vst [vmem:[#allocation95_spill] sm:$0xff] %v7565_v25  ;;  %v2610_v37 = vcombine.high %v7467_v23, %v7467_v23  ;;  %v3255_v15 = vsel %vm3253_vm2, %v3127_v62, 0.0  ;;  %v7574_v47 = vpop.permute.xlu0 %762  ;;  %v9166_v11 = vld [vmem:[#allocation12_spill] sm:$0xff] }
 0x256   :  { %v3130_v33 = vmul.f32 %v9164_v42, %v2090_v4  ;;  %v3129_v12 = vmul.f32 %v9164_v42, %v2089_v63  ;;  %v2092_v57 = vmax.f32 %v1836_v60, %v1964_v46  ;;  %9165 = vst [vmem:[#allocation69_spill] sm:$0xff] %v7574_v47  ;;  %v3131_v49 = vmul.f32 %v9166_v11, %v2091_v39  ;;  %v9168_v62 = vld [vmem:[#allocation92_spill] sm:$0xff]  ;;  %v9170_v46 = vld [vmem:[#allocation91_spill] sm:$0xff] }
 0x257   :  { %v1966_v24 = vmul.f32 0.2, %v1838_v3  ;;  %v1967_v28 = vmul.f32 0.2, %v1839_v0  ;;  %v1842_v21 = vadd.f32 %v9162_v9, %v9167_v35  ;;  %v2093_v25 = vmax.f32 %v1837_v34, %v1965_v41 }
 0x258   :  { %1063 = vbcast.lane.b32.xlu1 %v7187_v13, 264  ;;  %v1968_v58 = vmul.f32 0.2, %v1840_v14  ;;  %v1969_v43 = vmul.f32 0.2, %v1841_v8  ;;  %v1843_v4 = vadd.f32 %v9169_v18, %v9168_v62  ;;  %v3254_v60 = vsel %vm3253_vm2, %v3125_v36, 0.0  ;;  %v7586_v42 = vpop.permute.xlu1 %777 }
 0x259   :  { %1059 = vbcast.lane.b32.xlu0 %v7187_v13, 256  ;;  %v3271_v63 = vadd.f32 %v3270_v50, %v3269_v19  ;;  %v1844_v39 = vadd.f32 %v9169_v18, %v9170_v46  ;;  %v3343_v47 = vadd.f32 %v3342_v55, %v3341_v40  ;;  %v3256_v9 = vadd.f32 %v3255_v15, %v3254_v60  ;;  %v7591_v61 = vpop.permute.xlu0 %773  ;;  %v9172_v50 = vld [vmem:[#allocation14_spill] sm:$0xff]  ;;  %v9174_v60 = vld [vmem:[#allocation93_spill] sm:$0xff] }
 0x25a   :  { %v3272_v35 = vsel %vm3253_vm2, %v3130_v33, 0.0  ;;  %v3257_v34 = vsel %vm3253_vm2, %v3129_v12, 0.0  ;;  %v3132_v41 = vmul.f32 %v9166_v11, %v2092_v57  ;;  %v3259_v13 = vsel %vm3253_vm2, %v3131_v49, 0.0  ;;  %v9175_v49 = vld [vmem:[#allocation103_spill] sm:$0xff] }
 0x25b   :  { %v2094_v62 = vmax.f32 %v1838_v3, %v1966_v24  ;;  %v2095_v36 = vmax.f32 %v1839_v0, %v1967_v28  ;;  %v1970_v19 = vmul.f32 0.2, %v1842_v21  ;;  %v9171_v18 = vrot.slane %v7467_v23, %v6315_v30 }
 0x25c   :  { %v3133_v40 = vmul.f32 %v9172_v50, %v2093_v25  ;;  %v2096_v55 = vmax.f32 %v1840_v14, %v1968_v58  ;;  %v2097_v15 = vmax.f32 %v1841_v8, %v1969_v43  ;;  %v1971_v33 = vmul.f32 0.2, %v1843_v4  ;;  %v7603_v0 = vpop.permute.xlu1 %788  ;;  %v9177_v25 = vld [vmem:[#allocation94_spill] sm:$0xff] }
 0x25d   :  { %3110 = vperm.xlu1 %6028, %v9171_v18   ;;  %v9173_v12 = vrot.slane %v7471_v56, %v6315_v30  ;;  %v3258_v57 = vadd.f32 %v3257_v34, %v3256_v9  ;;  %v1972_v11 = vmul.f32 0.2, %v1844_v39  ;;  %v1878_v3 = vadd.f32 %v9175_v49, %v9174_v60  ;;  %v7610_v14 = vpop.permute.xlu0 %784  ;;  %v9178_v9 = vld [vmem:[#allocation19_spill] sm:$0xff] }
 0x25e   :  { %v7605_v24 = vadd.f32 %v3327_v53, %v3326_v48  ;;  %v3273_v23 = vadd.f32 %v3272_v35, %v3271_v63  ;;  %v3274_v28 = vsel %vm3253_vm2, %v3132_v41, 0.0  ;;  %v1877_v43 = vadd.f32 %v9175_v49, %v9177_v25  ;;  %v9180_v63 = vld [vmem:[#allocation24_spill] sm:$0xff] }
 0x25f   :  { %3078 = vperm.xlu0 %6029, %v9173_v12   ;;  %v7613_v8 = vrot.slane %v2610_v37, %v6315_v30  ;;  %v3260_v58 = vadd.f32 %v3259_v13, %v3258_v57  ;;  %v3134_v46 = vmul.f32 %v9172_v50, %v2094_v62  ;;  %v3135_v34 = vmul.f32 %v9178_v9, %v2095_v36  ;;  %v9179_v12 = vld [vmem:[#allocation29_spill] sm:$0xff]  ;;  %v9181_v49 = vld [vmem:[#allocation100_spill] sm:$0xff] }
 0x260   :  { %9176 = vst [vmem:[#allocation96_spill] sm:$0xff] %v7605_v24  ;;  %v2098_v18 = vmax.f32 %v1842_v21, %v1970_v19  ;;  %v3261_v48 = vsel %vm3253_vm2, %v3133_v40, 0.0  ;;  %v3136_v53 = vmul.f32 %v9178_v9, %v2096_v55  ;;  %v3137_v35 = vmul.f32 %v9180_v63, %v2097_v15  ;;  %v9182_v13 = vld [vmem:[#allocation105_spill] sm:$0xff]  ;;  %v7626_v21 = vpop.permute.xlu1 %799  ;;  %v9191_v24 = vld [vmem:[#allocation110_spill] sm:$0xff] }
 0x261   :  { %986 = vbcast.lane.b32.xlu1 %v9179_v12, 264  ;;  %v2099_v41 = vmax.f32 %v1843_v4, %v1971_v33  ;;  %v2100_v60 = vmax.f32 %v1844_v39, %v1972_v11  ;;  %v2006_v37 = vmul.f32 0.2, %v1878_v3  ;;  %v1880_v57 = vadd.f32 %v9182_v13, %v9181_v49  ;;  %v9183_v62 = vld [vmem:[#allocation101_spill] sm:$0xff]  ;;  %v7640_v25 = vpop.permute.xlu0 %795  ;;  %v9188_v49 = vld [vmem:[#allocation108_spill] sm:$0xff] }
 0x262   :  { %v1879_v36 = vadd.f32 %v9182_v13, %v9183_v62  ;;  %v3275_v19 = vadd.f32 %v3274_v28, %v3273_v23  ;;  %v2005_v50 = vmul.f32 0.2, %v1877_v43  ;;  %v9184_v40 = vcombine.high %v7471_v56, %v7471_v56  ;;  %v9186_v23 = vld [vmem:[#allocation30_spill] sm:$0xff]  ;;  %v9187_v9 = vld [vmem:[#allocation33_spill] sm:$0xff] }
 0x263   :  { %982 = vbcast.lane.b32.xlu0 %v9179_v12, 256  ;;  %v7635_v4 = vadd.f32 %v7393_v7, %v3343_v47  ;;  %v3276_v39 = vsel %vm3253_vm2, %v3134_v46, 0.0  ;;  %v3262_v15 = vadd.f32 %v3261_v48, %v3260_v58  ;;  %v3263_v33 = vsel %vm3253_vm2, %v3135_v34, 0.0  ;;  %v9189_v47 = vld [vmem:[#allocation107_spill] sm:$0xff] }
 0x264   :  { %v7632_v55 = vrot.slane %v9184_v40, %v6315_v30  ;;  %v3138_v11 = vmul.f32 %v9180_v63, %v2098_v18  ;;  %v3278_v28 = vsel %vm3253_vm2, %v3136_v53, 0.0  ;;  %v3265_v56 = vsel %vm3253_vm2, %v3137_v35, 0.0  ;;  %v7650_v48 = vpop.permute.xlu1 %810  ;;  %v9190_v53 = vld [vmem:[#allocation109_spill] sm:$0xff] }
 0x265   :  { %9185 = vst [vmem:[#allocation70_spill] sm:$0xff] %v7635_v4  ;;  %1074 = vbcast.lane.b32.xlu1 %v9186_v23, 264  ;;  %v3139_v12 = vmul.f32 %v9187_v9, %v2099_v41  ;;  %v1882_v13 = vadd.f32 %v9189_v47, %v9188_v49  ;;  %v3140_v58 = vmul.f32 %v9187_v9, %v2100_v60  ;;  %v2008_v34 = vmul.f32 0.2, %v1880_v57  ;;  %v7669_v9 = vpop.permute.xlu0 %806 }
 0x266   :  { %v2134_v46 = vmax.f32 %v1878_v3, %v2006_v37  ;;  %v2007_v18 = vmul.f32 0.2, %v1879_v36  ;;  %v3277_v63 = vadd.f32 %v3276_v39, %v3275_v19  ;;  %v3264_v62 = vadd.f32 %v3263_v33, %v3262_v15 }
 0x267   :  { %1070 = vbcast.lane.b32.xlu0 %v9186_v23, 256  ;;  %v2133_v40 = vmax.f32 %v1877_v43, %v2005_v50  ;;  %v1881_v35 = vadd.f32 %v9189_v47, %v9190_v53  ;;  %v3280_v41 = vsel %vm3253_vm2, %v3138_v11, 0.0  ;;  %v1884_v49 = vadd.f32 %v9191_v24, %v7144_v51  ;;  %v9194_v51 = vld [vmem:[#allocation22_spill] sm:$0xff] }
 0x268   :  { %v9192_v23 = vrot.slane %v7519_v29, %v6315_v30  ;;  %v2612_v3 = vcombine.high %v7519_v29, %v7519_v29  ;;  %v2563_v60 = vcombine.high %v7524_v31, %v7524_v31  ;;  %v3279_v37 = vadd.f32 %v3278_v28, %v3277_v63  ;;  %v855_v47 = vpop.permute.xlu1 %854 }
 0x269   :  { %v2010_v43 = vmul.f32 0.2, %v1882_v13  ;;  %v9193_v19 = vrot.slane %v7524_v31, %v6315_v30  ;;  %v3266_v50 = vadd.f32 %v3265_v56, %v3264_v62  ;;  %v3267_v39 = vsel %vm3253_vm2, %v3139_v12, 0.0  ;;  %v9195_v12 = vld [vmem:[#allocation111_spill] sm:$0xff] }
 0x26a   :  { %3114 = vperm.xlu1 %6028, %v9192_v23   ;;  %v3174_v15 = vmul.f32 %v9194_v51, %v2134_v46  ;;  %v2136_v33 = vmax.f32 %v1880_v57, %v2008_v34  ;;  %v2135_v11 = vmax.f32 %v1879_v36, %v2007_v18  ;;  %v3282_v29 = vsel %vm3253_vm2, %v3140_v58, 0.0  ;;  %v9196_v57 = vld [vmem:[#allocation31_spill] sm:$0xff] }
 0x26b   :  { %3082 = vperm.xlu0 %6029, %v9193_v19   ;;  %v3173_v53 = vmul.f32 %v9194_v51, %v2133_v40  ;;  %v2009_v28 = vmul.f32 0.2, %v1881_v35  ;;  %v1910_v63 = vadd.f32 %v7241_v17, %v855_v47  ;;  %v3281_v23 = vadd.f32 %v3280_v41, %v3279_v37  ;;  %v9197_v41 = vld [vmem:[#allocation21_spill] sm:$0xff]  ;;  %v7693_v51 = vpop.permute.xlu0 %850 }
 0x26c   :  { %v2012_v31 = vmul.f32 0.2, %v1884_v49  ;;  %v1883_v56 = vadd.f32 %v9191_v24, %v7146_v20  ;;  %v1886_v46 = vadd.f32 %v9195_v12, %v7189_v45  ;;  %v3268_v36 = vadd.f32 %v3267_v39, %v3266_v50  ;;  %v866_v45 = vpop.permute.xlu1 %865 }
 0x26d   :  { %v2138_v34 = vmax.f32 %v1882_v13, %v2010_v43  ;;  %v1885_v58 = vadd.f32 %v9195_v12, %v7191_v54  ;;  %v7683_v18 = vrot.slane %v2612_v3, %v6315_v30  ;;  %v3283_v62 = vadd.f32 %v3282_v29, %v3281_v23 }
 0x26e   :  { %997 = vbcast.lane.b32.xlu1 %v9196_v57, 264  ;;  %v3359_v40 = vsel %vm3253_vm2, %v3174_v15, 0.0  ;;  %v3176_v20 = vmul.f32 %v9197_v41, %v2136_v33  ;;  %v3175_v24 = vmul.f32 %v9197_v41, %v2135_v11  ;;  %v7689_v37 = vrot.slane %v2563_v60, %v6315_v30  ;;  %v9198_v15 = vld [vmem:[#allocation34_spill] sm:$0xff] }
 0x26f   :  { %993 = vbcast.lane.b32.xlu0 %v9196_v57, 256  ;;  %v3344_v13 = vsel %vm3253_vm2, %v3173_v53, 0.0  ;;  %v2137_v43 = vmax.f32 %v1881_v35, %v2009_v28  ;;  %v2038_v54 = vmul.f32 0.2, %v1910_v63  ;;  %v1912_v19 = vadd.f32 %v7244_v32, %v866_v45  ;;  %v9200_v11 = vld [vmem:[#allocation26_spill] sm:$0xff]  ;;  %v9202_v28 = vld [vmem:[#allocation113_spill] sm:$0xff] }
 0x270   :  { %v2140_v50 = vmax.f32 %v1884_v49, %v2012_v31  ;;  %v2011_v3 = vmul.f32 0.2, %v1883_v56  ;;  %v2014_v39 = vmul.f32 0.2, %v1886_v46  ;;  %v7697_v33 = vadd.f32 %v7370_v52, %v3268_v36  ;;  %v877_v12 = vpop.permute.xlu1 %876  ;;  %v9203_v45 = vld [vmem:[#allocation39_spill] sm:$0xff] }
 0x271   :  { %v3178_v47 = vmul.f32 %v9200_v11, %v2138_v34  ;;  %v2013_v60 = vmul.f32 0.2, %v1885_v58  ;;  %v2040_v29 = vmul.f32 0.2, %v1912_v19  ;;  %v7702_v35 = vadd.f32 %v7393_v7, %v3283_v62 }
 0x272   :  { %1085 = vbcast.lane.b32.xlu1 %v9198_v15, 264  ;;  %9199 = vst [vmem:[#allocation50_spill] sm:$0xff] %v7697_v33  ;;  %v3360_v49 = vsel %vm3253_vm2, %v3176_v20, 0.0  ;;  %v3345_v53 = vsel %vm3253_vm2, %v3175_v24, 0.0  ;;  %v1888_v23 = vadd.f32 %v9202_v28, %v7232_v1  ;;  %v1887_v31 = vadd.f32 %v9202_v28, %v7234_v16  ;;  %v9204_v24 = vld [vmem:[#allocation47_spill] sm:$0xff] }
 0x273   :  { %1081 = vbcast.lane.b32.xlu0 %v9198_v15, 256  ;;  %9201 = vst [vmem:[#allocation67_spill] sm:$0xff] %v7702_v35  ;;  %v3177_v57 = vmul.f32 %v9200_v11, %v2137_v43  ;;  %v2166_v36 = vmax.f32 %v1910_v63, %v2038_v54  ;;  %v2168_v34 = vmax.f32 %v1912_v19, %v2040_v29  ;;  %v7716_v20 = vsel %vm3253_vm2, %v7697_v33, -inf }
 0x274   :  { %v1914_v41 = vadd.f32 %v7250_v27, %v877_v12  ;;  %v3180_v62 = vmul.f32 %v9203_v45, %v2140_v50  ;;  %v2139_v15 = vmax.f32 %v1883_v56, %v2011_v3  ;;  %v2142_v30 = vmax.f32 %v1886_v46, %v2014_v39  ;;  %v7721_v56 = vpop.permute.xlu0 %861  ;;  %v888_v46 = vpop.permute.xlu1 %887  ;;  %v9205_v3 = vld [vmem:[#allocation48_spill] sm:$0xff]  ;;  %v9208_v12 = vld [vmem:[#allocation51_spill] sm:$0xff] }
 0x275   :  { %v3362_v1 = vsel %vm3253_vm2, %v3178_v47, 0.0  ;;  %v2141_v16 = vmax.f32 %v1885_v58, %v2013_v60  ;;  %v3208_v28 = vmul.f32 %v9204_v24, %v2168_v34  ;;  %v3361_v63 = vadd.f32 %v3360_v49, %v3359_v40 }
 0x276   :  { %3118 = vperm.xlu1 %6028, %v7613_v8   ;;  %v2042_v43 = vmul.f32 0.2, %v1914_v41  ;;  %v3346_v54 = vadd.f32 %v3345_v53, %v3344_v13  ;;  %v2016_v19 = vmul.f32 0.2, %v1888_v23  ;;  %v2015_v50 = vmul.f32 0.2, %v1887_v31 }
 0x277   :  { %3086 = vperm.xlu0 %6029, %v7632_v55   ;;  %v3347_v8 = vsel %vm3253_vm2, %v3177_v57, 0.0  ;;  %v3206_v39 = vmul.f32 %v9205_v3, %v2166_v36  ;;  %v1916_v47 = vadd.f32 %v7253_v2, %v888_v46  ;;  %v3363_v58 = vadd.f32 %v3362_v1, %v3361_v63  ;;  %v9206_v55 = vld [vmem:[#allocation41_spill] sm:$0xff]  ;;  %v9207_v13 = vld [vmem:[#allocation35_spill] sm:$0xff]  ;;  %v9209_v1 = vld [vmem:[#allocation112_spill] sm:$0xff] }
 0x278   :  { %v2170_v11 = vmax.f32 %v1914_v41, %v2042_v43  ;;  %v3364_v60 = vsel %vm3253_vm2, %v3180_v62, 0.0  ;;  %v3179_v29 = vmul.f32 %v9203_v45, %v2139_v15  ;;  %v3182_v40 = vmul.f32 %v9206_v55, %v2142_v30  ;;  %v899_v30 = vpop.permute.xlu1 %898 }
 0x279   :  { %v3181_v49 = vmul.f32 %v9206_v55, %v2141_v16  ;;  %v3420_v53 = vsel %vm3253_vm2, %v3208_v28, 0.0  ;;  %v2044_v34 = vmul.f32 0.2, %v1916_v47  ;;  %v2144_v36 = vmax.f32 %v1888_v23, %v2016_v19  ;;  %v7744_v19 = vpop.permute.xlu0 %872 }
 0x27a   :  { %1008 = vbcast.lane.b32.xlu1 %v9207_v13, 264  ;;  %v3210_v57 = vmul.f32 %v9208_v12, %v2170_v11  ;;  %v2143_v41 = vmax.f32 %v1887_v31, %v2015_v50  ;;  %v1890_v62 = vadd.f32 %v9209_v1, %v7296_v6  ;;  %v7738_v45 = vadd.f32 %v9209_v1, %v7298_v59  ;;  %v9210_v6 = vld [vmem:[#allocation36_spill] sm:$0xff]  ;;  %v9211_v11 = vld [vmem:[#allocation55_spill] sm:$0xff] }
 0x27b   :  { %1004 = vbcast.lane.b32.xlu0 %v9207_v13, 256  ;;  %v3419_v15 = vsel %vm3253_vm2, %v3206_v39, 0.0  ;;  %v2172_v28 = vmax.f32 %v1916_v47, %v2044_v34  ;;  %v1918_v43 = vadd.f32 %v7274_v22, %v899_v30  ;;  %v3348_v63 = vadd.f32 %v3347_v8, %v3346_v54  ;;  %v9212_v47 = vld [vmem:[#allocation43_spill] sm:$0xff] }
 0x27c   :  { %v3422_v16 = vsel %vm3253_vm2, %v3210_v57, 0.0  ;;  %v3365_v46 = vadd.f32 %v3364_v60, %v3363_v58  ;;  %v3349_v23 = vsel %vm3253_vm2, %v3179_v29, 0.0  ;;  %v3421_v31 = vadd.f32 %v3420_v53, %v3419_v15  ;;  %v9214_v15 = vld [vmem:[#allocation20_spill] sm:$0xff] }
 0x27d   :  { %v3366_v59 = vsel %vm3253_vm2, %v3182_v40, 0.0  ;;  %v3351_v50 = vsel %vm3253_vm2, %v3181_v49, 0.0  ;;  %v3212_v39 = vmul.f32 %v9211_v11, %v2172_v28  ;;  %v2046_v55 = vmul.f32 0.2, %v1918_v43  ;;  %v9215_v28 = vld [vmem:[#allocation57_spill] sm:$0xff] }
 0x27e   :  { %1096 = vbcast.lane.b32.xlu1 %v9210_v6, 264  ;;  %v3184_v13 = vmul.f32 %v9212_v47, %v2144_v36  ;;  %v3183_v54 = vmul.f32 %v9212_v47, %v2143_v41  ;;  %v2018_v8 = vmul.f32 0.2, %v1890_v62  ;;  %v3423_v58 = vadd.f32 %v3422_v16, %v3421_v31  ;;  %v9213_v41 = vld [vmem:[#allocation114_spill] sm:$0xff]  ;;  %v9218_v31 = vld [vmem:[#allocation144_spill] sm:$0xff] }
 0x27f   :  { %1092 = vbcast.lane.b32.xlu0 %v9210_v6, 256  ;;  %v3350_v60 = vadd.f32 %v3349_v23, %v3348_v63  ;;  %v2017_v29 = vmul.f32 0.2, %v7738_v45  ;;  %v3424_v53 = vsel %vm3253_vm2, %v3212_v39, 0.0  ;;  %v2174_v57 = vmax.f32 %v1918_v43, %v2046_v55 }
 0x280   :  { %v3367_v40 = vadd.f32 %v3366_v59, %v3365_v46  ;;  %v7757_v49 = vadd.f32 %v7161_v44, %v7341_v10  ;;  %v1846_v34 = vadd.f32 %v7152_v5, %v7378_v38  ;;  %v3425_v1 = vadd.f32 %v3424_v53, %v3423_v58  ;;  %v9216_v38 = vld [vmem:[#allocation139_spill] sm:$0xff]  ;;  %v9223_v58 = vld [vmem:[#allocation68_spill] sm:$0xff] }
 0x281   :  { %v3352_v36 = vadd.f32 %v3351_v50, %v3350_v60  ;;  %v1848_v30 = vadd.f32 %v9213_v41, %v7414_v26  ;;  %v1847_v16 = vadd.f32 %v9213_v41, %v9214_v15  ;;  %v3214_v43 = vmul.f32 %v9215_v28, %v2174_v57  ;;  %v9219_v59 = vld [vmem:[#allocation27_spill] sm:$0xff]  ;;  %v9220_v50 = vld [vmem:[#allocation116_spill] sm:$0xff]  ;;  %v9224_v60 = vld [vmem:[#allocation117_spill] sm:$0xff] }
 0x282   :  { %3122 = vperm.xlu1 %6028, %v7683_v18   ;;  %v3368_v10 = vsel %vm3253_vm2, %v3184_v13, 0.0  ;;  %v3353_v63 = vsel %vm3253_vm2, %v3183_v54, 0.0  ;;  %v2146_v46 = vmax.f32 %v1890_v62, %v2018_v8  ;;  %v7772_v23 = vadd.f32 %v7161_v44, %v9216_v38  ;;  %v7774_v18 = vpop.permute.xlu0 %883  ;;  %v9221_v62 = vld [vmem:[#allocation71_spill] sm:$0xff]  ;;  %v9222_v54 = vld [vmem:[#allocation37_spill] sm:$0xff]  ;;  %v9234_v28 = vld [vmem:[#allocation42_spill] sm:$0xff] }
 0x283   :  { %3090 = vperm.xlu0 %6029, %v7689_v37   ;;  %9217 = vst [vmem:[#allocation72_spill] sm:$0xff] %v7774_v18  ;;  %v2145_v26 = vmax.f32 %v7738_v45, %v2017_v29  ;;  %v1845_v6 = vadd.f32 %v7152_v5, %v9218_v31  ;;  %v1850_v39 = vadd.f32 %v9220_v50, %v9219_v59  ;;  %v3426_v37 = vsel %vm3253_vm2, %v3214_v43, 0.0  ;;  %v9225_v41 = vld [vmem:[#allocation61_spill] sm:$0xff] }
 0x284   :  { %v2020_v55 = vmul.f32 0.2, %v7757_v49  ;;  %v1974_v47 = vmul.f32 0.2, %v1846_v34  ;;  %v1849_v13 = vadd.f32 %v9220_v50, %v9221_v62  ;;  %v7785_v44 = vadd.f32 %v3426_v37, %v3425_v1  ;;  %v9226_v43 = vld [vmem:[#allocation49_spill] sm:$0xff]  ;;  %v9227_v50 = vld [vmem:[#allocation40_spill] sm:$0xff] }
 0x285   :  { %v1976_v8 = vmul.f32 0.2, %v1848_v30  ;;  %v1975_v45 = vmul.f32 0.2, %v1847_v16  ;;  %v1852_v5 = vadd.f32 %v9224_v60, %v9223_v58  ;;  %v7793_v29 = vsel %vm3253_vm2, %v7702_v35, -inf  ;;  %v9228_v37 = vld [vmem:[#allocation115_spill] sm:$0xff] }
 0x286   :  { %1019 = vbcast.lane.b32.xlu1 %v9222_v54, 264  ;;  %v7795_v53 = vadd.f32 %v3368_v10, %v3367_v40  ;;  %v7797_v57 = vadd.f32 %v3353_v63, %v3352_v36  ;;  %v7800_v1 = vmul.f32 0.2, %v7772_v23  ;;  %v1851_v15 = vadd.f32 %v9224_v60, %v9225_v41  ;;  %v9229_v36 = vld [vmem:[#allocation62_spill] sm:$0xff]  ;;  %v7811_v58 = vpop.permute.xlu0 %894 }
 0x287   :  { %1015 = vbcast.lane.b32.xlu0 %v9222_v54, 256  ;;  %v3186_v38 = vmul.f32 %v9226_v43, %v2146_v46  ;;  %v1973_v31 = vmul.f32 0.2, %v1845_v6  ;;  %v1978_v59 = vmul.f32 0.2, %v1850_v39  ;;  %v1854_v62 = vadd.f32 %v9228_v37, %v9227_v50  ;;  %9230 = vst [vmem:[#allocation97_spill] sm:$0xff] %v7811_v58 }
 0x288   :  { %v3185_v54 = vmul.f32 %v9226_v43, %v2145_v26  ;;  %v2148_v40 = vmax.f32 %v7757_v49, %v2020_v55  ;;  %v1977_v10 = vmul.f32 0.2, %v1849_v13  ;;  %v1853_v63 = vadd.f32 %v9228_v37, %v9229_v36  ;;  %v9231_v35 = vld [vmem:[#allocation38_spill] sm:$0xff]  ;;  %v9232_v43 = vld [vmem:[#allocation63_spill] sm:$0xff] }
 0x289   :  { %v2102_v60 = vmax.f32 %v1846_v34, %v1974_v47  ;;  %v2104_v41 = vmax.f32 %v1848_v30, %v1976_v8  ;;  %v2103_v46 = vmax.f32 %v1847_v16, %v1975_v45  ;;  %v1980_v33 = vmul.f32 0.2, %v1852_v5  ;;  %v9233_v49 = vld [vmem:[#allocation118_spill] sm:$0xff]  ;;  %v7824_v16 = vpop.permute.xlu1 %3066  ;;  %v9236_v45 = vld [vmem:[#allocation119_spill] sm:$0xff] }
 0x28a   :  { %1107 = vbcast.lane.b32.xlu1 %v9231_v35, 264  ;;  %v2147_v50 = vmax.f32 %v7772_v23, %v7800_v1  ;;  %v1979_v26 = vmul.f32 0.2, %v1851_v15  ;;  %v1856_v55 = vadd.f32 %v9233_v49, %v9232_v43  ;;  %v1855_v37 = vadd.f32 %v9233_v49, %v9234_v28  ;;  %v9235_v23 = vld [vmem:[#allocation65_spill] sm:$0xff]  ;;  %v7829_v12 = vpop.permute.xlu0 %3062  ;;  %v9237_v43 = vld [vmem:[#allocation8_spill] sm:$0xff]  ;;  %v9238_v28 = vld [vmem:[#allocation7_spill] sm:$0xff] }
 0x28b   :  { %1103 = vbcast.lane.b32.xlu0 %v9231_v35, 256  ;;  %v7822_v36 = vsel %vm3253_vm2, %v3186_v38, 0.0  ;;  %v2101_v11 = vmax.f32 %v1845_v6, %v1973_v31  ;;  %v2106_v34 = vmax.f32 %v1850_v39, %v1978_v59  ;;  %v1982_v30 = vmul.f32 0.2, %v1854_v62  ;;  %v9239_v39 = vld [vmem:[#allocation53_spill] sm:$0xff] }
 0x28c   :  { %v3355_v35 = vsel %vm3253_vm2, %v3185_v54, 0.0  ;;  %v2105_v47 = vmax.f32 %v1849_v13, %v1977_v10  ;;  %v1981_v8 = vmul.f32 0.2, %v1853_v63  ;;  %v1857_v1 = vadd.f32 %v9236_v45, %v9235_v23  ;;  %v9240_v54 = vld [vmem:[#allocation9_spill] sm:$0xff]  ;;  %v9241_v23 = vld [vmem:[#allocation64_spill] sm:$0xff] }
 0x28d   :  { %v3142_v22 = vmul.f32 %v9237_v43, %v2102_v60  ;;  %v3144_v49 = vmul.f32 %v9238_v28, %v2104_v41  ;;  %v3143_v38 = vmul.f32 %v9238_v28, %v2103_v46  ;;  %v2108_v6 = vmax.f32 %v1852_v5, %v1980_v33  ;;  %v7839_v18 = vpop.permute.xlu1 %3098  ;;  %v9242_v33 = vld [vmem:[#allocation66_spill] sm:$0xff] }
 0x28e   :  { %v3188_v31 = vmul.f32 %v9239_v39, %v2148_v40  ;;  %v2107_v59 = vmax.f32 %v1851_v15, %v1979_v26  ;;  %v1984_v58 = vmul.f32 0.2, %v1856_v55  ;;  %v1983_v24 = vmul.f32 0.2, %v1855_v37  ;;  %v9243_v5 = vld [vmem:[#allocation122_spill] sm:$0xff]  ;;  %v7844_v15 = vpop.permute.xlu0 %3094 }
 0x28f   :  { %v3141_v13 = vmul.f32 %v9237_v43, %v2101_v11  ;;  %v3146_v10 = vmul.f32 %v9240_v54, %v2106_v34  ;;  %v2110_v3 = vmax.f32 %v1854_v62, %v1982_v30  ;;  %v1858_v2 = vadd.f32 %v9236_v45, %v9241_v23  ;;  %v9244_v34 = vld [vmem:[#allocation11_spill] sm:$0xff]  ;;  %v9246_v23 = vld [vmem:[#allocation13_spill] sm:$0xff] }
 0x290   :  { %v3145_v60 = vmul.f32 %v9240_v54, %v2105_v47  ;;  %v2109_v41 = vmax.f32 %v1853_v63, %v1981_v8  ;;  %v1985_v46 = vmul.f32 0.2, %v1857_v1  ;;  %v1859_v40 = vadd.f32 %v9243_v5, %v9242_v33  ;;  %v9245_v47 = vld [vmem:[#allocation44_spill] sm:$0xff] }
 0x291   :  { %v3299_v26 = vsel %vm3253_vm2, %v3142_v22, 0.0  ;;  %v3300_v11 = vsel %vm3253_vm2, %v3144_v49, 0.0  ;;  %v3285_v62 = vsel %vm3253_vm2, %v3143_v38, 0.0  ;;  %v3148_v30 = vmul.f32 %v9244_v34, %v2108_v6  ;;  %v7856_v27 = vpop.permute.xlu1 %821 }
 0x292   :  { %v3147_v45 = vmul.f32 %v9244_v34, %v2107_v59  ;;  %v2112_v43 = vmax.f32 %v1856_v55, %v1984_v58  ;;  %v2111_v28 = vmax.f32 %v1855_v37, %v1983_v24  ;;  %v1860_v63 = vadd.f32 %v9243_v5, %v9245_v47  ;;  %9247 = vst [vmem:[#allocation73_spill] sm:$0xff] %v7856_v27  ;;  %v7860_v58 = vpop.permute.xlu0 %817 }
 0x293   :  { %v3284_v8 = vsel %vm3253_vm2, %v3141_v13, 0.0  ;;  %v3302_v54 = vsel %vm3253_vm2, %v3146_v10, 0.0  ;;  %v3150_v33 = vmul.f32 %v9246_v23, %v2110_v3  ;;  %v1986_v22 = vmul.f32 0.2, %v1858_v2  ;;  %v9248_v3 = vld [vmem:[#allocation18_spill] sm:$0xff] }
 0x294   :  { %v3287_v49 = vsel %vm3253_vm2, %v3145_v60, 0.0  ;;  %v3149_v38 = vmul.f32 %v9246_v23, %v2109_v41  ;;  %v2113_v6 = vmax.f32 %v1857_v1, %v1985_v46  ;;  %v1987_v59 = vmul.f32 0.2, %v1859_v40 }
 0x295   :  { %v3187_v24 = vmul.f32 %v9239_v39, %v2147_v50  ;;  %v3301_v55 = vadd.f32 %v3300_v11, %v3299_v26  ;;  %v3286_v37 = vadd.f32 %v3285_v62, %v3284_v8  ;;  %v3304_v13 = vsel %vm3253_vm2, %v3148_v30, 0.0  ;;  %v910_v46 = vpop.permute.xlu1 %909  ;;  %v9249_v50 = vld [vmem:[#allocation23_spill] sm:$0xff] }
 0x296   :  { %v3289_v10 = vsel %vm3253_vm2, %v3147_v45, 0.0  ;;  %v3152_v5 = vmul.f32 %v9248_v3, %v2112_v43  ;;  %v3151_v34 = vmul.f32 %v9248_v3, %v2111_v28  ;;  %v1988_v47 = vmul.f32 0.2, %v1860_v63  ;;  %v9250_v11 = vld [vmem:[#allocation135_spill] sm:$0xff]  ;;  %v7871_v30 = vpop.permute.xlu0 %905 }
 0x297   :  { %v3303_v60 = vadd.f32 %v3302_v54, %v3301_v55  ;;  %v3288_v27 = vadd.f32 %v3287_v49, %v3286_v37  ;;  %v3306_v1 = vsel %vm3253_vm2, %v3150_v33, 0.0  ;;  %v2114_v41 = vmax.f32 %v1858_v2, %v1986_v22  ;;  %v9251_v55 = vld [vmem:[#allocation32_spill] sm:$0xff] }
 0x298   :  { %v3291_v23 = vsel %vm3253_vm2, %v3149_v38, 0.0  ;;  %v3153_v39 = vmul.f32 %v9249_v50, %v2113_v6  ;;  %v2115_v26 = vmax.f32 %v1859_v40, %v1987_v59  ;;  %v1920_v62 = vadd.f32 %v9250_v11, %v910_v46 }
 0x299   :  { %v3305_v45 = vadd.f32 %v3304_v13, %v3303_v60  ;;  %v3290_v43 = vadd.f32 %v3289_v10, %v3288_v27  ;;  %v3371_v28 = vadd.f32 %v7822_v36, %v7795_v53  ;;  %v3356_v8 = vadd.f32 %v3355_v35, %v7797_v57  ;;  %v943_v6 = vpop.permute.xlu1 %942  ;;  %v9252_v36 = vld [vmem:[#allocation132_spill] sm:$0xff] }
 0x29a   :  { %v3308_v54 = vsel %vm3253_vm2, %v3152_v5, 0.0  ;;  %v3293_v2 = vsel %vm3253_vm2, %v3151_v34, 0.0  ;;  %v2116_v33 = vmax.f32 %v1860_v63, %v1988_v47  ;;  %v2048_v22 = vmul.f32 0.2, %v1920_v62  ;;  %v939_v35 = vpop.permute.xlu0 %938  ;;  %v9253_v34 = vld [vmem:[#allocation95_spill] sm:$0xff]  ;;  %v9254_v47 = vld [vmem:[#allocation120_spill] sm:$0xff] }
 0x29b   :  { %v3307_v49 = vadd.f32 %v3306_v1, %v3305_v45  ;;  %v3292_v38 = vadd.f32 %v3291_v23, %v3290_v43  ;;  %v3154_v40 = vmul.f32 %v9249_v50, %v2114_v41  ;;  %v3372_v59 = vsel %vm3253_vm2, %v3188_v31, 0.0  ;;  %v9255_v31 = vld [vmem:[#allocation59_spill] sm:$0xff]  ;;  %v9256_v23 = vld [vmem:[#allocation69_spill] sm:$0xff]  ;;  %v9257_v43 = vld [vmem:[#allocation136_spill] sm:$0xff] }
 0x29c   :  { %v3295_v27 = vsel %vm3253_vm2, %v3153_v39, 0.0  ;;  %v3155_v37 = vmul.f32 %v9251_v55, %v2115_v26  ;;  %v2176_v53 = vmax.f32 %v1920_v62, %v2048_v22  ;;  %v1926_v57 = vadd.f32 %v9252_v36, %v943_v6  ;;  %v9258_v22 = vld [vmem:[#allocation121_spill] sm:$0xff] }
 0x29d   :  { %v3309_v13 = vadd.f32 %v3308_v54, %v3307_v49  ;;  %v3294_v10 = vadd.f32 %v3293_v2, %v3292_v38  ;;  %v1925_v63 = vadd.f32 %v9252_v36, %v939_v35  ;;  %v3357_v3 = vsel %vm3253_vm2, %v3187_v24, 0.0  ;;  %v954_v26 = vpop.permute.xlu1 %953 }
 0x29e   :  { %v3156_v5 = vmul.f32 %v9251_v55, %v2116_v33  ;;  %v7888_v60 = vadd.f32 %v9254_v47, %v9253_v34  ;;  %v3216_v1 = vmul.f32 %v9255_v31, %v2176_v53  ;;  %v2054_v41 = vmul.f32 0.2, %v1926_v57  ;;  %v950_v2 = vpop.permute.xlu0 %949 }
 0x29f   :  { %v3310_v46 = vsel %vm3253_vm2, %v3154_v40, 0.0  ;;  %v7894_v50 = vadd.f32 %v9254_v47, %v9256_v23  ;;  %v2053_v39 = vmul.f32 0.2, %v1925_v63  ;;  %v3296_v62 = vadd.f32 %v3295_v27, %v3294_v10  ;;  %v9259_v23 = vld [vmem:[#allocation137_spill] sm:$0xff] }
 0x2a0   :  { %v3428_v24 = vsel %vm3253_vm2, %v3216_v1, 0.0  ;;  %v2182_v45 = vmax.f32 %v1926_v57, %v2054_v41  ;;  %v1928_v54 = vadd.f32 %v9257_v43, %v954_v26  ;;  %v3297_v33 = vsel %vm3253_vm2, %v3155_v37, 0.0 }
 0x2a1   :  { %v7901_v49 = vadd.f32 %v9258_v22, %v7586_v42  ;;  %v7904_v38 = vadd.f32 %v3428_v24, %v7785_v44  ;;  %v2181_v40 = vmax.f32 %v1925_v63, %v2053_v39  ;;  %v1927_v6 = vadd.f32 %v9257_v43, %v950_v2  ;;  %v7912_v35 = vpop.permute.xlu1 %1030 }
 0x2a2   :  { %v1895_v27 = vadd.f32 %v9258_v22, %v7591_v61  ;;  %v3222_v55 = vmul.f32 %v7829_v12, %v2182_v45  ;;  %v2056_v53 = vmul.f32 0.2, %v1928_v54  ;;  %v3312_v36 = vsel %vm3253_vm2, %v3156_v5, 0.0  ;;  %v1027_v34 = vpop.permute.xlu0 %1026  ;;  %v9262_v45 = vld [vmem:[#allocation124_spill] sm:$0xff] }
 0x2a3   :  { %v3221_v37 = vmul.f32 %v7829_v12, %v2181_v40  ;;  %v2055_v57 = vmul.f32 0.2, %v1927_v6  ;;  %v3298_v42 = vadd.f32 %v3297_v33, %v3296_v62  ;;  %v3311_v10 = vadd.f32 %v3310_v46, %v3309_v13  ;;  %v9260_v62 = vld [vmem:[#allocation123_spill] sm:$0xff]  ;;  %v9263_v40 = vld [vmem:[#allocation138_spill] sm:$0xff] }
 0x2a4   :  { %v7915_v44 = vmul.f32 0.2, %v7888_v60  ;;  %v2184_v63 = vmax.f32 %v1928_v54, %v2056_v53  ;;  %v3373_v47 = vadd.f32 %v3372_v59, %v3371_v28  ;;  %v3358_v1 = vadd.f32 %v3357_v3, %v3356_v8 }
 0x2a5   :  { %v7918_v61 = vmul.f32 0.2, %v7894_v50  ;;  %v2183_v41 = vmax.f32 %v1927_v6, %v2055_v57  ;;  %v1941_v5 = vadd.f32 %v9259_v23, %v1027_v34  ;;  %v3313_v39 = vadd.f32 %v3312_v36, %v3311_v10  ;;  %v7930_v59 = vpop.permute.xlu1 %1041 }
 0x2a6   :  { %v2024_v12 = vmul.f32 0.2, %v7901_v49  ;;  %v2023_v26 = vmul.f32 0.2, %v1895_v27  ;;  %v1898_v13 = vadd.f32 %v9260_v62, %v7603_v0  ;;  %v3224_v46 = vmul.f32 %v7824_v16, %v2184_v63 }
 0x2a7   :  { %v7927_v24 = vadd.f32 %v9260_v62, %v7610_v14  ;;  %v3223_v28 = vmul.f32 %v7824_v16, %v2183_v41  ;;  %v2069_v8 = vmul.f32 0.2, %v1941_v5  ;;  %v7933_v3 = vadd.f32 %v7370_v52, %v3298_v42  ;;  %v1038_v14 = vpop.permute.xlu0 %1037  ;;  %v9265_v41 = vld [vmem:[#allocation96_spill] sm:$0xff] }
 0x2a8   :  { %v1900_v43 = vadd.f32 %v9262_v45, %v7626_v21  ;;  %v3449_v54 = vsel %vm3253_vm2, %v3222_v55, 0.0  ;;  %v3434_v0 = vsel %vm3253_vm2, %v3221_v37, 0.0  ;;  %v3450_v2 = vsel %vm3253_vm2, %v3224_v46, 0.0  ;;  %v9269_v46 = vld [vmem:[#allocation45_spill] sm:$0xff] }
 0x2a9   :  { %9261 = vst [vmem:[#allocation76_spill] sm:$0xff] %v7933_v3  ;;  %v7941_v33 = vadd.f32 %v3450_v2, %v3449_v54  ;;  %v3435_v16 = vsel %vm3253_vm2, %v3223_v28, 0.0  ;;  %v2197_v22 = vmax.f32 %v1941_v5, %v2069_v8  ;;  %v1943_v6 = vadd.f32 %v9263_v40, %v1038_v14 }
 0x2aa   :  { %3513 = vmax.xlane.f32.xlu0 %v7716_v20  ;;  %v2152_v53 = vmax.f32 %v7901_v49, %v2024_v12  ;;  %v2026_v36 = vmul.f32 0.2, %v1898_v13  ;;  %v7946_v21 = vadd.f32 %v3435_v16, %v3434_v0  ;;  %v7949_v55 = vadd.f32 %v7393_v7, %v3313_v39  ;;  %v7953_v42 = vpop.permute.xlu1 %3054 }
 0x2ab   :  { %v2151_v37 = vmax.f32 %v1895_v27, %v2023_v26  ;;  %v1899_v20 = vadd.f32 %v9262_v45, %v7640_v25  ;;  %v2071_v57 = vmul.f32 0.2, %v1943_v6  ;;  %v3518_v10 = vsel %vm3253_vm2, %v7933_v3, -inf  ;;  %v7958_v49 = vpop.permute.xlu0 %3022 }
 0x2ac   :  { %9264 = vst [vmem:[#allocation98_spill] sm:$0xff] %v7949_v55  ;;  %v2025_v63 = vmul.f32 0.2, %v7927_v24  ;;  %v2028_v34 = vmul.f32 0.2, %v1900_v43  ;;  %v3527_v27 = vsel %vm3253_vm2, %v7635_v4, -inf  ;;  %v7965_v25 = vadd.f32 %v7370_v52, %v9265_v41 }
 0x2ad   :  { %v3237_v5 = vmul.f32 %v7844_v15, %v2197_v22  ;;  %v2199_v39 = vmax.f32 %v1943_v6, %v2071_v57  ;;  %v7969_v12 = vadd.f32 %v7393_v7, %v3373_v47  ;;  %v7972_v26 = vadd.f32 %v7370_v52, %v3358_v1 }
 0x2ae   :  { %3519 = vmax.xlane.f32.xlu0 %v3518_v10  ;;  %3516 = vmax.xlane.f32.xlu1 %v7793_v29  ;;  %9266 = vst [vmem:[#allocation25_spill] sm:$0xff] %v7965_v25  ;;  %v2150_v62 = vmax.f32 %v7888_v60, %v7915_v44  ;;  %v2149_v29 = vmax.f32 %v7894_v50, %v7918_v61  ;;  %v2027_v54 = vmul.f32 0.2, %v1899_v20  ;;  %v7981_v2 = vpop.permute.xlu1 %3102  ;;  %v3521_v47 = vsel %vm3253_vm2, %v7949_v55, -inf  ;;  %v9270_v60 = vld [vmem:[#allocation125_spill] sm:$0xff] }
 0x2af   :  { %9267 = vst [vmem:[#allocation54_spill] sm:$0xff] %v7969_v12  ;;  %9268 = vst [vmem:[#allocation75_spill] sm:$0xff] %v7972_v26  ;;  %v3192_v28 = vmul.f32 %v9269_v46, %v2152_v53  ;;  %v2154_v8 = vmax.f32 %v1898_v13, %v2026_v36  ;;  %v3191_v45 = vmul.f32 %v9269_v46, %v2151_v37  ;;  %v3524_v61 = vsel %vm3253_vm2, %v7965_v25, -inf  ;;  %v9272_v53 = vld [vmem:[#allocation52_spill] sm:$0xff]  ;;  %v9275_v46 = vld [vmem:[#allocation126_spill] sm:$0xff] }
 0x2b0   :  { %v3239_v0 = vmul.f32 %v7839_v18, %v2199_v39  ;;  %v2153_v1 = vmax.f32 %v7927_v24, %v2025_v63  ;;  %v2156_v14 = vmax.f32 %v1900_v43, %v2028_v34  ;;  %v1902_v44 = vadd.f32 %v9270_v60, %v7650_v48  ;;  %v7988_v50 = vpop.permute.xlu0 %3070  ;;  %v9271_v43 = vld [vmem:[#allocation46_spill] sm:$0xff]  ;;  %v9294_v25 = vld [vmem:[#allocation143_spill] sm:$0xff] }
 0x2b1   :  { %v1901_v13 = vadd.f32 %v9270_v60, %v7669_v9  ;;  %v1909_v16 = vadd.f32 %v7241_v17, %v7693_v51  ;;  %v3464_v22 = vsel %vm3253_vm2, %v3237_v5, 0.0  ;;  %v3190_v6 = vmul.f32 %v9271_v43, %v2150_v62 }
 0x2b2   :  { %3522 = vmax.xlane.f32.xlu0 %v3521_v47  ;;  %3528 = vmax.xlane.f32.xlu1 %v3527_v27  ;;  %v3465_v24 = vsel %vm3253_vm2, %v3239_v0, 0.0  ;;  %v3189_v48 = vmul.f32 %v9271_v43, %v2149_v29  ;;  %v3194_v36 = vmul.f32 %v9272_v53, %v2154_v8  ;;  %v3390_v57 = vsel %vm3253_vm2, %v3192_v28, 0.0  ;;  %v833_v63 = vpop.permute.xlu1 %832  ;;  %v9273_v27 = vld [vmem:[#allocation56_spill] sm:$0xff]  ;;  %v9277_v28 = vld [vmem:[#allocation130_spill] sm:$0xff] }
 0x2b3   :  { %v8001_v37 = vadd.f32 %v3465_v24, %v3464_v22  ;;  %v2155_v10 = vmax.f32 %v1899_v20, %v2027_v54  ;;  %v1911_v9 = vadd.f32 %v7244_v32, %v7721_v56  ;;  %v3533_v17 = vsel %vm3253_vm2, %v7969_v12, -inf  ;;  %v9274_v20 = vld [vmem:[#allocation4_spill] sm:$0xff] }
 0x2b4   :  { %v3375_v51 = vsel %vm3253_vm2, %v3191_v45, 0.0  ;;  %v3193_v34 = vmul.f32 %v9272_v53, %v2153_v1  ;;  %v3196_v41 = vmul.f32 %v9273_v27, %v2156_v14  ;;  %v2030_v5 = vmul.f32 0.2, %v1902_v44  ;;  %v829_v39 = vpop.permute.xlu0 %828 }
 0x2b5   :  { %v2029_v62 = vmul.f32 0.2, %v1901_v13  ;;  %v2037_v29 = vmul.f32 0.2, %v1909_v16  ;;  %v9276_v32 = vcombine.high %v9275_v46, %v9275_v46  ;;  %v1458_v8 = vcombine.high %v9277_v28, %v9277_v28  ;;  %v9279_v28 = vld [vmem:[#allocation127_spill] sm:$0xff] }
 0x2b6   :  { %3525 = vmax.xlane.f32.xlu0 %v3524_v61  ;;  %3534 = vmax.xlane.f32.xlu1 %v3533_v17  ;;  %v3389_v45 = vsel %vm3253_vm2, %v3190_v6, 0.0  ;;  %v3374_v54 = vsel %vm3253_vm2, %v3189_v48, 0.0  ;;  %v3392_v0 = vsel %vm3253_vm2, %v3194_v36, 0.0  ;;  %v3530_v47 = vsel %vm3253_vm2, %v7972_v26, -inf  ;;  %v921_v22 = vpop.permute.xlu1 %920  ;;  %v9278_v17 = vld [vmem:[#allocation141_spill] sm:$0xff] }
 0x2b7   :  { %v8015_v56 = vrot.slane %v9276_v32, %v9274_v20  ;;  %v3391_v1 = vadd.f32 %v3390_v57, %v3389_v45  ;;  %v3376_v14 = vadd.f32 %v3375_v51, %v3374_v54  ;;  %v3195_v60 = vmul.f32 %v9273_v27, %v2155_v10  ;;  %v9280_v10 = vld [vmem:[#allocation129_spill] sm:$0xff] }
 0x2b8   :  { %v2039_v61 = vmul.f32 0.2, %v1911_v9  ;;  %v3377_v24 = vsel %vm3253_vm2, %v3193_v34, 0.0  ;;  %v3394_v43 = vsel %vm3253_vm2, %v3196_v41, 0.0  ;;  %v2158_v53 = vmax.f32 %v1902_v44, %v2030_v5  ;;  %v917_v48 = vpop.permute.xlu0 %916  ;;  %v9282_v44 = vld [vmem:[#allocation133_spill] sm:$0xff]  ;;  %v9289_v41 = vld [vmem:[#allocation134_spill] sm:$0xff] }
 0x2b9   :  { %v1922_v6 = vadd.f32 %v9278_v17, %v921_v22  ;;  %v3393_v46 = vadd.f32 %v3392_v0, %v3391_v1  ;;  %v2157_v36 = vmax.f32 %v1901_v13, %v2029_v62  ;;  %v2165_v32 = vmax.f32 %v1909_v16, %v2037_v29  ;;  %v9283_v29 = vld [vmem:[#allocation58_spill] sm:$0xff]  ;;  %v9284_v0 = vld [vmem:[#allocation72_spill] sm:$0xff] }
 0x2ba   :  { %3531 = vmax.xlane.f32.xlu0 %v3530_v47  ;;  %v1913_v57 = vadd.f32 %v9279_v28, %v7744_v19  ;;  %v9281_v27 = vcombine.high %v9280_v10, %v9280_v10  ;;  %v8037_v34 = vrot.slane %v1458_v8, %v9274_v20  ;;  %v8041_v5 = vadd.f32 %v3377_v24, %v3376_v14  ;;  %v965_v62 = vpop.permute.xlu1 %964  ;;  %v9285_v47 = vld [vmem:[#allocation128_spill] sm:$0xff]  ;;  %v9286_v8 = vld [vmem:[#allocation142_spill] sm:$0xff] }
 0x2bb   :  { %v2050_v51 = vmul.f32 0.2, %v1922_v6  ;;  %v8043_v13 = vadd.f32 %v3394_v43, %v3393_v46  ;;  %v8046_v16 = vsel %vm3253_vm2, %v3195_v60, 0.0  ;;  %v2167_v19 = vmax.f32 %v1911_v9, %v2039_v61  ;;  %v9287_v14 = vld [vmem:[#allocation48_spill] sm:$0xff]  ;;  %v9288_v60 = vld [vmem:[#allocation73_spill] sm:$0xff] }
 0x2bc   :  { %v8034_v45 = vrot.slane %v9281_v27, %v9274_v20  ;;  %v3198_v54 = vmul.f32 %v9283_v29, %v2158_v53  ;;  %v1915_v1 = vadd.f32 %v9285_v47, %v9284_v0  ;;  %v1930_v28 = vadd.f32 %v9286_v8, %v965_v62  ;;  %v961_v10 = vpop.permute.xlu0 %960  ;;  %v9291_v62 = vld [vmem:[#allocation97_spill] sm:$0xff]  ;;  %v9292_v47 = vld [vmem:[#allocation131_spill] sm:$0xff] }
 0x2bd   :  { %v2178_v22 = vmax.f32 %v1922_v6, %v2050_v51  ;;  %v3197_v27 = vmul.f32 %v9283_v29, %v2157_v36  ;;  %v3205_v24 = vmul.f32 %v9287_v14, %v2165_v32  ;;  %v2041_v43 = vmul.f32 0.2, %v1913_v57  ;;  %v9290_v6 = vld [vmem:[#allocation47_spill] sm:$0xff]  ;;  %v9293_v36 = vld [vmem:[#allocation140_spill] sm:$0xff] }
 0x2be   :  { %v1929_v46 = vadd.f32 %v9286_v8, %v961_v10  ;;  %v1904_v9 = vadd.f32 %v9289_v41, %v9288_v60  ;;  %v1903_v61 = vadd.f32 %v9289_v41, %v7860_v58  ;;  %v2058_v0 = vmul.f32 0.2, %v1930_v28  ;;  %v8064_v14 = vpop.permute.xlu1 %1052 }
 0x2bf   :  { %v3218_v53 = vmul.f32 %v7953_v42, %v2178_v22  ;;  %v3207_v51 = vmul.f32 %v9290_v6, %v2167_v19  ;;  %v1917_v26 = vadd.f32 %v9292_v47, %v9291_v62  ;;  %v1906_v29 = vadd.f32 %v9293_v36, %v833_v63 }
 0x2c0   :  { %v2057_v32 = vmul.f32 0.2, %v1929_v46  ;;  %v2043_v8 = vmul.f32 0.2, %v1915_v1  ;;  %v1905_v10 = vadd.f32 %v9293_v36, %v829_v39  ;;  %v2186_v12 = vmax.f32 %v1930_v28, %v2058_v0  ;;  %v1049_v58 = vpop.permute.xlu0 %1048 }
 0x2c1   :  { %v3430_v60 = vsel %vm3253_vm2, %v3218_v53, 0.0  ;;  %v2169_v41 = vmax.f32 %v1913_v57, %v2041_v43  ;;  %v1945_v4 = vadd.f32 %v9294_v25, %v1049_v58  ;;  %v2032_v6 = vmul.f32 0.2, %v1904_v9 }
 0x2c2   :  { %v2185_v22 = vmax.f32 %v1929_v46, %v2057_v32  ;;  %v8070_v19 = vadd.f32 %v3430_v60, %v7904_v38  ;;  %v2031_v62 = vmul.f32 0.2, %v1903_v61  ;;  %v1919_v63 = vadd.f32 %v9250_v11, %v7871_v30  ;;  %v9295_v32 = vld [vmem:[#allocation51_spill] sm:$0xff] }
 0x2c3   :  { %v3226_v47 = vmul.f32 %v7988_v50, %v2186_v12  ;;  %v2045_v55 = vmul.f32 0.2, %v1917_v26  ;;  %v2034_v39 = vmul.f32 0.2, %v1906_v29  ;;  %v2073_v28 = vmul.f32 0.2, %v1945_v4  ;;  %v8076_v0 = vpop.permute.xlu1 %3058 }
 0x2c4   :  { %v3225_v53 = vmul.f32 %v7988_v50, %v2185_v22  ;;  %v2171_v57 = vmax.f32 %v1915_v1, %v2043_v8  ;;  %v2033_v43 = vmul.f32 0.2, %v1905_v10  ;;  %v1921_v46 = vadd.f32 %v9278_v17, %v917_v48  ;;  %v8080_v36 = vpop.permute.xlu0 %3026 }
 0x2c5   :  { %v3452_v38 = vsel %vm3253_vm2, %v3226_v47, 0.0  ;;  %v3209_v60 = vmul.f32 %v9295_v32, %v2169_v41  ;;  %v2201_v12 = vmax.f32 %v1945_v4, %v2073_v28  ;;  %v2160_v50 = vmax.f32 %v1904_v9, %v2032_v6  ;;  %v9296_v41 = vld [vmem:[#allocation55_spill] sm:$0xff]  ;;  %v9298_v28 = vld [vmem:[#allocation57_spill] sm:$0xff] }
 0x2c6   :  { %v8084_v11 = vadd.f32 %v3452_v38, %v7941_v33  ;;  %v3437_v30 = vsel %vm3253_vm2, %v3225_v53, 0.0  ;;  %v2159_v58 = vmax.f32 %v1903_v61, %v2031_v62  ;;  %v2047_v22 = vmul.f32 0.2, %v1919_v63 }
 0x2c7   :  { %v8088_v1 = vadd.f32 %v3437_v30, %v7946_v21  ;;  %v3396_v17 = vsel %vm3253_vm2, %v3198_v54, 0.0  ;;  %v2173_v48 = vmax.f32 %v1917_v26, %v2045_v55  ;;  %v2162_v8 = vmax.f32 %v1906_v29, %v2034_v39  ;;  %v8092_v3 = vpop.permute.xlu1 %3106  ;;  %v9297_v26 = vld [vmem:[#allocation60_spill] sm:$0xff] }
 0x2c8   :  { %v3241_v47 = vmul.f32 %v7981_v2, %v2201_v12  ;;  %v3405_v33 = vsel %vm3253_vm2, %v3207_v51, 0.0  ;;  %v3211_v38 = vmul.f32 %v9296_v41, %v2171_v57  ;;  %v2161_v53 = vmax.f32 %v1905_v10, %v2033_v43  ;;  %v8096_v9 = vpop.permute.xlu0 %3074 }
 0x2c9   :  { %v2049_v4 = vmul.f32 0.2, %v1921_v46  ;;  %v3381_v61 = vsel %vm3253_vm2, %v3197_v27, 0.0  ;;  %v3404_v21 = vsel %vm3253_vm2, %v3205_v24, 0.0  ;;  %v3407_v54 = vsel %vm3253_vm2, %v3209_v60, 0.0 }
 0x2ca   :  { %v3467_v55 = vsel %vm3253_vm2, %v3241_v47, 0.0  ;;  %v3200_v29 = vmul.f32 %v9297_v26, %v2160_v50  ;;  %v3199_v6 = vmul.f32 %v9297_v26, %v2159_v58  ;;  %v2175_v62 = vmax.f32 %v1919_v63, %v2047_v22 }
 0x2cb   :  { %v8105_v51 = vadd.f32 %v3467_v55, %v8001_v37  ;;  %v3380_v10 = vadd.f32 %v8046_v16, %v8041_v5  ;;  %v3406_v39 = vadd.f32 %v3405_v33, %v3404_v21  ;;  %v3213_v27 = vmul.f32 %v9298_v28, %v2173_v48  ;;  %v844_v57 = vpop.permute.xlu1 %843 }
 0x2cc   :  { %v3202_v24 = vmul.f32 %v7958_v49, %v2162_v8  ;;  %v3409_v43 = vsel %vm3253_vm2, %v3211_v38, 0.0  ;;  %v3201_v32 = vmul.f32 %v7958_v49, %v2161_v53  ;;  %v2177_v60 = vmax.f32 %v1921_v46, %v2049_v4  ;;  %v840_v63 = vpop.permute.xlu0 %839 }
 0x2cd   :  { %v1908_v30 = vadd.f32 %v8015_v56, %v844_v57  ;;  %v3397_v37 = vadd.f32 %v3396_v17, %v8043_v13  ;;  %v3382_v12 = vadd.f32 %v3381_v61, %v3380_v10  ;;  %v3408_v50 = vadd.f32 %v3407_v54, %v3406_v39 }
 0x2ce   :  { %v1907_v5 = vadd.f32 %v8015_v56, %v840_v63  ;;  %v3398_v16 = vsel %vm3253_vm2, %v3200_v29, 0.0  ;;  %v3383_v58 = vsel %vm3253_vm2, %v3199_v6, 0.0  ;;  %v3215_v22 = vmul.f32 %v9255_v31, %v2175_v62 }
 0x2cf   :  { %v2036_v48 = vmul.f32 0.2, %v1908_v30  ;;  %v3410_v8 = vadd.f32 %v3409_v43, %v3408_v50  ;;  %v3411_v49 = vsel %vm3253_vm2, %v3213_v27, 0.0  ;;  %v3400_v46 = vsel %vm3253_vm2, %v3202_v24, 0.0  ;;  %v932_v33 = vpop.permute.xlu1 %931 }
 0x2d0   :  { %v2035_v47 = vmul.f32 0.2, %v1907_v5  ;;  %v3385_v13 = vsel %vm3253_vm2, %v3201_v32, 0.0  ;;  %v3217_v17 = vmul.f32 %v7953_v42, %v2177_v60  ;;  %v1924_v56 = vadd.f32 %v8034_v45, %v932_v33  ;;  %v928_v38 = vpop.permute.xlu0 %927 }
 0x2d1   :  { %v2164_v41 = vmax.f32 %v1908_v30, %v2036_v48  ;;  %v3399_v53 = vadd.f32 %v3398_v16, %v3397_v37  ;;  %v3384_v4 = vadd.f32 %v3383_v58, %v3382_v12  ;;  %v1923_v31 = vadd.f32 %v8034_v45, %v928_v38  ;;  %v9301_v38 = vld [vmem:[#allocation90_spill] sm:$0xff] }
 0x2d2   :  { %v2163_v61 = vmax.f32 %v1907_v5, %v2035_v47  ;;  %v3412_v21 = vadd.f32 %v3411_v49, %v3410_v8  ;;  %v3413_v54 = vsel %vm3253_vm2, %v3215_v22, 0.0  ;;  %v2052_v26 = vmul.f32 0.2, %v1924_v56 }
 0x2d3   :  { %v3204_v55 = vmul.f32 %v8080_v36, %v2164_v41  ;;  %v2051_v6 = vmul.f32 0.2, %v1923_v31  ;;  %v976_v62 = vpop.permute.xlu1 %975  ;;  %v3401_v42 = vadd.f32 %v3400_v46, %v3399_v53  ;;  %v3386_v10 = vadd.f32 %v3385_v13, %v3384_v4  ;;  %v9302_v4 = vld [vmem:[#allocation86_spill] sm:$0xff] }
 0x2d4   :  { %v3203_v29 = vmul.f32 %v8080_v36, %v2163_v61  ;;  %v3415_v39 = vsel %vm3253_vm2, %v3217_v17, 0.0  ;;  %v2180_v28 = vmax.f32 %v1924_v56, %v2052_v26  ;;  %v1932_v27 = vadd.f32 %v8037_v34, %v976_v62  ;;  %v972_v24 = vpop.permute.xlu0 %971  ;;  %v9300_v56 = vld [vmem:[#allocation3_spill] sm:$0xff] }
 0x2d5   :  { %v3402_v45 = vsel %vm3253_vm2, %v3204_v55, 0.0  ;;  %v2179_v43 = vmax.f32 %v1923_v31, %v2051_v6  ;;  %v1931_v32 = vadd.f32 %v8037_v34, %v972_v24  ;;  %v3414_v30 = vadd.f32 %v3413_v54, %v3412_v21 }
 0x2d6   :  { %v3387_v57 = vsel %vm3253_vm2, %v3203_v29, 0.0  ;;  %v3403_v60 = vadd.f32 %v3402_v45, %v3401_v42  ;;  %v3220_v36 = vmul.f32 %v8076_v0, %v2180_v28  ;;  %v2060_v63 = vmul.f32 0.2, %v1932_v27 }
 0x2d7   :  { %v3388_v37 = vadd.f32 %v3387_v57, %v3386_v10  ;;  %v3219_v12 = vmul.f32 %v8076_v0, %v2179_v43  ;;  %v2059_v50 = vmul.f32 0.2, %v1931_v32  ;;  %v9299_v5 = vcombine.high %v9282_v44, %v9282_v44  ;;  %v8141_v58 = vpop.permute.xlu1 %1063 }
 0x2d8   :  { %v8144_v22 = vadd.f32 %v7393_v7, %v3403_v60  ;;  %v2188_v34 = vmax.f32 %v1932_v27, %v2060_v63  ;;  %v1060_v48 = vpop.permute.xlu0 %1059  ;;  %v3432_v49 = vsel %vm3253_vm2, %v3220_v36, 0.0  ;;  %v3416_v0 = vadd.f32 %v3415_v39, %v3414_v30 }
 0x2d9   :  { %v8139_v16 = vrot.slane %v9299_v5, %v9274_v20  ;;  %v8147_v8 = vadd.f32 %v7370_v52, %v3388_v37  ;;  %v3417_v46 = vsel %vm3253_vm2, %v3219_v12, 0.0  ;;  %v2187_v47 = vmax.f32 %v1931_v32, %v2059_v50 }
 0x2da   :  { %v3539_v33 = vsel %vm3253_vm2, %v8144_v22, -inf  ;;  %v3228_v13 = vmul.f32 %v8096_v9, %v2188_v34  ;;  %v3433_v41 = vadd.f32 %v3432_v49, %v8070_v19  ;;  %v8160_v53 = vrot.slane %v9301_v38, %v9300_v56 }
 0x2db   :  { %v1947_v44 = vadd.f32 %v8139_v16, %v1060_v48  ;;  %3540 = vmax.xlane.f32.xlu1 %v3539_v33  ;;  %v3536_v17 = vsel %vm3253_vm2, %v8147_v8, -inf  ;;  %v9303_v61 = vcombine.high %v9302_v4, %v9302_v4  ;;  %v3227_v21 = vmul.f32 %v8096_v9, %v2187_v47 }
 0x2dc   :  { %3537 = vmax.xlane.f32.xlu0 %v3536_v17  ;;  %v8167_v55 = vpop.permute.xlu1 %3110  ;;  %v3418_v26 = vadd.f32 %v3417_v46, %v3416_v0  ;;  %v3454_v29 = vsel %vm3253_vm2, %v3228_v13, 0.0  ;;  %v8171_v19 = vadd.f32 %v7393_v7, %v3433_v41  ;;  %v1720_v27 = vrot.slane %v8160_v53, %v9274_v20 }
 0x2dd   :  { %v1474_v31 = vrot.slane %v9303_v61, %v9300_v56  ;;  %v2075_v54 = vmul.f32 0.2, %v1947_v44  ;;  %v3455_v62 = vadd.f32 %v3454_v29, %v8084_v11  ;;  %v3439_v42 = vsel %vm3253_vm2, %v3227_v21, 0.0 }
 0x2de   :  { %v3079_v6 = vpop.permute.xlu0 %3078  ;;  %v8176_v39 = vadd.f32 %v7370_v52, %v3418_v26  ;;  %v3440_v9 = vadd.f32 %v3439_v42, %v8088_v1  ;;  %v3545_v28 = vsel %vm3253_vm2, %v8171_v19, -inf  ;;  %v1427_v63 = vcombine.high %v9301_v38, %v9301_v38 }
 0x2df   :  { %v2203_v10 = vmax.f32 %v1947_v44, %v2075_v54  ;;  %3546 = vmax.xlane.f32.xlu1 %v3545_v28  ;;  %v8187_v57 = vrot.slane %v1474_v31, %v9300_v56  ;;  %v1476_v33 = vcombine.high %v1474_v31, %v1474_v31 }
 0x2e0   :  { %v3542_v11 = vsel %vm3253_vm2, %v8176_v39, -inf  ;;  %v987_v45 = vpop.permute.xlu1 %986  ;;  %v8196_v46 = vrot.slane %v1427_v63, %v9300_v56  ;;  %v1457_v63 = vcombine.high %v8160_v53, %v8160_v53 }
 0x2e1   :  { %v3243_v24 = vmul.f32 %v8092_v3, %v2203_v10  ;;  %3543 = vmax.xlane.f32.xlu0 %v3542_v11  ;;  %v1934_v43 = vadd.f32 %v1720_v27, %v987_v45  ;;  %v1752_v12 = vrot.slane %v8187_v57, %v9274_v20 }
 0x2e2   :  { %v983_v32 = vpop.permute.xlu0 %982  ;;  %v1724_v54 = vrot.slane %v8196_v46, %v9274_v20 }
 0x2e3   :  { %v3469_v1 = vsel %vm3253_vm2, %v3243_v24, 0.0  ;;  %v1933_v60 = vadd.f32 %v1720_v27, %v983_v32  ;;  %v2062_v36 = vmul.f32 0.2, %v1934_v43  ;;  %v1944_v32 = vadd.f32 %v9263_v40, %v7930_v59 }
 0x2e4   :  { %v3470_v30 = vadd.f32 %v3469_v1, %v8105_v51  ;;  %v1075_v50 = vpop.permute.xlu1 %1074  ;;  %v1506_v59 = vcombine.high %v8187_v57, %v8187_v57 }
 0x2e5   :  { %v2061_v37 = vmul.f32 0.2, %v1933_v60  ;;  %v2190_v5 = vmax.f32 %v1934_v43, %v2062_v36  ;;  %v2072_v40 = vmul.f32 0.2, %v1944_v32 }
 0x2e6   :  { %v1071_v34 = vpop.permute.xlu0 %1070 }
 0x2e7   :  { %v2189_v48 = vmax.f32 %v1933_v60, %v2061_v37  ;;  %v1949_v49 = vadd.f32 %v1752_v12, %v1071_v34  ;;  %v3230_v0 = vmul.f32 %v3079_v6, %v2190_v5  ;;  %v2200_v57 = vmax.f32 %v1944_v32, %v2072_v40 }
 0x2e8   :  { %v1459_v32 = vcombine.high %v8196_v46, %v8196_v46 }
 0x2e9   :  { %v3229_v47 = vmul.f32 %v3079_v6, %v2189_v48  ;;  %v2077_v44 = vmul.f32 0.2, %v1949_v49  ;;  %v8198_v51 = vpop.permute.xlu1 %3114  ;;  %v3456_v13 = vsel %vm3253_vm2, %v3230_v0, 0.0  ;;  %v8206_v6 = vrot.slane %v1476_v33, %v9300_v56 }
 0x2ea   :  { %v3083_v17 = vpop.permute.xlu0 %3082  ;;  %v3457_v41 = vadd.f32 %v3456_v13, %v3455_v62  ;;  %v1946_v48 = vadd.f32 %v9294_v25, %v8064_v14  ;;  %v1728_v33 = vrot.slane %v1457_v63, %v9274_v20 }
 0x2eb   :  { %v3441_v38 = vsel %vm3253_vm2, %v3229_v47, 0.0  ;;  %v2205_v61 = vmax.f32 %v1949_v49, %v2077_v44 }
 0x2ec   :  { %v3442_v21 = vadd.f32 %v3441_v38, %v3440_v9  ;;  %v1756_v9 = vrot.slane %v8206_v6, %v9274_v20  ;;  %v1950_v38 = vadd.f32 %v1752_v12, %v1075_v50 }
 0x2ed   :  { %v3245_v26 = vmul.f32 %v8167_v55, %v2205_v61  ;;  %v998_v29 = vpop.permute.xlu1 %997 }
 0x2ee   :  { %v1936_v42 = vadd.f32 %v1724_v54, %v998_v29  ;;  %v994_v10 = vpop.permute.xlu0 %993  ;;  %v1760_v29 = vrot.slane %v1506_v59, %v9274_v20 }
 0x2ef   :  { %v3471_v31 = vsel %vm3253_vm2, %v3245_v26, 0.0  ;;  %v1935_v28 = vadd.f32 %v1724_v54, %v994_v10 }
 0x2f0   :  { %v3472_v27 = vadd.f32 %v3471_v31, %v3470_v30  ;;  %v2064_v62 = vmul.f32 0.2, %v1936_v42  ;;  %v1942_v30 = vadd.f32 %v9259_v23, %v7912_v35  ;;  %v1948_v35 = vadd.f32 %v8139_v16, %v8141_v58 }
 0x2f1   :  { %v2063_v24 = vmul.f32 0.2, %v1935_v28  ;;  %v1086_v11 = vpop.permute.xlu1 %1085 }
 0x2f2   :  { %v2192_v45 = vmax.f32 %v1936_v42, %v2064_v62  ;;  %v1082_v43 = vpop.permute.xlu0 %1081  ;;  %v2070_v13 = vmul.f32 0.2, %v1942_v30  ;;  %v2076_v42 = vmul.f32 0.2, %v1948_v35  ;;  %v1952_v10 = vadd.f32 %v1756_v9, %v1086_v11 }
 0x2f3   :  { %v2191_v1 = vmax.f32 %v1935_v28, %v2063_v24  ;;  %v1951_v60 = vadd.f32 %v1756_v9, %v1082_v43  ;;  %v2078_v24 = vmul.f32 0.2, %v1950_v38 }
 0x2f4   :  { %v3232_v36 = vmul.f32 %v3083_v17, %v2192_v45  ;;  %v2080_v63 = vmul.f32 0.2, %v1952_v10 }
 0x2f5   :  { %v3231_v37 = vmul.f32 %v3083_v17, %v2191_v1  ;;  %v2079_v5 = vmul.f32 0.2, %v1951_v60  ;;  %v8217_v34 = vpop.permute.xlu1 %3118  ;;  %v2074_v17 = vmul.f32 0.2, %v1946_v48 }
 0x2f6   :  { %v3458_v49 = vsel %vm3253_vm2, %v3232_v36, 0.0  ;;  %v3087_v0 = vpop.permute.xlu0 %3086  ;;  %v2204_v36 = vmax.f32 %v1948_v35, %v2076_v42 }
 0x2f7   :  { %v3459_v47 = vadd.f32 %v3458_v49, %v3457_v41  ;;  %v3443_v53 = vsel %vm3253_vm2, %v3231_v37, 0.0  ;;  %v2207_v44 = vmax.f32 %v1951_v60, %v2079_v5  ;;  %v2202_v62 = vmax.f32 %v1946_v48, %v2074_v17 }
 0x2f8   :  { %v3444_v23 = vadd.f32 %v3443_v53, %v3442_v21  ;;  %v2198_v21 = vmax.f32 %v1942_v30, %v2070_v13  ;;  %v3240_v60 = vmul.f32 %v7839_v18, %v2200_v57  ;;  %v1508_v5 = vcombine.high %v8206_v6, %v8206_v6 }
 0x2f9   :  { %v3247_v25 = vmul.f32 %v8198_v51, %v2207_v44  ;;  %v1009_v14 = vpop.permute.xlu1 %1008  ;;  %v3242_v48 = vmul.f32 %v7981_v2, %v2202_v62  ;;  %v2206_v49 = vmax.f32 %v1950_v38, %v2078_v24  ;;  %v1732_v44 = vrot.slane %v1459_v32, %v9274_v20 }
 0x2fa   :  { %v1938_v61 = vadd.f32 %v1728_v33, %v1009_v14  ;;  %v1005_v54 = vpop.permute.xlu0 %1004 }
 0x2fb   :  { %v3473_v41 = vsel %vm3253_vm2, %v3247_v25, 0.0  ;;  %v1937_v26 = vadd.f32 %v1728_v33, %v1005_v54  ;;  %v2208_v33 = vmax.f32 %v1952_v10, %v2080_v63  ;;  %v3482_v14 = vsel %vm3253_vm2, %v3242_v48, 0.0 }
 0x2fc   :  { %v3474_v16 = vadd.f32 %v3473_v41, %v3472_v27  ;;  %v2066_v58 = vmul.f32 0.2, %v1938_v61  ;;  %v3238_v27 = vmul.f32 %v7844_v15, %v2198_v21  ;;  %v3480_v15 = vsel %vm3253_vm2, %v3240_v60, 0.0 }
 0x2fd   :  { %v2065_v31 = vmul.f32 0.2, %v1937_v26  ;;  %v1097_v28 = vpop.permute.xlu1 %1096  ;;  %v3246_v17 = vmul.f32 %v8167_v55, %v2206_v49 }
 0x2fe   :  { %v2194_v45 = vmax.f32 %v1938_v61, %v2066_v58  ;;  %v1954_v43 = vadd.f32 %v1760_v29, %v1097_v28  ;;  %v1093_v12 = vpop.permute.xlu0 %1092  ;;  %v3479_v6 = vsel %vm3253_vm2, %v3238_v27, 0.0 }
 0x2ff   :  { %v2193_v50 = vmax.f32 %v1937_v26, %v2065_v31  ;;  %v1953_v1 = vadd.f32 %v1760_v29, %v1093_v12  ;;  %v3481_v57 = vadd.f32 %v3480_v15, %v3479_v6  ;;  %v3248_v26 = vmul.f32 %v8198_v51, %v2208_v33 }
 0x300   :  { %v3234_v9 = vmul.f32 %v3087_v0, %v2194_v45  ;;  %v2082_v40 = vmul.f32 0.2, %v1954_v43  ;;  %v3486_v55 = vsel %vm3253_vm2, %v3246_v17, 0.0 }
 0x301   :  { %v3233_v11 = vmul.f32 %v3087_v0, %v2193_v50  ;;  %v2081_v30 = vmul.f32 0.2, %v1953_v1  ;;  %v3123_v37 = vpop.permute.xlu1 %3122  ;;  %v3244_v0 = vmul.f32 %v8092_v3, %v2204_v36  ;;  %v1764_v3 = vrot.slane %v1508_v5, %v9274_v20 }
 0x302   :  { %v3460_v59 = vsel %vm3253_vm2, %v3234_v9, 0.0  ;;  %v3091_v46 = vpop.permute.xlu0 %3090  ;;  %v2210_v38 = vmax.f32 %v1954_v43, %v2082_v40  ;;  %v3483_v10 = vadd.f32 %v3482_v14, %v3481_v57  ;;  %v3488_v50 = vsel %vm3253_vm2, %v3248_v26, 0.0 }
 0x303   :  { %v3445_v18 = vsel %vm3253_vm2, %v3233_v11, 0.0  ;;  %v2209_v53 = vmax.f32 %v1953_v1, %v2081_v30  ;;  %v3461_v35 = vadd.f32 %v3460_v59, %v3459_v47 }
 0x304   :  { %v3446_v13 = vadd.f32 %v3445_v18, %v3444_v23  ;;  %v3484_v23 = vsel %vm3253_vm2, %v3244_v0, 0.0  ;;  %v3250_v31 = vmul.f32 %v8217_v34, %v2210_v38 }
 0x305   :  { %v3249_v2 = vmul.f32 %v8217_v34, %v2209_v53  ;;  %v1020_v25 = vpop.permute.xlu1 %1019  ;;  %v3485_v45 = vadd.f32 %v3484_v23, %v3483_v10 }
 0x306   :  { %v1940_v61 = vadd.f32 %v1732_v44, %v1020_v25  ;;  %v1016_v54 = vpop.permute.xlu0 %1015  ;;  %v3490_v36 = vsel %vm3253_vm2, %v3250_v31, 0.0  ;;  %v9304_v25 = vld [vmem:[#allocation50_spill] sm:$0xff] }
 0x307   :  { %v3475_v47 = vsel %vm3253_vm2, %v3249_v2, 0.0  ;;  %v1939_v41 = vadd.f32 %v1732_v44, %v1016_v54  ;;  %v3487_v51 = vadd.f32 %v3486_v55, %v3485_v45  ;;  %v9305_v54 = vld [vmem:[#allocation76_spill] sm:$0xff] }
 0x308   :  { %v3476_v29 = vadd.f32 %v3475_v47, %v3474_v16  ;;  %v2068_v42 = vmul.f32 0.2, %v1940_v61  ;;  %v9306_v47 = vld [vmem:[#allocation67_spill] sm:$0xff] }
 0x309   :  { %v2067_v58 = vmul.f32 0.2, %v1939_v41  ;;  %v1108_v21 = vpop.permute.xlu1 %1107  ;;  %v3489_v27 = vadd.f32 %v3488_v50, %v3487_v51 }
 0x30a   :  { %v2196_v28 = vmax.f32 %v1940_v61, %v2068_v42  ;;  %v1956_v62 = vadd.f32 %v1764_v3, %v1108_v21  ;;  %v1104_v24 = vpop.permute.xlu0 %1103  ;;  %v9307_v42 = vld [vmem:[#allocation98_spill] sm:$0xff] }
 0x30b   :  { %v2195_v43 = vmax.f32 %v1939_v41, %v2067_v58  ;;  %v1955_v12 = vadd.f32 %v1764_v3, %v1104_v24  ;;  %v3491_v40 = vadd.f32 %v3490_v36, %v3489_v27  ;;  %v9308_v58 = vld [vmem:[#allocation70_spill] sm:$0xff]  ;;  %v9309_v24 = vld [vmem:[#allocation25_spill] sm:$0xff] }
 0x30c   :  { %v3236_v1 = vmul.f32 %v3091_v46, %v2196_v28  ;;  %v2084_v32 = vmul.f32 0.2, %v1956_v62 }
 0x30d   :  { %v3235_v16 = vmul.f32 %v3091_v46, %v2195_v43  ;;  %v2083_v60 = vmul.f32 0.2, %v1955_v12  ;;  %v9310_v43 = vld [vmem:[#allocation54_spill] sm:$0xff] }
 0x30e   :  { %v2212_v63 = vmax.f32 %v1956_v62, %v2084_v32  ;;  %v3462_v9 = vsel %vm3253_vm2, %v3236_v1, 0.0 }
 0x30f   :  { %v3447_v34 = vsel %vm3253_vm2, %v3235_v16, 0.0  ;;  %v2211_v11 = vmax.f32 %v1955_v12, %v2083_v60  ;;  %v3463_v30 = vadd.f32 %v3462_v9, %v3461_v35  ;;  %v9311_v60 = vld [vmem:[#allocation75_spill] sm:$0xff] }
 0x310   :  { %v3252_v5 = vmul.f32 %v3123_v37, %v2212_v63  ;;  %v3448_v48 = vadd.f32 %v3447_v34, %v3446_v13 }
 0x311   :  { %v3251_v49 = vmul.f32 %v3123_v37, %v2211_v11  ;;  %v8258_v59 = vadd.f32 %v7393_v7, %v3463_v30 }
 0x312   :  { %v8261_v46 = vadd.f32 %v7370_v52, %v3448_v48  ;;  %v3492_v18 = vsel %vm3253_vm2, %v3252_v5, 0.0 }
 0x313   :  { %v3477_v53 = vsel %vm3253_vm2, %v3251_v49, 0.0  ;;  %v3551_v44 = vsel %vm3253_vm2, %v8258_v59, -inf  ;;  %v3493_v15 = vadd.f32 %v3492_v18, %v3491_v40 }
 0x314   :  { %3552 = vmax.xlane.f32.xlu1 %v3551_v44  ;;  %v3548_v35 = vsel %vm3253_vm2, %v8261_v46, -inf  ;;  %v3478_v37 = vadd.f32 %v3477_v53, %v3476_v29 }
 0x315   :  { %3549 = vmax.xlane.f32.xlu0 %v3548_v35  ;;  %v8270_v0 = vadd.f32 %v7393_v7, %v3493_v15 }
 0x316   :  { %v8273_v33 = vadd.f32 %v7370_v52, %v3478_v37  ;;  %v6160_v37 = vmov 0.0  }
 0x317   :  { %v3557_v13 = vsel %vm3253_vm2, %v8270_v0, -inf  ;;  %5934 = vmatprep.subr.bf16.mxu0 %v6160_v37  ;;  %5940 = vmatprep.subr.bf16.mxu1 %v6160_v37 }
 0x318   :  { %3558 = vmax.xlane.f32.xlu1 %v3557_v13  ;;  %v3554_v6 = vsel %vm3253_vm2, %v8273_v33, -inf  ;;  %5936 = vmatprep.mubr.msk.bf16.mxu0 %vm6161_vm3, %v6160_v37 }
 0x319   :  { %3555 = vmax.xlane.f32.xlu0 %v3554_v6  ;;  %5942 = vmatprep.mubr.msk.bf16.mxu1 %vm6161_vm3, %v6160_v37 }
 0x337   :  { %v3514_v2 = vpop.xlane.xlu0 %3513 }
 0x338   :  { %v3560_v14 = vsub.f32 %v9304_v25, %v3514_v2 }
 0x33a   :  { %v3576_v17 = vmul.f32 1.442695, %v3560_v14 }
 0x33b   :  { %v3520_v38 = vpop.xlane.xlu0 %3519  ;;  %v3517_v61 = vpop.xlane.xlu1 %3516 }
 0x33c   :  { %6046 = vpow2.f32 %v3576_v17  ;;  %v3562_v57 = vsub.f32 %v9305_v54, %v3520_v38  ;;  %v3561_v41 = vsub.f32 %v9306_v47, %v3517_v61 }
 0x33e   :  { %v3580_v3 = vmul.f32 1.442695, %v3562_v57  ;;  %v3578_v23 = vmul.f32 1.442695, %v3561_v41 }
 0x33f   :  { %v3523_v26 = vpop.xlane.xlu0 %3522  ;;  %v3529_v29 = vpop.xlane.xlu1 %3528 }
 0x340   :  { %6048 = vpow2.f32 %v3580_v3  ;;  %v3563_v10 = vsub.f32 %v9307_v42, %v3523_v26  ;;  %v3565_v21 = vsub.f32 %v9308_v58, %v3529_v29 }
 0x341   :  { %6050 = vpow2.f32 %v3578_v23 }
 0x342   :  { %v3582_v55 = vmul.f32 1.442695, %v3563_v10  ;;  %v3586_v31 = vmul.f32 1.442695, %v3565_v21 }
 0x343   :  { %v3526_v28 = vpop.xlane.xlu0 %3525  ;;  %v3535_v62 = vpop.xlane.xlu1 %3534 }
 0x344   :  { %6052 = vpow2.f32 %v3582_v55  ;;  %v3564_v45 = vsub.f32 %v9309_v24, %v3526_v28  ;;  %v3567_v12 = vsub.f32 %v9310_v43, %v3535_v62 }
 0x345   :  { %6054 = vpow2.f32 %v3586_v31 }
 0x346   :  { %v8286_v50 = vpop.eup %6046  ;;  %v3584_v1 = vmul.f32 1.442695, %v3564_v45  ;;  %v3590_v32 = vmul.f32 1.442695, %v3567_v12 }
 0x347   :  { %v3532_v51 = vpop.xlane.xlu0 %3531  ;;  %v3608_v16 = vsel %vm3253_vm2, %v8286_v50, 0.0 }
 0x348   :  { %6056 = vpow2.f32 %v3584_v1  ;;  %v3566_v36 = vsub.f32 %v9311_v60, %v3532_v51  ;;  %3609 = vadd.xlane.f32.xlu0 %v3608_v16 }
 0x349   :  { %6058 = vpow2.f32 %v3590_v32 }
 0x34a   :  { %v8291_v63 = vpop.eup %6048  ;;  %v3588_v9 = vmul.f32 1.442695, %v3566_v36 }
 0x34b   :  { %v8293_v27 = vpop.eup %6050  ;;  %v3614_v34 = vsel %vm3253_vm2, %v8291_v63, 0.0 }
 0x34c   :  { %6060 = vpow2.f32 %v3588_v9  ;;  %3615 = vadd.xlane.f32.xlu0 %v3614_v34  ;;  %v3611_v11 = vsel %vm3253_vm2, %v8293_v27, 0.0 }
 0x34d   :  { %3612 = vadd.xlane.f32.xlu1 %v3611_v11 }
 0x34e   :  { %v8299_v30 = vpop.eup %6052 }
 0x34f   :  { %v3617_v5 = vsel %vm3253_vm2, %v8299_v30, 0.0  ;;  %v8303_v48 = vpop.eup %6054 }
 0x350   :  { %v3623_v18 = vsel %vm3253_vm2, %v8303_v48, 0.0 }
 0x351   :  { %3618 = vadd.xlane.f32.xlu1 %v3617_v5 }
 0x352   :  { %v8305_v49 = vpop.eup %6056 }
 0x353   :  { %v3620_v40 = vsel %vm3253_vm2, %v8305_v49, 0.0  ;;  %v8311_v53 = vpop.eup %6058 }
 0x354   :  { %3621 = vadd.xlane.f32.xlu0 %v3620_v40  ;;  %v3629_v35 = vsel %vm3253_vm2, %v8311_v53, 0.0 }
 0x355   :  { %3624 = vadd.xlane.f32.xlu1 %v3623_v18 }
 0x356   :  { %v8313_v44 = vpop.eup %6060 }
 0x357   :  { %v3626_v15 = vsel %vm3253_vm2, %v8313_v44, 0.0 }
 0x358   :  { %3627 = vadd.xlane.f32.xlu0 %v3626_v15 }
 0x359   :  { %3630 = vadd.xlane.f32.xlu1 %v3629_v35 }
 0x368   :  { %v3541_v13 = vpop.xlane.xlu1 %3540 }
 0x369   :  { %v3569_v6 = vsub.f32 %v8144_v22, %v3541_v13  ;;  %v3538_v2 = vpop.xlane.xlu0 %3537 }
 0x36a   :  { %v3568_v25 = vsub.f32 %v8147_v8, %v3538_v2 }
 0x36b   :  { %v3594_v14 = vmul.f32 1.442695, %v3569_v6 }
 0x36c   :  { %v3592_v17 = vmul.f32 1.442695, %v3568_v25  ;;  %v3547_v38 = vpop.xlane.xlu1 %3546 }
 0x36d   :  { %6062 = vpow2.f32 %v3594_v14  ;;  %v3571_v61 = vsub.f32 %v8171_v19, %v3547_v38 }
 0x36e   :  { %6064 = vpow2.f32 %v3592_v17  ;;  %v3544_v54 = vpop.xlane.xlu0 %3543 }
 0x36f   :  { %v3570_v57 = vsub.f32 %v8176_v39, %v3544_v54  ;;  %v3598_v22 = vmul.f32 1.442695, %v3571_v61 }
 0x371   :  { %v3596_v47 = vmul.f32 1.442695, %v3570_v57  ;;  %6066 = vpow2.f32 %v3598_v22 }
 0x373   :  { %6068 = vpow2.f32 %v3596_v47 }
 0x377   :  { %v8329_v8 = vpop.eup %6062 }
 0x378   :  { %v8331_v41 = vpop.eup %6064  ;;  %v3635_v19 = vsel %vm3253_vm2, %v8329_v8, 0.0 }
 0x379   :  { %3636 = vadd.xlane.f32.xlu1 %v3635_v19  ;;  %v3632_v39 = vsel %vm3253_vm2, %v8331_v41, 0.0 }
 0x37a   :  { %3633 = vadd.xlane.f32.xlu0 %v3632_v39  ;;  %v9312_v39 = vld [vmem:[#allocation77_spill] sm:$0xff] }
 0x37b   :  { %v8337_v3 = vpop.eup %6066 }
 0x37c   :  { %v3641_v26 = vsel %vm3253_vm2, %v8337_v3, 0.0 }
 0x37d   :  { %v8339_v23 = vpop.eup %6068  ;;  %3642 = vadd.xlane.f32.xlu1 %v3641_v26  ;;  %v3696_v26 = vpack.c.bf16 %v9312_v39, %v9312_v39 }
 0x37e   :  { %v3638_v29 = vsel %vm3253_vm2, %v8339_v23, 0.0 }
 0x37f   :  { %3639 = vadd.xlane.f32.xlu0 %v3638_v29 }
 0x3a1   :  { %v3553_v42 = vpop.xlane.xlu1 %3552 }
 0x3a2   :  { %v3573_v10 = vsub.f32 %v8258_v59, %v3553_v42  ;;  %v3550_v58 = vpop.xlane.xlu0 %3549 }
 0x3a3   :  { %v3572_v21 = vsub.f32 %v8261_v46, %v3550_v58 }
 0x3a4   :  { %v3602_v55 = vmul.f32 1.442695, %v3573_v10 }
 0x3a5   :  { %v3600_v31 = vmul.f32 1.442695, %v3572_v21  ;;  %v3559_v28 = vpop.xlane.xlu1 %3558  ;;  %v9314_v21 = vld [vmem:[#allocation74_spill] sm:$0xff] }
 0x3a6   :  { %6070 = vpow2.f32 %v3602_v55  ;;  %v3575_v62 = vsub.f32 %v8270_v0, %v3559_v28  ;;  %v3556_v24 = vpop.xlane.xlu0 %3555  ;;  %v9315_v55 = vld [vmem:[#allocation78_spill] sm:$0xff] }
 0x3a7   :  { %6072 = vpow2.f32 %v3600_v31  ;;  %v3574_v45 = vsub.f32 %v8273_v33, %v3556_v24  ;;  %v3699_v31 = vpack.c.bf16 %v9315_v55, %v9315_v55 }
 0x3a8   :  { %v3606_v43 = vmul.f32 1.442695, %v3575_v62 }
 0x3a9   :  { %v3604_v12 = vmul.f32 1.442695, %v3574_v45 }
 0x3aa   :  { %6074 = vpow2.f32 %v3606_v43 }
 0x3ab   :  { %6076 = vpow2.f32 %v3604_v12 }
 0x3b0   :  { %v8349_v1 = vpop.eup %6070 }
 0x3b1   :  { %v8351_v59 = vpop.eup %6072  ;;  %v3647_v46 = vsel %vm3253_vm2, %v8349_v1, 0.0 }
 0x3b2   :  { %3648 = vadd.xlane.f32.xlu1 %v3647_v46  ;;  %v3644_v32 = vsel %vm3253_vm2, %v8351_v59, 0.0 }
 0x3b3   :  { %3645 = vadd.xlane.f32.xlu0 %v3644_v32 }
 0x3b4   :  { %v8357_v0 = vpop.eup %6074 }
 0x3b5   :  { %v8359_v51 = vpop.eup %6076  ;;  %v3653_v33 = vsel %vm3253_vm2, %v8357_v0, 0.0 }
 0x3b6   :  { %3654 = vadd.xlane.f32.xlu1 %v3653_v33  ;;  %v3650_v16 = vsel %vm3253_vm2, %v8359_v51, 0.0 }
 0x3b7   :  { %3651 = vadd.xlane.f32.xlu0 %v3650_v16 }
 0x3d5   :  { %v3610_v60 = vpop.xlane.xlu0 %3609 }
 0x3d6   :  { %6078 = vrcp.f32 %v3610_v60 }
 0x3d9   :  { %v3616_v36 = vpop.xlane.xlu0 %3615 }
 0x3da   :  { %v3613_v9 = vpop.xlane.xlu1 %3612 }
 0x3db   :  { %6080 = vrcp.f32 %v3613_v9 }
 0x3dc   :  { %6082 = vrcp.f32 %v3616_v36 }
 0x3de   :  { %v3619_v34 = vpop.xlane.xlu1 %3618 }
 0x3df   :  { %6084 = vrcp.f32 %v3619_v34 }
 0x3e0   :  { %v6079_v40 = vpop.eup %6078 }
 0x3e1   :  { %v3622_v11 = vpop.xlane.xlu0 %3621  ;;  %v3672_v13 = vmul.f32 %v6079_v40, %v8286_v50  ;;  %v9316_v40 = vld [vmem:[#allocation85_spill] sm:$0xff] }
 0x3e2   :  { %6086 = vrcp.f32 %v3622_v11  ;;  %v3625_v5 = vpop.xlane.xlu1 %3624 }
 0x3e3   :  { %6088 = vrcp.f32 %v3625_v5 }
 0x3e5   :  { %v6081_v18 = vpop.eup %6080  ;;  %v3628_v15 = vpop.xlane.xlu0 %3627 }
 0x3e6   :  { %6090 = vrcp.f32 %v3628_v15  ;;  %v3631_v35 = vpop.xlane.xlu1 %3630  ;;  %v3673_v6 = vmul.f32 %v6081_v18, %v8293_v27  ;;  %v6083_v2 = vpop.eup %6082 }
 0x3e7   :  { %6092 = vrcp.f32 %v3631_v35  ;;  %v3674_v38 = vmul.f32 %v6083_v2, %v8291_v63 }
 0x3e8   :  { %v3688_v25 = vpack.c.bf16 %v3673_v6, %v3672_v13 }
 0x3e9   :  { %v6085_v14 = vpop.eup %6084 }
 0x3ea   :  { %v3708_v17 = vsel %vm3253_vm2, %v3688_v25, 0  ;;  %v3675_v61 = vmul.f32 %v6085_v14, %v8299_v30 }
 0x3eb   :  { %5935 = vmatpush3.bf16.xpose.msra.mxu0 %v3708_v17 }
 0x3ec   :  { %v6087_v54 = vpop.eup %6086  ;;  %v3689_v57 = vpack.c.bf16 %v3675_v61, %v3674_v38  ;;  %5946 = vmatprep.subr.bf16.mxu0 %v6160_v37 }
 0x3ed   :  { %v6089_v22 = vpop.eup %6088  ;;  %v3676_v50 = vmul.f32 %v6087_v54, %v8305_v49 }
 0x3ee   :  { %v3754_v27 = vsel %vm3253_vm2, %v3689_v57, 0  ;;  %v3677_v47 = vmul.f32 %v6089_v22, %v8303_v48  ;;  %v9313_v48 = vld [vmem:[#allocation79_spill] sm:$0xff] }
 0x3ef   :  { %5941 = vmatpush3.bf16.xpose.msra.mxu1 %v3754_v27  ;;  %v3697_v10 = vpack.c.bf16 %v9313_v48, %v9313_v48  ;;  %v9318_v27 = vld [vmem:[#allocation82_spill] sm:$0xff] }
 0x3f0   :  { %v6091_v19 = vpop.eup %6090  ;;  %v3690_v63 = vpack.c.bf16 %v3677_v47, %v3676_v50  ;;  %5952 = vmatprep.subr.bf16.mxu1 %v6160_v37 }
 0x3f1   :  { %v6093_v30 = vpop.eup %6092  ;;  %v3678_v29 = vmul.f32 %v6091_v19, %v8313_v44 }
 0x3f2   :  { %5937 = vmatmul.mubr.msk.bf16.vlgmr.msra.gmra.mrb[8].mxu0 %vm3253_vm2, %v3696_v26  ;;  %v3800_v42 = vsel %vm3253_vm2, %v3690_v63, 0  ;;  %v3679_v49 = vmul.f32 %v6093_v30, %v8311_v53  ;;  %v3698_v53 = vpack.c.bf16 %v9314_v21, %v9314_v21 }
 0x3f3   :  { %5947 = vmatpush3.bf16.xpose.msra.mxu0 %v3800_v42  ;;  %5948 = vmatprep.mubr.msk.bf16.mxu0 %vm6161_vm3, %v6160_v37 }
 0x3f4   :  { %v3691_v58 = vpack.c.bf16 %v3679_v49, %v3678_v29  ;;  %5958 = vmatprep.subr.bf16.mxu0 %v6160_v37 }
 0x3f6   :  { %5943 = vmatmul.mubr.msk.bf16.vlgmr.msra.gmra.mrb[8].mxu1 %vm3253_vm2, %v3697_v10  ;;  %v3846_v44 = vsel %vm3253_vm2, %v3691_v58, 0 }
 0x3f7   :  { %5953 = vmatpush3.bf16.xpose.msra.mxu1 %v3846_v44  ;;  %5954 = vmatprep.mubr.msk.bf16.mxu1 %vm6161_vm3, %v6160_v37 }
 0x3f8   :  { %5964 = vmatprep.subr.bf16.mxu1 %v6160_v37 }
 0x3fa   :  { %5949 = vmatmul.mubr.msk.bf16.vlgmr.msra.gmra.mrb[12].mxu0 %vm3253_vm2, %v3698_v53 }
 0x3fb   :  { %5960 = vmatprep.mubr.msk.bf16.mxu0 %vm6161_vm3, %v6160_v37 }
 0x3fe   :  { %5955 = vmatmul.mubr.msk.bf16.vlgmr.msra.gmra.mrb[12].mxu1 %vm3253_vm2, %v3699_v31 }
 0x3ff   :  { %5966 = vmatprep.mubr.msk.bf16.mxu1 %vm6161_vm3, %v6160_v37 }
 0x406   :  { %v3637_v28 = vpop.xlane.xlu1 %3636 }
 0x407   :  { %6094 = vrcp.f32 %v3637_v28  ;;  %v3634_v62 = vpop.xlane.xlu0 %3633 }
 0x408   :  { %6096 = vrcp.f32 %v3634_v62 }
 0x40a   :  { %v3643_v24 = vpop.xlane.xlu1 %3642 }
 0x40b   :  { %6098 = vrcp.f32 %v3643_v24 }
 0x40c   :  { %v3640_v45 = vpop.xlane.xlu0 %3639 }
 0x40d   :  { %6100 = vrcp.f32 %v3640_v45 }
 0x411   :  { %v6095_v43 = vpop.eup %6094 }
 0x412   :  { %v6097_v12 = vpop.eup %6096  ;;  %v3681_v46 = vmul.f32 %v6095_v43, %v8329_v8  ;;  %v3700_v8 = vpack.c.bf16 %v9316_v40, %v9316_v40 }
 0x413   :  { %v3680_v32 = vmul.f32 %v6097_v12, %v8331_v41  ;;  %v9317_v41 = vld [vmem:[#allocation87_spill] sm:$0xff] }
 0x415   :  { %v3692_v33 = vpack.c.bf16 %v3681_v46, %v3680_v32  ;;  %v6099_v16 = vpop.eup %6098 }
 0x416   :  { %v3683_v9 = vmul.f32 %v6099_v16, %v8337_v3  ;;  %v3701_v3 = vpack.c.bf16 %v9317_v41, %v9317_v41  ;;  %v6163_v41 = vmov 1934713408  }
 0x417   :  { %v6101_v60 = vpop.eup %6100  ;;  %v3892_v36 = vsel %vm3253_vm2, %v3692_v33, 0 }
 0x418   :  { %5959 = vmatpush3.bf16.xpose.msra.mxu0 %v3892_v36  ;;  %v3682_v34 = vmul.f32 %v6101_v60, %v8339_v23 }
 0x419   :  { %5970 = vmatprep.subr.bf16.mxu0 %v6160_v37 }
 0x41a   :  { %v3693_v11 = vpack.c.bf16 %v3683_v9, %v3682_v34 }
 0x41c   :  { %v3938_v5 = vsel %vm3253_vm2, %v3693_v11, 0  ;;  %v6162_v11 = vmov 1983009808  }
 0x41d   :  { %5965 = vmatpush3.bf16.xpose.msra.mxu1 %v3938_v5  ;;  %v4331_v5 = vunpack.c.l.s4 %v6162_v11 }
 0x41e   :  { %5976 = vmatprep.subr.bf16.mxu1 %v6160_v37 }
 0x41f   :  { %5961 = vmatmul.mubr.msk.bf16.vlgmr.msra.gmra.mrb[16].mxu0 %vm3253_vm2, %v3700_v8  ;;  %v4332_v8 = vunpack.c.0.s8 %v4331_v5 }
 0x420   :  { %5972 = vmatprep.mubr.msk.bf16.mxu0 %vm6161_vm3, %v6160_v37 }
 0x424   :  { %5967 = vmatmul.mubr.msk.bf16.vlgmr.msra.gmra.mrb[16].mxu1 %vm3253_vm2, %v3701_v3  ;;  %v4395_v3 = vunpack.c.l.s4 %v6163_v41 }
 0x425   :  { %5978 = vmatprep.mubr.msk.bf16.mxu1 %vm6161_vm3, %v6160_v37 }
 0x43f   :  { %v3649_v23 = vpop.xlane.xlu1 %3648 }
 0x440   :  { %6102 = vrcp.f32 %v3649_v23  ;;  %v3646_v18 = vpop.xlane.xlu0 %3645 }
 0x441   :  { %6104 = vrcp.f32 %v3646_v18  ;;  %v9319_v18 = vld [vmem:[#allocation2_spill] sm:$0xff] }
 0x443   :  { %v3655_v15 = vpop.xlane.xlu1 %3654 }
 0x444   :  { %6106 = vrcp.f32 %v3655_v15  ;;  %v3652_v35 = vpop.xlane.xlu0 %3651  ;;  %v8438_v15 = vsub.s32 %v4332_v8, %v9319_v18 }
 0x445   :  { %6108 = vrcp.f32 %v3652_v35 }
 0x44a   :  { %v6103_v13 = vpop.eup %6102 }
 0x44b   :  { %v6105_v6 = vpop.eup %6104  ;;  %v3685_v2 = vmul.f32 %v6103_v13, %v8349_v1  ;;  %v3702_v1 = vpack.c.bf16 %v9318_v27, %v9318_v27 }
 0x44c   :  { %v3684_v25 = vmul.f32 %v6105_v6, %v8351_v59  ;;  %v3703_v59 = vpack.c.bf16 %v9302_v4, %v9302_v4 }
 0x44e   :  { %v6107_v14 = vpop.eup %6106  ;;  %v3694_v17 = vpack.c.bf16 %v3685_v2, %v3684_v25  ;;  %v4396_v2 = vunpack.c.0.s8 %v4395_v3 }
 0x44f   :  { %v6109_v38 = vpop.eup %6108  ;;  %v3687_v61 = vmul.f32 %v6107_v14, %v8357_v0 }
 0x450   :  { %v3984_v54 = vsel %vm3253_vm2, %v3694_v17, 0  ;;  %v3686_v57 = vmul.f32 %v6109_v38, %v8359_v51 }
 0x451   :  { %5971 = vmatpush3.bf16.xpose.msra.mxu0 %v3984_v54 }
 0x452   :  { %v3695_v22 = vpack.c.bf16 %v3687_v61, %v3686_v57  ;;  %5982 = vmatprep.subr.bf16.mxu0 %v6160_v37 }
 0x454   :  { %v4030_v50 = vsel %vm3253_vm2, %v3695_v22, 0  ;;  %v8443_v22 = vsub.s32 %v4396_v2, %v9319_v18 }
 0x455   :  { %5977 = vmatpush3.bf16.xpose.msra.mxu1 %v4030_v50 }
 0x456   :  { %5994 = vmatprep.subr.bf16.mxu1 %v6160_v37 }
 0x458   :  { %5973 = vmatmul.mubr.msk.bf16.vlgmr.msra.gmra.mrb[20].mxu0 %vm3253_vm2, %v3702_v1 }
 0x459   :  { %5990 = vmatprep.mubr.msk.bf16.mxu0 %vm6161_vm3, %v6160_v37 }
 0x45c   :  { %5979 = vmatmul.mubr.msk.bf16.vlgmr.msra.gmra.mrb[20].mxu1 %vm3253_vm2, %v3703_v59 }
 0x45d   :  { %6002 = vmatprep.mubr.msk.bf16.mxu1 %vm6161_vm3, %v6160_v37 }
 0x4c5   :  { %v3744_v0 = vpop.f32.mrb[8].mxu0 }
 0x4c6   :  { %4072 = vxpose.xlu0.b32.start.end [1/1] (short) (narrow) %v3744_v0, 16  ;;  %v5938_v51 = vpop.f32.mrb[9].mxu0 }
 0x4c7   :  { %v3747_v47 = vpop.f32.mrb[10].mxu0 }
 0x4c8   :  { %v5939_v19 = vpop.f32.mrb[11].mxu0 }
 0x4c9   :  { %v3790_v39 = vpop.f32.mrb[8].mxu1 }
 0x4ca   :  { %4104 = vxpose.xlu1.b32.start.end [1/1] (short) (narrow) %v3790_v39, 16  ;;  %v5944_v26 = vpop.f32.mrb[9].mxu1 }
 0x4cb   :  { %v3793_v63 = vpop.f32.mrb[10].mxu1 }
 0x4cc   :  { %v5945_v30 = vpop.f32.mrb[11].mxu1 }
 0x4cd   :  { %v3836_v29 = vpop.f32.mrb[12].mxu0 }
 0x4ce   :  { %4136 = vxpose.xlu0.b32.start.end [1/1] (short) (narrow) %v3836_v29, 16  ;;  %v5950_v42 = vpop.f32.mrb[13].mxu0 }
 0x4cf   :  { %v3839_v49 = vpop.f32.mrb[14].mxu0 }
 0x4d0   :  { %v5951_v4 = vpop.f32.mrb[15].mxu0 }
 0x4d1   :  { %v3882_v48 = vpop.f32.mrb[12].mxu1 }
 0x4d2   :  { %v5956_v10 = vpop.f32.mrb[13].mxu1 }
 0x4d3   :  { %4168 = vxpose.xlu0.b32.start.end [1/1] (short) (narrow) %v3882_v48, 16  ;;  %v3885_v58 = vpop.f32.mrb[14].mxu1 }
 0x4d4   :  { %v5957_v44 = vpop.f32.mrb[15].mxu1 }
 0x4f2   :  { %v3928_v21 = vpop.f32.mrb[16].mxu0 }
 0x4f3   :  { %4200 = vxpose.xlu1.b32.start.end [1/1] (short) (narrow) %v3928_v21, 16  ;;  %v5962_v53 = vpop.f32.mrb[17].mxu0 }
 0x4f4   :  { %v3931_v55 = vpop.f32.mrb[18].mxu0 }
 0x4f5   :  { %v5963_v31 = vpop.f32.mrb[19].mxu0 }
 0x4f7   :  { %v3974_v28 = vpop.f32.mrb[16].mxu1 }
 0x4f8   :  { %4232 = vxpose.xlu0.b32.start.end [1/1] (short) (narrow) %v3974_v28, 16  ;;  %v5968_v62 = vpop.f32.mrb[17].mxu1 }
 0x4f9   :  { %v3977_v24 = vpop.f32.mrb[18].mxu1 }
 0x4fa   :  { %v5969_v45 = vpop.f32.mrb[19].mxu1 }
 0x52b   :  { %v4020_v43 = vpop.f32.mrb[20].mxu0 }
 0x52c   :  { %4264 = vxpose.xlu1.b32.start.end [1/1] (short) (narrow) %v4020_v43, 16  ;;  %v5974_v12 = vpop.f32.mrb[21].mxu0 }
 0x52d   :  { %v4023_v46 = vpop.f32.mrb[22].mxu0 }
 0x52e   :  { %v5975_v32 = vpop.f32.mrb[23].mxu0 }
 0x52f   :  { %v4066_v33 = vpop.f32.mrb[20].mxu1 }
 0x530   :  { %4296 = vxpose.xlu0.b32.start.end [1/1] (short) (narrow) %v4066_v33, 16  ;;  %v5980_v16 = vpop.f32.mrb[21].mxu1 }
 0x531   :  { %v4069_v60 = vpop.f32.mrb[22].mxu1 }
 0x532   :  { %v5981_v36 = vpop.f32.mrb[23].mxu1 }
 0x546   :  { %v4088_v9 = vpop.trf.xlu0 }
 0x54a   :  { %v4089_v34 = vpop.trf.xlu0  ;;  %v4120_v6 = vpop.trf.xlu1 }
 0x54e   :  { %v4152_v40 = vpop.trf.xlu0  ;;  %v4121_v1 = vpop.trf.xlu1 }
 0x54f   :  { %v4328_v35 = vcombine.low %v4088_v9, %v4152_v40  ;;  %v4329_v13 = vcombine.high %v4088_v9, %v4152_v40 }
 0x551   :  { %v4336_v14 = vrot.slane %v4328_v35, %v8438_v15  ;;  %v4343_v17 = vrot.slane %v4329_v13, %v8438_v15 }
 0x552   :  { %v4153_v23 = vpop.trf.xlu0 }
 0x553   :  { %v4464_v54 = vcombine.low %v4089_v34, %v4153_v23  ;;  %v4465_v57 = vcombine.high %v4089_v34, %v4153_v23 }
 0x555   :  { %v4472_v39 = vrot.slane %v4464_v54, %v8438_v15  ;;  %v4479_v26 = vrot.slane %v4465_v57, %v8438_v15 }
 0x556   :  { %v4184_v25 = vpop.trf.xlu0 }
 0x557   :  { %v4344_v38 = vcombine.low %v4120_v6, %v4184_v25  ;;  %v4345_v61 = vcombine.high %v4120_v6, %v4184_v25 }
 0x559   :  { %v4352_v50 = vrot.slane %v4344_v38, %v8438_v15  ;;  %v4359_v27 = vrot.slane %v4345_v61, %v8438_v15 }
 0x55a   :  { %v4185_v59 = vpop.trf.xlu0 }
 0x55b   :  { %v4392_v0 = vcombine.low %v4336_v14, %v4352_v50  ;;  %v4393_v51 = vcombine.high %v4336_v14, %v4352_v50  ;;  %v4408_v47 = vcombine.low %v4343_v17, %v4359_v27  ;;  %v4409_v19 = vcombine.high %v4343_v17, %v4359_v27 }
 0x55c   :  { %v4480_v63 = vcombine.low %v4121_v1, %v4185_v59  ;;  %v4481_v30 = vcombine.high %v4121_v1, %v4185_v59 }
 0x55d   :  { %v4400_v29 = vrot.slane %v4392_v0, %v8443_v22  ;;  %v4407_v42 = vrot.slane %v4393_v51, %v8443_v22  ;;  %v4416_v49 = vrot.slane %v4408_v47, %v8443_v22  ;;  %v4423_v4 = vrot.slane %v4409_v19, %v8443_v22 }
 0x55e   :  { %v4488_v48 = vrot.slane %v4480_v63, %v8438_v15  ;;  %v4495_v10 = vrot.slane %v4481_v30, %v8438_v15 }
 0x55f   :  { %v5848_v58 = vcombine.low %v4400_v29, %v4407_v42  ;;  %v5850_v44 = vcombine.high %v4400_v29, %v4407_v42  ;;  %v5852_v21 = vcombine.low %v4416_v49, %v4423_v4  ;;  %v5854_v53 = vcombine.high %v4416_v49, %v4423_v4 }
 0x560   :  { %v4528_v55 = vcombine.low %v4472_v39, %v4488_v48  ;;  %v4529_v31 = vcombine.high %v4472_v39, %v4488_v48  ;;  %v4544_v28 = vcombine.low %v4479_v26, %v4495_v10  ;;  %v4545_v62 = vcombine.high %v4479_v26, %v4495_v10 }
 0x561   :  { %v4608_v24 = vrot.slane %v5848_v58, %v8438_v15  ;;  %v4624_v45 = vrot.slane %v5850_v44, %v8438_v15  ;;  %v4640_v43 = vrot.slane %v5852_v21, %v8438_v15  ;;  %v4656_v12 = vrot.slane %v5854_v53, %v8438_v15 }
 0x562   :  { %v4536_v46 = vrot.slane %v4528_v55, %v8443_v22  ;;  %v4543_v32 = vrot.slane %v4529_v31, %v8443_v22  ;;  %v4552_v33 = vrot.slane %v4544_v28, %v8443_v22  ;;  %v4559_v16 = vrot.slane %v4545_v62, %v8443_v22 }
 0x563   :  { %v4664_v60 = vcombine.low %v4608_v24, %v4624_v45  ;;  %v4696_v36 = vcombine.low %v4640_v43, %v4656_v12  ;;  %v4665_v9 = vcombine.high %v4608_v24, %v4624_v45  ;;  %v4697_v34 = vcombine.high %v4640_v43, %v4656_v12 }
 0x564   :  { %v5856_v11 = vcombine.low %v4536_v46, %v4543_v32  ;;  %v5858_v5 = vcombine.high %v4536_v46, %v4543_v32  ;;  %v5860_v40 = vcombine.low %v4552_v33, %v4559_v16  ;;  %v5862_v8 = vcombine.high %v4552_v33, %v4559_v16 }
 0x565   :  { %v8464_v41 = vrot.slane %v4664_v60, %v8443_v22  ;;  %v8467_v3 = vrot.slane %v4696_v36, %v8443_v22  ;;  %v4679_v23 = vrot.slane %v4665_v9, %v8443_v22  ;;  %v4711_v18 = vrot.slane %v4697_v34, %v8443_v22 }
 0x566   :  { %v4744_v35 = vrot.slane %v5856_v11, %v8438_v15  ;;  %v4760_v13 = vrot.slane %v5858_v5, %v8438_v15  ;;  %v4776_v6 = vrot.slane %v5860_v40, %v8438_v15  ;;  %v4792_v2 = vrot.slane %v5862_v8, %v8438_v15 }
 0x567   :  { %v4729_v25 = vcombine.high %v8464_v41, %v8467_v3  ;;  %v4730_v14 = vcombine.low %v4679_v23, %v4711_v18  ;;  %v4728_v17 = vcombine.low %v8464_v41, %v8467_v3  ;;  %v4731_v50 = vcombine.high %v4679_v23, %v4711_v18 }
 0x568   :  { %v4800_v38 = vcombine.low %v4744_v35, %v4760_v13  ;;  %v4832_v61 = vcombine.low %v4776_v6, %v4792_v2  ;;  %v4801_v54 = vcombine.high %v4744_v35, %v4760_v13  ;;  %v4833_v57 = vcombine.high %v4776_v6, %v4792_v2 }
 0x569   :  { %4874 = vrot.lane.b32.xlu1 %v4729_v25, %s6164_s1  ;;  %4882 = vrot.lane.b32.xlu0 %v4730_v14, %s6165_s3 }
 0x56a   :  { %v8480_v27 = vrot.slane %v4800_v38, %v8443_v22  ;;  %v8483_v1 = vrot.slane %v4832_v61, %v8443_v22  ;;  %v4815_v59 = vrot.slane %v4801_v54, %v8443_v22  ;;  %v4847_v0 = vrot.slane %v4833_v57, %v8443_v22 }
 0x56c   :  { %v4867_v51 = vcombine.high %v4815_v59, %v4847_v0  ;;  %v4864_v47 = vcombine.low %v8480_v27, %v8483_v1  ;;  %v4865_v19 = vcombine.high %v8480_v27, %v8483_v1  ;;  %v4866_v39 = vcombine.low %v4815_v59, %v4847_v0 }
 0x56d   :  { %4890 = vrot.lane.b32.xlu1 %v4731_v50, %s6166_s26 }
 0x56e   :  { %4892 = vrot.lane.b32.xlu0 %v4867_v51, %s6166_s26 }
 0x571   :  { %4876 = vrot.lane.b32.xlu1 %v4865_v19, %s6164_s1 }
 0x573   :  { %v4216_v26 = vpop.trf.xlu1 }
 0x575   :  { %4884 = vrot.lane.b32.xlu1 %v4866_v39, %s6165_s3 }
 0x577   :  { %v4217_v30 = vpop.trf.xlu1 }
 0x578   :  { %v4248_v63 = vpop.trf.xlu0 }
 0x57c   :  { %v4249_v29 = vpop.trf.xlu0 }
 0x5ac   :  { %v4280_v42 = vpop.trf.xlu1 }
 0x5ad   :  { %v4360_v49 = vcombine.low %v4216_v26, %v4280_v42  ;;  %v4361_v4 = vcombine.high %v4216_v26, %v4280_v42 }
 0x5af   :  { %v4368_v21 = vrot.slane %v4360_v49, %v8438_v15  ;;  %v4375_v53 = vrot.slane %v4361_v4, %v8438_v15 }
 0x5b0   :  { %v4312_v48 = vpop.trf.xlu0  ;;  %v4281_v10 = vpop.trf.xlu1 }
 0x5b1   :  { %v4376_v58 = vcombine.low %v4248_v63, %v4312_v48  ;;  %v4377_v44 = vcombine.high %v4248_v63, %v4312_v48  ;;  %v4496_v28 = vcombine.low %v4217_v30, %v4281_v10  ;;  %v4497_v62 = vcombine.high %v4217_v30, %v4281_v10 }
 0x5b3   :  { %v4384_v55 = vrot.slane %v4376_v58, %v8438_v15  ;;  %v4391_v31 = vrot.slane %v4377_v44, %v8438_v15  ;;  %v4504_v34 = vrot.slane %v4496_v28, %v8438_v15  ;;  %v4511_v11 = vrot.slane %v4497_v62, %v8438_v15 }
 0x5b4   :  { %v4313_v24 = vpop.trf.xlu0 }
 0x5b5   :  { %v4424_v45 = vcombine.low %v4368_v21, %v4384_v55  ;;  %v4425_v43 = vcombine.high %v4368_v21, %v4384_v55  ;;  %v4440_v12 = vcombine.low %v4375_v53, %v4391_v31  ;;  %v4441_v46 = vcombine.high %v4375_v53, %v4391_v31 }
 0x5b6   :  { %v4512_v32 = vcombine.low %v4249_v29, %v4313_v24  ;;  %v4513_v33 = vcombine.high %v4249_v29, %v4313_v24 }
 0x5b7   :  { %v4432_v16 = vrot.slane %v4424_v45, %v8443_v22  ;;  %v4439_v60 = vrot.slane %v4425_v43, %v8443_v22  ;;  %v4448_v36 = vrot.slane %v4440_v12, %v8443_v22  ;;  %v4455_v9 = vrot.slane %v4441_v46, %v8443_v22 }
 0x5b8   :  { %v4520_v5 = vrot.slane %v4512_v32, %v8438_v15  ;;  %v4527_v40 = vrot.slane %v4513_v33, %v8438_v15 }
 0x5b9   :  { %v5849_v8 = vcombine.low %v4432_v16, %v4439_v60  ;;  %v5851_v23 = vcombine.high %v4432_v16, %v4439_v60  ;;  %v5853_v18 = vcombine.low %v4448_v36, %v4455_v9  ;;  %v5855_v35 = vcombine.high %v4448_v36, %v4455_v9 }
 0x5ba   :  { %v4560_v13 = vcombine.low %v4504_v34, %v4520_v5  ;;  %v4561_v6 = vcombine.high %v4504_v34, %v4520_v5  ;;  %v4576_v2 = vcombine.low %v4511_v11, %v4527_v40  ;;  %v4577_v25 = vcombine.high %v4511_v11, %v4527_v40  ;;  %v4970_v11 = vld [vmem:[%s8823_s11] sm:$0xf] }
 0x5bb   :  { %v4615_v14 = vrot.slane %v5849_v8, %v8438_v15  ;;  %v4631_v38 = vrot.slane %v5851_v23, %v8438_v15  ;;  %v4647_v61 = vrot.slane %v5853_v18, %v8438_v15  ;;  %v4663_v54 = vrot.slane %v5855_v35, %v8438_v15  ;;  %v5869_v5 = vld.sshfl [vmem:[%s8824_s12] sm:$0x33 pattern:$0x75316420] }
 0x5bc   :  { %v4568_v57 = vrot.slane %v4560_v13, %v8443_v22  ;;  %v4575_v50 = vrot.slane %v4561_v6, %v8443_v22  ;;  %v4584_v59 = vrot.slane %v4576_v2, %v8443_v22  ;;  %v4591_v0 = vrot.slane %v4577_v25, %v8443_v22  ;;  %v4968_v23 = vld [vmem:[%s8825_s9] sm:$0xf] }
 0x5bd   :  { %v4680_v51 = vcombine.low %v4615_v14, %v4631_v38  ;;  %v4712_v19 = vcombine.low %v4647_v61, %v4663_v54  ;;  %v4681_v44 = vcombine.high %v4615_v14, %v4631_v38  ;;  %v4713_v21 = vcombine.high %v4647_v61, %v4663_v54 }
 0x5be   :  { %v5857_v39 = vcombine.low %v4568_v57, %v4575_v50  ;;  %v5859_v26 = vcombine.high %v4568_v57, %v4575_v50  ;;  %v5861_v63 = vcombine.low %v4584_v59, %v4591_v0  ;;  %v5863_v30 = vcombine.high %v4584_v59, %v4591_v0 }
 0x5bf   :  { %v4688_v29 = vrot.slane %v4680_v51, %v8443_v22  ;;  %v4720_v42 = vrot.slane %v4712_v19, %v8443_v22  ;;  %v4695_v24 = vrot.slane %v4681_v44, %v8443_v22  ;;  %v4727_v45 = vrot.slane %v4713_v21, %v8443_v22 }
 0x5c0   :  { %v4751_v49 = vrot.slane %v5857_v39, %v8438_v15  ;;  %v4767_v4 = vrot.slane %v5859_v26, %v8438_v15  ;;  %v4783_v48 = vrot.slane %v5861_v63, %v8438_v15  ;;  %v4799_v10 = vrot.slane %v5863_v30, %v8438_v15 }
 0x5c1   :  { %v4732_v58 = vcombine.low %v4688_v29, %v4720_v42  ;;  %v4733_v62 = vcombine.high %v4688_v29, %v4720_v42  ;;  %v4734_v32 = vcombine.low %v4695_v24, %v4727_v45  ;;  %v4735_v36 = vcombine.high %v4695_v24, %v4727_v45  ;;  %v5864_v29 = vld [vmem:[%s8826_s7] ss:$0 sm:$0xff] }
 0x5c2   :  { %v4816_v53 = vcombine.low %v4751_v49, %v4767_v4  ;;  %v4848_v55 = vcombine.low %v4783_v48, %v4799_v10  ;;  %v4817_v12 = vcombine.high %v4751_v49, %v4767_v4  ;;  %v4849_v46 = vcombine.high %v4783_v48, %v4799_v10 }
 0x5c3   :  { %4898 = vrot.lane.b32.xlu1 %v4732_v58, %s6167_s0  ;;  %v5234_v40 = vrot.slane %v5869_v5, %v9300_v56  ;;  %v5227_v8 = vcombine.high %v5869_v5, %v5869_v5 }
 0x5c4   :  { %v4824_v31 = vrot.slane %v4816_v53, %v8443_v22  ;;  %v4856_v28 = vrot.slane %v4848_v55, %v8443_v22  ;;  %v4831_v16 = vrot.slane %v4817_v12, %v8443_v22  ;;  %v4863_v60 = vrot.slane %v4849_v46, %v8443_v22 }
 0x5c5   :  { %v5247_v18 = vrot.slane %v5234_v40, %v9274_v20  ;;  %v8535_v35 = vrot.slane %v5227_v8, %v9300_v56  ;;  %v5242_v6 = vcombine.high %v5234_v40, %v5234_v40 }
 0x5c6   :  { %v4868_v43 = vcombine.low %v4824_v31, %v4856_v28  ;;  %v4869_v33 = vcombine.high %v4824_v31, %v4856_v28  ;;  %v4870_v9 = vcombine.low %v4831_v16, %v4863_v60  ;;  %v4871_v34 = vcombine.high %v4831_v16, %v4863_v60 }
 0x5c7   :  { %4906 = vrot.lane.b32.xlu1 %v4733_v62, %s6168_s27  ;;  %v5251_v13 = vrot.slane %v8535_v35, %v9274_v20  ;;  %v5255_v2 = vrot.slane %v5242_v6, %v9274_v20  ;;  %v4969_v6 = vld [vmem:[%s8828_s10] sm:$0x3] }
 0x5c8   :  { %4900 = vrot.lane.b32.xlu0 %v4868_v43, %s6167_s0 }
 0x5cb   :  { %4914 = vrot.lane.b32.xlu1 %v4734_v32, %s6169_s28 }
 0x5cc   :  { %4908 = vrot.lane.b32.xlu0 %v4869_v33, %s6168_s27 }
 0x5cf   :  { %4922 = vrot.lane.b32.xlu1 %v4735_v36, %s6170_s29 }
 0x5d0   :  { %4916 = vrot.lane.b32.xlu0 %v4870_v9, %s6169_s28 }
 0x5d3   :  { %4924 = vrot.lane.b32.xlu1 %v4871_v34, %s6170_s29 }
 0x5d7   :  { %5060 = vperm.xlu1 %6028, %v4970_v11  }
 0x5db   :  { %5011 = vperm.xlu1 %6028, %v4968_v23   ;;  %v4875_v25 = vpop.permute.xlu1 %4874  ;;  %v4883_v54 = vpop.permute.xlu0 %4882 }
 0x5dc   :  { %v4928_v0 = vsel %vm186_vm0, %v4728_v17, %v4875_v25 }
 0x5dd   :  { %v4930_v19 = vsel %vm3253_vm2, %v4928_v0, %v4883_v54  ;;  %v9320_v0 = vld [vmem:[#allocation16_spill] sm:$0xff] }
 0x5df   :  { %5261 = vperm.xlu1 %6028, %v5247_v18   ;;  %v4891_v14 = vpop.permute.xlu1 %4890 }
 0x5e0   :  { %v4893_v50 = vpop.permute.xlu0 %4892  ;;  %v4933_v26 = vsel %vm4932_vm4, %v4930_v19, %v4891_v14 }
 0x5e3   :  { %5265 = vperm.xlu1 %6028, %v5251_v13   ;;  %v4877_v38 = vpop.permute.xlu1 %4876  ;;  %v4967_v13 = vld [vmem:[%s8827_s8] sm:$0x3] }
 0x5e4   :  { %v4929_v63 = vsel %vm186_vm0, %v4864_v47, %v4877_v38 }
 0x5e7   :  { %5269 = vperm.xlu1 %6028, %v5255_v2   ;;  %v4885_v61 = vpop.permute.xlu1 %4884 }
 0x5e8   :  { %v4931_v41 = vsel %vm3253_vm2, %v4929_v63, %v4885_v61 }
 0x5e9   :  { %v4934_v27 = vsel %vm4932_vm4, %v4931_v41, %v4893_v50  ;;  %vm5575_vm4 = vcmask 31744  }
 0x635   :  { %v4899_v57 = vpop.permute.xlu1 %4898 }
 0x636   :  { %v4936_v3 = vsel %vm4935_vm5, %v4933_v26, %v4899_v57  ;;  %v9321_v26 = vld [vmem:[#allocation15_spill] sm:$0xff] }
 0x639   :  { %v4907_v59 = vpop.permute.xlu1 %4906 }
 0x63a   :  { %v4901_v51 = vpop.permute.xlu0 %4900  ;;  %v4939_v17 = vsel %vm4938_vm6, %v4936_v3, %v4907_v59  ;;  %v9322_v3 = vld [vmem:[#allocation17_spill] sm:$0xff] }
 0x63b   :  { %v4937_v4 = vsel %vm4935_vm5, %v4934_v27, %v4901_v51 }
 0x63d   :  { %v4915_v39 = vpop.permute.xlu1 %4914 }
 0x63e   :  { %v4909_v30 = vpop.permute.xlu0 %4908  ;;  %v4942_v42 = vsel %vm4941_vm7, %v4939_v17, %v4915_v39 }
 0x63f   :  { %v4940_v10 = vsel %vm4938_vm6, %v4937_v4, %v4909_v30  ;;  %v5243_v30 = vcombine.high %v8535_v35, %v8535_v35 }
 0x641   :  { %v4923_v49 = vpop.permute.xlu1 %4922  ;;  %v5259_v41 = vrot.slane %v5243_v30, %v9274_v20 }
 0x642   :  { %v4945_v1 = vsel %vm4944_vm8, %v4942_v42, %v4923_v49  ;;  %v4917_v47 = vpop.permute.xlu0 %4916 }
 0x643   :  { %v4953_v48 = vadd.f32 %v5864_v29, %v4945_v1  ;;  %v4943_v44 = vsel %vm4941_vm7, %v4940_v10, %v4917_v47 }
 0x645   :  { %v4957_v58 = vmin.f32 %v4953_v48, 0.0  ;;  %v4925_v21 = vpop.permute.xlu1 %4924  ;;  %vm4955_vm9 = vcmp.gt.f32.partialorder %v4953_v48, 0.0 }
 0x646   :  { %v4946_v53 = vsel %vm4944_vm8, %v4943_v44, %v4925_v21 }
 0x647   :  { %v4959_v55 = vmul.f32 1.442695, %v4957_v58  ;;  %v4954_v31 = vadd.f32 %v5864_v29, %v4946_v53 }
 0x649   :  { %6110 = vpow2.f32 %v4959_v55  ;;  %v4958_v28 = vmin.f32 %v4954_v31, 0.0  ;;  %vm4956_vm10 = vcmp.gt.f32.partialorder %v4954_v31, 0.0 }
 0x64b   :  { %v4961_v62 = vmul.f32 1.442695, %v4958_v28 }
 0x64d   :  { %6112 = vpow2.f32 %v4961_v62 }
 0x653   :  { %v6111_v24 = vpop.eup %6110 }
 0x654   :  { %v5865_v45 = vadd.f32 -1.0, %v6111_v24 }
 0x656   :  { %v4965_v43 = vsel %vm4955_vm9, %v4953_v48, %v5865_v45  ;;  %v5061_v2 = vpop.permute.xlu1 %5060 }
 0x657   :  { %v6113_v12 = vpop.eup %6112  ;;  %4973 = vxpose.xlu0.b32.start [1/2] (short) (narrow) %v4965_v43, 64 }
 0x658   :  { %v5866_v46 = vadd.f32 -1.0, %v6113_v12 }
 0x65a   :  { %v4966_v32 = vsel %vm4956_vm10, %v4954_v31, %v5866_v46  ;;  %v5012_v29 = vpop.permute.xlu1 %5011 }
 0x65b   :  { %4974 = vxpose.xlu0.b32.end [2/2] (short) (narrow) %v4966_v32, 64 }
 0x65e   :  { %v5262_v42 = vpop.permute.xlu1 %5261 }
 0x662   :  { %v5266_v49 = vpop.permute.xlu1 %5265 }
 0x666   :  { %v5270_v27 = vpop.permute.xlu1 %5269 }
 0x6d7   :  { %v4989_v33 = vpop.trf.xlu0 }
 0x6db   :  { %v4990_v16 = vpop.trf.xlu0 }
 0x6dc   :  { %v5005_v60 = vpack.c.bf16 %v4990_v16, %v4989_v33 }
 0x6de   :  { %5983 = vmatpush3.bf16.msra.mxu0 %v5005_v60  ;;  %5995 = vmatpush3.bf16.msra.mxu1 %v5005_v60 }
 0x6df   :  { %v4991_v36 = vpop.trf.xlu0  ;;  %5984 = vmatprep.subr.bf16.mxu0 %v6160_v37  ;;  %5996 = vmatprep.subr.bf16.mxu1 %v6160_v37 }
 0x6e3   :  { %v4992_v9 = vpop.trf.xlu0 }
 0x6e4   :  { %v5006_v34 = vpack.c.bf16 %v4992_v9, %v4991_v36 }
 0x6e6   :  { %5985 = vmatpush3.bf16.msra.mxu0 %v5006_v34  ;;  %5997 = vmatpush3.bf16.msra.mxu1 %v5006_v34 }
 0x6e7   :  { %v4993_v11 = vpop.trf.xlu0  ;;  %5986 = vmatprep.subr.bf16.mxu0 %v6160_v37  ;;  %5998 = vmatprep.subr.bf16.mxu1 %v6160_v37 }
 0x6eb   :  { %v4994_v5 = vpop.trf.xlu0 }
 0x6ec   :  { %v5007_v40 = vpack.c.bf16 %v4994_v5, %v4993_v11 }
 0x6ee   :  { %5987 = vmatpush3.bf16.msra.mxu0 %v5007_v40  ;;  %5999 = vmatpush3.bf16.msra.mxu1 %v5007_v40 }
 0x6ef   :  { %v4995_v8 = vpop.trf.xlu0  ;;  %5988 = vmatprep.subr.bf16.mxu0 %v6160_v37  ;;  %6000 = vmatprep.subr.bf16.mxu1 %v6160_v37 }
 0x6f3   :  { %v4996_v23 = vpop.trf.xlu0 }
 0x6f4   :  { %v5008_v18 = vpack.c.bf16 %v4996_v23, %v4995_v8 }
 0x6f6   :  { %5989 = vmatpush3.bf16.msra.mxu0 %v5008_v18  ;;  %6001 = vmatpush3.bf16.msra.mxu1 %v5008_v18 }
 0x6f7   :  { %6006 = vmatprep.subr.bf16.mxu0 %v6160_v37 }
 0x6f9   :  { %5991 = vmatmul.mubr.msk.bf16.vlgmr.msra.gmra.mrb[24].mxu0 %vm5014_vm11, %v4967_v13  ;;  %6003 = vmatmul.mubr.msk.bf16.vlgmr.msra.gmra.mrb[24].mxu1 %vm5014_vm11, %v4969_v6 }
 0x6fa   :  { %6008 = vmatprep.mubr.msk.bf16.mxu0 %vm6161_vm3, %v6160_v37  ;;  %vm5557_vm3 = vcmask 1047559  }
 0x7cc   :  { %v5052_v25 = vpop.f32.mrb[24].mxu0  ;;  %v5100_v14 = vpop.f32.mrb[24].mxu1 }
 0x7cd   :  { %v5101_v38 = vadd.f32 %v5100_v14, %v5061_v2  ;;  %v6004_v61 = vpop.f32.mrb[25].mxu1  ;;  %v5992_v54 = vpop.f32.mrb[25].mxu0  ;;  %v8583_v1 = vadd.f32 %v5052_v25, %v5012_v29 }
 0x7ce   :  { %v5103_v57 = vpop.f32.mrb[26].mxu1  ;;  %v5055_v50 = vpop.f32.mrb[26].mxu0 }
 0x7cf   :  { %v6005_v59 = vpop.f32.mrb[27].mxu1  ;;  %v5131_v51 = vrot.slane %v5101_v38, %v9320_v0  ;;  %v5109_v19 = vrot.slane %v5101_v38, %v9274_v20  ;;  %v5993_v39 = vpop.f32.mrb[27].mxu0  ;;  %v5120_v63 = vrot.slane %v5101_v38, %v9321_v26  ;;  %v5142_v17 = vrot.slane %v5101_v38, %v9322_v3 }
 0x7d0   :  { %v5157_v4 = vrot.slane %v8583_v1, %v9300_v56 }
 0x7d1   :  { %5133 = vbcast.lane.b32.xlu0 %v5131_v51, 256  ;;  %5111 = vbcast.lane.b32.xlu1 %v5109_v19, 256 }
 0x7d2   :  { %v5158_v35 = vcombine.high %v5157_v4, %v5157_v4  ;;  %v5165_v58 = vrot.slane %v5157_v4, %v9300_v56 }
 0x7d4   :  { %v5172_v10 = vrot.slane %v5158_v35, %v9300_v56  ;;  %v5173_v53 = vcombine.high %v5165_v58, %v5165_v58  ;;  %v5178_v55 = vrot.slane %v5165_v58, %v9274_v20 }
 0x7d5   :  { %5115 = vbcast.lane.b32.xlu1 %v5109_v19, 264 }
 0x7d6   :  { %v5182_v21 = vrot.slane %v5172_v10, %v9274_v20  ;;  %v5186_v45 = vrot.slane %v5173_v53, %v9274_v20  ;;  %v5174_v56 = vcombine.high %v5172_v10, %v5172_v10 }
 0x7d8   :  { %v5190_v23 = vrot.slane %v5174_v56, %v9274_v20 }
 0x7d9   :  { %5122 = vbcast.lane.b32.xlu1 %v5120_v63, 256 }
 0x7dd   :  { %5126 = vbcast.lane.b32.xlu1 %v5120_v63, 264 }
 0x7e1   :  { %5273 = vperm.xlu1 %6028, %v5259_v41  }
 0x7e5   :  { %5137 = vbcast.lane.b32.xlu1 %v5131_v51, 264 }
 0x7e9   :  { %5144 = vbcast.lane.b32.xlu1 %v5142_v17, 256 }
 0x7ed   :  { %5148 = vbcast.lane.b32.xlu1 %v5142_v17, 264 }
 0x843   :  { %v5112_v47 = vpop.permute.xlu1 %5111  ;;  %v5134_v62 = vpop.permute.xlu0 %5133 }
 0x844   :  { %v5195_v28 = vadd.f32 %v5178_v55, %v5112_v47  ;;  %v5199_v12 = vadd.f32 %v5186_v45, %v5134_v62 }
 0x846   :  { %v5203_v46 = vmul.f32 0.2, %v5195_v28  ;;  %v5207_v36 = vmul.f32 0.2, %v5199_v12 }
 0x847   :  { %v5116_v48 = vpop.permute.xlu1 %5115 }
 0x848   :  { %v5196_v16 = vadd.f32 %v5178_v55, %v5116_v48  ;;  %v5211_v9 = vmax.f32 %v5195_v28, %v5203_v46  ;;  %v5215_v18 = vmax.f32 %v5199_v12, %v5207_v36 }
 0x84a   :  { %v5204_v5 = vmul.f32 0.2, %v5196_v16  ;;  %v5276_v13 = vmul.f32 %v5262_v42, %v5211_v9  ;;  %v5280_v57 = vmul.f32 %v5270_v27, %v5215_v18 }
 0x84b   :  { %v5123_v44 = vpop.permute.xlu1 %5122 }
 0x84c   :  { %v5197_v31 = vadd.f32 %v5182_v21, %v5123_v44  ;;  %v5212_v14 = vmax.f32 %v5196_v16, %v5204_v5  ;;  %v5284_v50 = vsel %vm3253_vm2, %v5276_v13, 0.0  ;;  %v5287_v30 = vsel %vm3253_vm2, %v5280_v57, 0.0 }
 0x84d   :  { %v5323_v5 = vpack.c.bf16 %v8583_v1, %v8583_v1 }
 0x84e   :  { %v5205_v43 = vmul.f32 0.2, %v5197_v31  ;;  %v5277_v39 = vmul.f32 %v5262_v42, %v5212_v14 }
 0x84f   :  { %v5127_v24 = vpop.permute.xlu1 %5126 }
 0x850   :  { %v5198_v32 = vadd.f32 %v5182_v21, %v5127_v24  ;;  %v5213_v60 = vmax.f32 %v5197_v31, %v5205_v43  ;;  %v5291_v47 = vsel %vm3253_vm2, %v5277_v39, 0.0 }
 0x852   :  { %v5206_v34 = vmul.f32 0.2, %v5198_v32  ;;  %v5278_v40 = vmul.f32 %v5266_v49, %v5213_v60 }
 0x854   :  { %v5214_v6 = vmax.f32 %v5198_v32, %v5206_v34  ;;  %v5285_v38 = vsel %vm3253_vm2, %v5278_v40, 0.0 }
 0x855   :  { %v5286_v51 = vadd.f32 %v5285_v38, %v5284_v50 }
 0x856   :  { %v5279_v59 = vmul.f32 %v5266_v49, %v5214_v6 }
 0x857   :  { %v5288_v29 = vadd.f32 %v5287_v30, %v5286_v51 }
 0x858   :  { %v5292_v41 = vsel %vm3253_vm2, %v5279_v59, 0.0  ;;  %v5871_v59 = vld [vmem:[%s8829_s13] ss:$0 sm:$0xff]  ;;  %s6171_s13 = smov 4  }
 0x859   :  { %v5293_v48 = vadd.f32 %v5292_v41, %v5291_v47 }
 0x860   :  { %v5274_v33 = vpop.permute.xlu1 %5273 }
 0x864   :  { %v5138_v11 = vpop.permute.xlu1 %5137 }
 0x865   :  { %v5200_v8 = vadd.f32 %v5186_v45, %v5138_v11 }
 0x867   :  { %v5208_v2 = vmul.f32 0.2, %v5200_v8 }
 0x868   :  { %v5145_v25 = vpop.permute.xlu1 %5144 }
 0x869   :  { %v5216_v61 = vmax.f32 %v5200_v8, %v5208_v2  ;;  %v5201_v54 = vadd.f32 %v5190_v23, %v5145_v25 }
 0x86b   :  { %v5209_v0 = vmul.f32 0.2, %v5201_v54  ;;  %v5281_v26 = vmul.f32 %v5270_v27, %v5216_v61 }
 0x86c   :  { %v5149_v19 = vpop.permute.xlu1 %5148 }
 0x86d   :  { %v5217_v20 = vmax.f32 %v5201_v54, %v5209_v0  ;;  %v5202_v63 = vadd.f32 %v5190_v23, %v5149_v19  ;;  %v5294_v4 = vsel %vm3253_vm2, %v5281_v26, 0.0 }
 0x86e   :  { %v5295_v27 = vadd.f32 %v5294_v4, %v5293_v48 }
 0x86f   :  { %v5282_v3 = vmul.f32 %v5274_v33, %v5217_v20  ;;  %v5210_v17 = vmul.f32 0.2, %v5202_v63 }
 0x871   :  { %v5289_v49 = vsel %vm3253_vm2, %v5282_v3, 0.0  ;;  %v5218_v35 = vmax.f32 %v5202_v63, %v5210_v17 }
 0x872   :  { %v5290_v10 = vadd.f32 %v5289_v49, %v5288_v29 }
 0x873   :  { %v5283_v42 = vmul.f32 %v5274_v33, %v5218_v35 }
 0x874   :  { %v5298_v58 = vadd.f32 %v7370_v52, %v5290_v10 }
 0x875   :  { %v5296_v44 = vsel %vm3253_vm2, %v5283_v42, 0.0 }
 0x876   :  { %v5300_v21 = vsel %vm3253_vm2, %v5298_v58, -inf  ;;  %v5297_v53 = vadd.f32 %v5296_v44, %v5295_v27 }
 0x877   :  { %5301 = vmax.xlane.f32.xlu1 %v5300_v21 }
 0x878   :  { %v5299_v55 = vadd.f32 %v7393_v7, %v5297_v53 }
 0x87a   :  { %v5303_v31 = vsel %vm3253_vm2, %v5299_v55, -inf }
 0x87b   :  { %5304 = vmax.xlane.f32.xlu1 %v5303_v31 }
 0x904   :  { %v5302_v28 = vpop.xlane.xlu1 %5301 }
 0x905   :  { %v5306_v62 = vsub.f32 %v5298_v58, %v5302_v28 }
 0x907   :  { %v5308_v24 = vmul.f32 1.442695, %v5306_v62 }
 0x908   :  { %v5305_v45 = vpop.xlane.xlu1 %5304 }
 0x909   :  { %6114 = vpow2.f32 %v5308_v24  ;;  %v5307_v43 = vsub.f32 %v5299_v55, %v5305_v45 }
 0x90b   :  { %v5310_v12 = vmul.f32 1.442695, %v5307_v43 }
 0x90d   :  { %6116 = vpow2.f32 %v5310_v12 }
 0x913   :  { %v6115_v52 = vpop.eup %6114 }
 0x914   :  { %v5312_v46 = vsel %vm3253_vm2, %v6115_v52, 0.0 }
 0x915   :  { %5313 = vadd.xlane.f32.xlu1 %v5312_v46 }
 0x917   :  { %v6117_v32 = vpop.eup %6116 }
 0x918   :  { %v5315_v33 = vsel %vm3253_vm2, %v6117_v32, 0.0 }
 0x919   :  { %5316 = vadd.xlane.f32.xlu1 %v5315_v33 }
 0x9a2   :  { %v5314_v7 = vpop.xlane.xlu1 %5313 }
 0x9a3   :  { %6118 = vrcp.f32 %v5314_v7 }
 0x9a6   :  { %v5317_v16 = vpop.xlane.xlu1 %5316 }
 0x9a7   :  { %6120 = vrcp.f32 %v5317_v16 }
 0x9ad   :  { %v6119_v60 = vpop.eup %6118 }
 0x9ae   :  { %v5320_v36 = vmul.f32 %v6119_v60, %v6115_v52 }
 0x9b1   :  { %v6121_v56 = vpop.eup %6120 }
 0x9b2   :  { %v5321_v9 = vmul.f32 %v6121_v56, %v6117_v32 }
 0x9b4   :  { %v5322_v34 = vpack.c.bf16 %v5321_v9, %v5320_v36 }
 0x9b6   :  { %v5328_v11 = vsel %vm3253_vm2, %v5322_v34, 0 }
 0x9b7   :  { %6007 = vmatpush3.bf16.xpose.msra.mxu0 %v5328_v11 }
 0x9be   :  { %6009 = vmatmul.mubr.msk.bf16.vlgmr.msra.gmra.mrb[28].mxu0 %vm3253_vm2, %v5323_v5  ;;  %vm5554_vm2 = vcmask 1046534  }
 0xa91   :  { %v5364_v40 = vpop.f32.mrb[28].mxu0 }
 0xa92   :  { %5370 = vxpose.xlu0.b32.start.end [1/1] (short) (narrow) %v5364_v40, 16  ;;  %v6010_v8 = vpop.f32.mrb[29].mxu0 }
 0xa93   :  { %v5367_v23 = vpop.f32.mrb[30].mxu0 }
 0xa94   :  { %v6011_v18 = vpop.f32.mrb[31].mxu0 }
 0xb12   :  { %v5386_v13 = vpop.trf.xlu0 }
 0xb13   :  { %v5402_v6 = vcombine.high %v5386_v13, %v6160_v37  ;;  %v5409_v2 = vrot.slane %v5386_v13, %v8438_v15 }
 0xb15   :  { %v5416_v25 = vrot.slane %v5402_v6, %v8438_v15  ;;  %v5417_v14 = vcombine.high %v5409_v2, %v6160_v37  ;;  %v5424_v38 = vrot.slane %v5409_v2, %v8443_v22 }
 0xb16   :  { %v5387_v1 = vpop.trf.xlu0 }
 0xb17   :  { %v5431_v61 = vrot.slane %v5417_v14, %v8443_v22  ;;  %v5432_v54 = vcombine.high %v5416_v25, %v6160_v37  ;;  %v5439_v57 = vrot.slane %v5416_v25, %v8443_v22  ;;  %v5447_v50 = vcombine.high %v5424_v38, %v6160_v37 }
 0xb18   :  { %v5451_v0 = vcombine.high %v5387_v1, %v6160_v37  ;;  %v5458_v51 = vrot.slane %v5387_v1, %v8438_v15  ;;  %v5506_v29 = vadd.f32 %v5871_v59, %v5424_v38 }
 0xb19   :  { %v5446_v19 = vrot.slane %v5432_v54, %v8443_v22  ;;  %v5448_v39 = vcombine.high %v5431_v61, %v6160_v37  ;;  %v5449_v26 = vcombine.high %v5439_v57, %v6160_v37  ;;  %v8628_v20 = vadd.f32 %v5871_v59, %v5447_v50 }
 0xb1a   :  { %v8630_v63 = vadd.f32 %v5871_v59, %v5431_v61  ;;  %v8632_v30 = vadd.f32 %v5871_v59, %v5439_v57  ;;  %v5465_v41 = vrot.slane %v5451_v0, %v8438_v15  ;;  %v5466_v3 = vcombine.high %v5458_v51, %v6160_v37 }
 0xb1b   :  { %v5450_v17 = vcombine.high %v5446_v19, %v6160_v37  ;;  %v8637_v47 = vadd.f32 %v5871_v59, %v5448_v39  ;;  %v8639_v4 = vadd.f32 %v5871_v59, %v5449_v26  ;;  %v5538_v49 = vrot.slane %v8628_v20, 7 }
 0xb1c   :  { %v5541_v35 = vrot.slane %v8630_v63, 6  ;;  %v5473_v48 = vrot.slane %v5458_v51, %v8443_v22  ;;  %v5480_v15 = vrot.slane %v5466_v3, %v8443_v22  ;;  %v5481_v42 = vcombine.high %v5465_v41, %v6160_v37 }
 0xb1d   :  { %v5544_v10 = vrot.slane %v8637_v47, 5  ;;  %v5488_v27 = vrot.slane %v5465_v41, %v8443_v22  ;;  %v5512_v58 = vadd.f32 %v5871_v59, %v5446_v19  ;;  %v5540_v44 = vsel %vm5539_vm12, %v5538_v49, %v5506_v29 }
 0xb1e   :  { %v5547_v21 = vrot.slane %v8632_v30, 4  ;;  %v5496_v53 = vcombine.high %v5473_v48, %v6160_v37  ;;  %v5543_v55 = vsel %vm5542_vm13, %v5541_v35, %v5540_v44  ;;  %v5495_v31 = vrot.slane %v5481_v42, %v8443_v22 }
 0xb1f   :  { %v5497_v28 = vcombine.high %v5480_v15, %v6160_v37  ;;  %v5498_v62 = vcombine.high %v5488_v27, %v6160_v37  ;;  %v5514_v24 = vadd.f32 %v5871_v59, %v5473_v48  ;;  %v8657_v43 = vadd.f32 %v5871_v59, %v5480_v15 }
 0xb20   :  { %v8655_v45 = vadd.f32 %v5871_v59, %v5496_v53  ;;  %v5546_v12 = vsel %vm5545_vm14, %v5544_v10, %v5543_v55  ;;  %v5499_v52 = vcombine.high %v5495_v31, %v6160_v37  ;;  %v8663_v32 = vadd.f32 %v5871_v59, %v5488_v27 }
 0xb21   :  { %v8661_v46 = vadd.f32 %v5871_v59, %v5497_v28  ;;  %v5513_v33 = vadd.f32 %v5871_v59, %v5450_v17  ;;  %v8665_v7 = vadd.f32 %v5871_v59, %v5498_v62  ;;  %v5561_v16 = vrot.slane %v8657_v43, 6 }
 0xb22   :  { %v5559_v22 = vrot.slane %v8655_v45, 7  ;;  %v5549_v60 = vsel %vm5548_vm15, %v5547_v21, %v5546_v12  ;;  %v8670_v56 = vadd.f32 %v5871_v59, %v5495_v31  ;;  %v5550_v9 = vrot.slane %v8639_v4, 3 }
 0xb23   :  { %v5563_v36 = vrot.slane %v8661_v46, 5  ;;  %v5553_v34 = vrot.slane %v5512_v58, 2  ;;  %v8675_v11 = vadd.f32 %v5871_v59, %v5499_v52  ;;  %v5565_v40 = vrot.slane %v8663_v32, 4 }
 0xb24   :  { %v5560_v37 = vsel %vm5539_vm12, %v5559_v22, %v5514_v24  ;;  %v5552_v8 = vsel %vm5551_vm1, %v5550_v9, %v5549_v60  ;;  %v5556_v23 = vrot.slane %v5513_v33, 1  ;;  %v5567_v6 = vrot.slane %v8665_v7, 3 }
 0xb25   :  { %v5562_v5 = vsel %vm5542_vm13, %v5561_v16, %v5560_v37  ;;  %v5555_v18 = vsel %vm5554_vm2, %v5553_v34, %v5552_v8  ;;  %v5569_v14 = vrot.slane %v8670_v56, 2  ;;  %v5571_v61 = vrot.slane %v8675_v11, 1 }
 0xb26   :  { %v5564_v13 = vsel %vm5545_vm14, %v5563_v36, %v5562_v5  ;;  %v8684_v2 = vsel %vm5557_vm3, %v5556_v23, %v5555_v18 }
 0xb27   :  { %v5566_v25 = vsel %vm5548_vm15, %v5565_v40, %v5564_v13  ;;  %v5576_v38 = vsel %vm5575_vm4, %v8684_v2, -inf }
 0xb28   :  { %v5568_v1 = vsel %vm5551_vm1, %v5567_v6, %v5566_v25  ;;  %5577 = vmax.xlane.f32.xlu1 %v5576_v38 }
 0xb29   :  { %v5570_v54 = vsel %vm5554_vm2, %v5569_v14, %v5568_v1 }
 0xb2a   :  { %v8694_v57 = vsel %vm5557_vm3, %v5571_v61, %v5570_v54 }
 0xb2b   :  { %v5579_v50 = vsel %vm5575_vm4, %v8694_v57, -inf }
 0xb2c   :  { %5580 = vmax.xlane.f32.xlu1 %v5579_v50 }
 0xbb5   :  { %v5578_v59 = vpop.xlane.xlu1 %5577 }
 0xbb6   :  { %v5584_v0 = vrot.slane %v5578_v59, 1  ;;  %v5585_v51 = vrot.slane %v5578_v59, 2  ;;  %v5586_v19 = vrot.slane %v5578_v59, 3  ;;  %v5587_v39 = vrot.slane %v5578_v59, 4 }
 0xbb7   :  { %v8698_v26 = vsub.f32 %v5506_v29, %v5578_v59  ;;  %v5588_v41 = vrot.slane %v5578_v59, 5  ;;  %v5589_v3 = vrot.slane %v5578_v59, 6  ;;  %v5590_v17 = vrot.slane %v5578_v59, 7 }
 0xbb8   :  { %v8701_v49 = vsub.f32 %v8628_v20, %v5584_v0  ;;  %v8704_v35 = vsub.f32 %v8630_v63, %v5585_v51  ;;  %v8707_v48 = vsub.f32 %v8637_v47, %v5586_v19  ;;  %v8710_v10 = vsub.f32 %v8632_v30, %v5587_v39 }
 0xbb9   :  { %v5630_v15 = vmul.f32 1.442695, %v8698_v26  ;;  %v5581_v42 = vpop.xlane.xlu1 %5580  ;;  %v8714_v29 = vsub.f32 %v8639_v4, %v5588_v41  ;;  %v8716_v27 = vsub.f32 %v5512_v58, %v5589_v3  ;;  %v8718_v44 = vsub.f32 %v5513_v33, %v5590_v17 }
 0xbba   :  { %v5632_v20 = vmul.f32 1.442695, %v8701_v49  ;;  %v5591_v63 = vrot.slane %v5581_v42, 1  ;;  %v5592_v21 = vrot.slane %v5581_v42, 2  ;;  %v5593_v53 = vrot.slane %v5581_v42, 3 }
 0xbbb   :  { %6122 = vpow2.f32 %v5630_v15  ;;  %v5594_v47 = vrot.slane %v5581_v42, 4  ;;  %v8721_v55 = vsub.f32 %v5514_v24, %v5581_v42  ;;  %v5634_v30 = vmul.f32 1.442695, %v8704_v35 }
 0xbbc   :  { %v8725_v31 = vsub.f32 %v8655_v45, %v5591_v63  ;;  %v8728_v4 = vsub.f32 %v8657_v43, %v5592_v21  ;;  %6124 = vpow2.f32 %v5632_v20  ;;  %v5636_v58 = vmul.f32 1.442695, %v8707_v48 }
 0xbbd   :  { %v5646_v28 = vmul.f32 1.442695, %v8721_v55  ;;  %6126 = vpow2.f32 %v5634_v30  ;;  %v5638_v62 = vmul.f32 1.442695, %v8710_v10  ;;  %v5640_v12 = vmul.f32 1.442695, %v8714_v29 }
 0xbbe   :  { %6128 = vpow2.f32 %v5636_v58  ;;  %v5642_v24 = vmul.f32 1.442695, %v8716_v27  ;;  %v5644_v52 = vmul.f32 1.442695, %v8718_v44  ;;  %v5595_v45 = vrot.slane %v5581_v42, 5 }
 0xbbf   :  { %6130 = vpow2.f32 %v5646_v28  ;;  %v5596_v33 = vrot.slane %v5581_v42, 6  ;;  %v5597_v43 = vrot.slane %v5581_v42, 7  ;;  %v5648_v22 = vmul.f32 1.442695, %v8725_v31 }
 0xbc0   :  { %6132 = vpow2.f32 %v5638_v62  ;;  %v8738_v16 = vsub.f32 %v8661_v46, %v5593_v53  ;;  %v8741_v60 = vsub.f32 %v8663_v32, %v5594_v47  ;;  %v8744_v36 = vsub.f32 %v8665_v7, %v5595_v45 }
 0xbc1   :  { %6134 = vpow2.f32 %v5640_v12  ;;  %v8747_v9 = vsub.f32 %v8670_v56, %v5596_v33  ;;  %v5650_v37 = vmul.f32 1.442695, %v8728_v4  ;;  %v8751_v34 = vsub.f32 %v8675_v11, %v5597_v43 }
 0xbc2   :  { %6136 = vpow2.f32 %v5642_v24  ;;  %v5652_v5 = vmul.f32 1.442695, %v8738_v16  ;;  %v5654_v46 = vmul.f32 1.442695, %v8741_v60  ;;  %v5656_v32 = vmul.f32 1.442695, %v8744_v36 }
 0xbc3   :  { %6138 = vpow2.f32 %v5644_v52  ;;  %v5658_v7 = vmul.f32 1.442695, %v8747_v9  ;;  %v5660_v8 = vmul.f32 1.442695, %v8751_v34 }
 0xbc4   :  { %6140 = vpow2.f32 %v5648_v22 }
 0xbc5   :  { %v6123_v40 = vpop.eup %6122  ;;  %6142 = vpow2.f32 %v5650_v37 }
 0xbc6   :  { %v6125_v56 = vpop.eup %6124  ;;  %6144 = vpow2.f32 %v5652_v5 }
 0xbc7   :  { %v6127_v23 = vpop.eup %6126  ;;  %v5678_v18 = vrot.slane %v6125_v56, 7  ;;  %6146 = vpow2.f32 %v5654_v46 }
 0xbc8   :  { %v6129_v11 = vpop.eup %6128  ;;  %v5680_v13 = vrot.slane %v6127_v23, 6  ;;  %6148 = vpow2.f32 %v5656_v32 }
 0xbc9   :  { %v6131_v6 = vpop.eup %6130  ;;  %v5679_v25 = vsel %vm5539_vm12, %v5678_v18, %v6123_v40  ;;  %v5682_v14 = vrot.slane %v6129_v11, 5  ;;  %6150 = vpow2.f32 %v5658_v7 }
 0xbca   :  { %v6133_v38 = vpop.eup %6132  ;;  %v5681_v1 = vsel %vm5542_vm13, %v5680_v13, %v5679_v25  ;;  %6152 = vpow2.f32 %v5660_v8 }
 0xbcb   :  { %v6135_v61 = vpop.eup %6134  ;;  %v5683_v54 = vsel %vm5545_vm14, %v5682_v14, %v5681_v1  ;;  %v5684_v50 = vrot.slane %v6133_v38, 4 }
 0xbcc   :  { %v6137_v59 = vpop.eup %6136  ;;  %v5686_v0 = vrot.slane %v6135_v61, 3 }
 0xbcd   :  { %v6139_v51 = vpop.eup %6138  ;;  %v5685_v19 = vsel %vm5548_vm15, %v5684_v50, %v5683_v54  ;;  %v5688_v39 = vrot.slane %v6137_v59, 2 }
 0xbce   :  { %v6141_v41 = vpop.eup %6140  ;;  %v5687_v3 = vsel %vm5551_vm1, %v5686_v0, %v5685_v19  ;;  %v5690_v17 = vrot.slane %v6139_v51, 1 }
 0xbcf   :  { %v6143_v15 = vpop.eup %6142  ;;  %v5689_v42 = vsel %vm5554_vm2, %v5688_v39, %v5687_v3  ;;  %v5692_v20 = vrot.slane %v6141_v41, 7 }
 0xbd0   :  { %v6145_v63 = vpop.eup %6144  ;;  %v5691_v21 = vsel %vm5557_vm3, %v5690_v17, %v5689_v42  ;;  %v5694_v53 = vrot.slane %v6143_v15, 6 }
 0xbd1   :  { %v6147_v47 = vpop.eup %6146  ;;  %v5708_v30 = vsel %vm5575_vm4, %v5691_v21, 0.0  ;;  %v5693_v58 = vsel %vm5539_vm12, %v5692_v20, %v6131_v6  ;;  %v5696_v28 = vrot.slane %v6145_v63, 5 }
 0xbd2   :  { %v6149_v62 = vpop.eup %6148  ;;  %5709 = vadd.xlane.f32.xlu1 %v5708_v30  ;;  %v5695_v12 = vsel %vm5542_vm13, %v5694_v53, %v5693_v58  ;;  %v5698_v24 = vrot.slane %v6147_v47, 4 }
 0xbd3   :  { %v6151_v52 = vpop.eup %6150  ;;  %v5697_v45 = vsel %vm5545_vm14, %v5696_v28, %v5695_v12  ;;  %v5700_v33 = vrot.slane %v6149_v62, 3 }
 0xbd4   :  { %v6153_v43 = vpop.eup %6152  ;;  %v5699_v22 = vsel %vm5548_vm15, %v5698_v24, %v5697_v45  ;;  %v5702_v37 = vrot.slane %v6151_v52, 2 }
 0xbd5   :  { %v5701_v5 = vsel %vm5551_vm1, %v5700_v33, %v5699_v22  ;;  %v5704_v46 = vrot.slane %v6153_v43, 1 }
 0xbd6   :  { %v5703_v32 = vsel %vm5554_vm2, %v5702_v37, %v5701_v5 }
 0xbd7   :  { %v5705_v40 = vsel %vm5557_vm3, %v5704_v46, %v5703_v32 }
 0xbd8   :  { %v5711_v7 = vsel %vm5575_vm4, %v5705_v40, 0.0 }
 0xbd9   :  { %5712 = vadd.xlane.f32.xlu1 %v5711_v7 }
 0xc5f   :  { %v5710_v56 = vpop.xlane.xlu1 %5709 }
 0xc60   :  { %6154 = vlog2.f32 %v5710_v56 }
 0xc66   :  { %v5713_v8 = vpop.xlane.xlu1 %5712 }
 0xc67   :  { %6156 = vlog2.f32 %v5713_v8 }
 0xc6a   :  { %v6155_v23 = vpop.eup %6154 }
 0xc6b   :  { %v5715_v18 = vmul.f32 0.6931472, %v6155_v23 }
 0xc6d   :  { %v5720_v11 = vrot.slane %v5715_v18, 1  ;;  %v5721_v13 = vrot.slane %v5715_v18, 2  ;;  %v5722_v6 = vrot.slane %v5715_v18, 3  ;;  %v5723_v25 = vrot.slane %v5715_v18, 4 }
 0xc6e   :  { %v5724_v14 = vrot.slane %v5715_v18, 5  ;;  %v5725_v38 = vrot.slane %v5715_v18, 6  ;;  %v5726_v1 = vrot.slane %v5715_v18, 7  ;;  %v5750_v19 = vsub.f32 %v8698_v26, %v5715_v18 }
 0xc6f   :  { %v5751_v61 = vsub.f32 %v8701_v49, %v5720_v11  ;;  %v5752_v54 = vsub.f32 %v8704_v35, %v5721_v13  ;;  %v5753_v50 = vsub.f32 %v8707_v48, %v5722_v6  ;;  %v5754_v59 = vsub.f32 %v8710_v10, %v5723_v25 }
 0xc70   :  { %v5755_v0 = vsub.f32 %v8714_v29, %v5724_v14  ;;  %v5756_v39 = vsub.f32 %v8716_v27, %v5725_v38  ;;  %v5757_v15 = vsub.f32 %v8718_v44, %v5726_v1 }
 0xc71   :  { %v6157_v51 = vpop.eup %6156  ;;  %v5782_v41 = vrot.slane %v5751_v61, 7  ;;  %v5784_v3 = vrot.slane %v5752_v54, 6  ;;  %v5786_v42 = vrot.slane %v5753_v50, 5  ;;  %v5788_v35 = vrot.slane %v5754_v59, 4 }
 0xc72   :  { %v5717_v17 = vmul.f32 0.6931472, %v6157_v51  ;;  %v5790_v20 = vrot.slane %v5755_v0, 3  ;;  %v5792_v26 = vrot.slane %v5756_v39, 2  ;;  %v5794_v30 = vrot.slane %v5757_v15, 1 }
 0xc73   :  { %v5783_v49 = vsel %vm5539_vm12, %v5782_v41, %v5750_v19 }
 0xc74   :  { %v5785_v48 = vsel %vm5542_vm13, %v5784_v3, %v5783_v49  ;;  %v5727_v10 = vrot.slane %v5717_v17, 1  ;;  %v5728_v63 = vrot.slane %v5717_v17, 2  ;;  %v5729_v29 = vrot.slane %v5717_v17, 3 }
 0xc75   :  { %v5787_v21 = vsel %vm5545_vm14, %v5786_v42, %v5785_v48  ;;  %v5730_v53 = vrot.slane %v5717_v17, 4  ;;  %v5731_v27 = vrot.slane %v5717_v17, 5  ;;  %v5732_v58 = vrot.slane %v5717_v17, 6 }
 0xc76   :  { %v5789_v47 = vsel %vm5548_vm15, %v5788_v35, %v5787_v21  ;;  %v5759_v44 = vsub.f32 %v8725_v31, %v5727_v10  ;;  %v5733_v62 = vrot.slane %v5717_v17, 7  ;;  %v5760_v12 = vsub.f32 %v8728_v4, %v5728_v63 }
 0xc77   :  { %v5791_v28 = vsel %vm5551_vm1, %v5790_v20, %v5789_v47  ;;  %v5761_v24 = vsub.f32 %v8738_v16, %v5729_v29  ;;  %v5758_v45 = vsub.f32 %v8721_v55, %v5717_v17  ;;  %v5762_v33 = vsub.f32 %v8741_v60, %v5730_v53 }
 0xc78   :  { %v5793_v52 = vsel %vm5554_vm2, %v5792_v26, %v5791_v28  ;;  %v5763_v22 = vsub.f32 %v8744_v36, %v5731_v27  ;;  %v5796_v37 = vrot.slane %v5759_v44, 7  ;;  %v5798_v5 = vrot.slane %v5760_v12, 6 }
 0xc79   :  { %v5795_v43 = vsel %vm5557_vm3, %v5794_v30, %v5793_v52  ;;  %v5764_v31 = vsub.f32 %v8747_v9, %v5732_v58  ;;  %v5765_v4 = vsub.f32 %v8751_v34, %v5733_v62  ;;  %v5800_v46 = vrot.slane %v5761_v24, 5 }
 0xc7a   :  { %5810 = vrot.lane.b32.xlu1 %v5795_v43, %s6171_s13  ;;  %v5797_v16 = vsel %vm5539_vm12, %v5796_v37, %v5758_v45  ;;  %v5802_v55 = vrot.slane %v5762_v33, 4  ;;  %v5804_v40 = vrot.slane %v5763_v22, 3 }
 0xc7b   :  { %v5799_v32 = vsel %vm5542_vm13, %v5798_v5, %v5797_v16  ;;  %v5806_v36 = vrot.slane %v5764_v31, 2  ;;  %v5808_v8 = vrot.slane %v5765_v4, 1 }
 0xc7c   :  { %v5801_v60 = vsel %vm5545_vm14, %v5800_v46, %v5799_v32 }
 0xc7d   :  { %v5803_v7 = vsel %vm5548_vm15, %v5802_v55, %v5801_v60 }
 0xc7e   :  { %v5805_v56 = vsel %vm5551_vm1, %v5804_v40, %v5803_v7 }
 0xc7f   :  { %v5807_v23 = vsel %vm5554_vm2, %v5806_v36, %v5805_v56 }
 0xc80   :  { %v5809_v9 = vsel %vm5557_vm3, %v5808_v8, %v5807_v23 }
 0xc81   :  { %5812 = vrot.lane.b32.xlu0 %v5809_v9, %s6171_s13 }
 0xcec   :  { %v5811_v34 = vpop.permute.xlu1 %5810 }
 0xced   :  { %v5816_v18 = vsel %vm5575_vm4, %v8684_v2, %v5811_v34 }
 0xcee   :  { %5818 = vst.msk [vmem:[%s8830_s14] sm:$0xff] %vm186_vm0, %v5816_v18 }
 0xcf3   :  { %v5813_v11 = vpop.permute.xlu0 %5812 }
 0xcf4   :  { %v5817_v13 = vsel %vm5575_vm4, %v8694_v57, %v5813_v11 }
 0xcf5   :  { %5819 = vst.msk [vmem:[%s8830_s14 + $0x8] sm:$0xff] %vm186_vm0, %v5817_v13 }

</bundles_post_ra>
